<compile_context>
chip_gen: v5e
topology: v5e:2x2
jax: 0.10.0
libtpu: 0.0.40
codegen_flags: <defaults>
</compile_context>

<pallas_src>
import jax
import jax.numpy as jnp
from jax.experimental import pallas as pl

NUM_CLASSES = 4
DENSE_FEAT = 1024          # densenet121.features output channels
EFF_FEAT = 2048            # efficientnet_b5.features output channels
COMBINED_FEAT = DENSE_FEAT + EFF_FEAT   # 3072
HIDDEN = 512
BN_EPS = 1e-5
OUT_LANES = 128            # pad the 4-class output to a full lane tile


# ----------------------------------------------------------------------------
# Fused kernel: global-avg-pool -> pointwise projection stub -> Linear (BN
# folded) -> ReLU -> Dropout(identity, eval) -> Linear -> Sigmoid.
#   x_ref  : [B, 3, S]     f32   NCHW image, spatial flattened to lane-dense S
#   wf_ref : [3, 3072]     f32   concat(w_dense, w_eff) pointwise projection
#   w1_ref : [3072, 512]   bf16  BN-folded classifier weight
#   b1_ref : [1, 512]      f32   BN-folded classifier bias
#   w2_ref : [512, 128]    bf16  zero-padded (4 -> 128) output weight
#   b2_ref : [1, 128]      f32   zero-padded output bias
#   o_ref  : [B, 128]      f32   sigmoid probabilities (first 4 lanes valid)
# ----------------------------------------------------------------------------
def fused_forward_kernel(x_ref, wf_ref, w1_ref, b1_ref, w2_ref, b2_ref, o_ref):
    # AdaptiveAvgPool2d((1,1)) == lane-axis mean.  Pooling before the pointwise
    # projection is exact (both linear) and removes the [S, Cout] intermediate.
    pooled = jnp.mean(x_ref[...], axis=-1)                               # [B, 3]
    combined = jnp.dot(pooled, wf_ref[...],
                       preferred_element_type=jnp.float32)               # [B, 3072]
    # Linear(3072->512) with BatchNorm1d (eval, running stats) pre-folded.
    h = jnp.dot(combined.astype(jnp.bfloat16), w1_ref[...],
                preferred_element_type=jnp.float32) + b1_ref[...]        # [B, 512]
    h = jnp.maximum(h, 0.0)                                              # ReLU
    # Dropout(p=0.4) is identity at inference time.
    logits = jnp.dot(h.astype(jnp.bfloat16), w2_ref[...],
                     preferred_element_type=jnp.float32) + b2_ref[...]   # [B, 128]
    o_ref[...] = jax.nn.sigmoid(logits)


# ----------------------------------------------------------------------------
# Forward pass wrapper.
# ----------------------------------------------------------------------------
def hybrid_lung_model(x_nchw, fused):
    B, C, H, W = x_nchw.shape
    S = H * W
    # Free reshape: channels-first stays put, spatial axis becomes the
    # lane-dense last dim (multiple of 128).  No XLA transpose.
    x_bcs = x_nchw.reshape(B, C, S).astype(jnp.float32)

    # Everything fits comfortably in VMEM at these sizes (x ~6 KiB, w1 ~3 MiB),
    # so a single grid-free call with whole-array blocks is the fastest
    # structure: one launch, w1 streamed from HBM exactly once.
    # TODO(synk): at real image sizes (e.g. 512x512) tile the spatial axis with
    # a grid + VMEM accumulator so per-block input stays under v7x's 64 MiB VMEM.
    out = pl.pallas_call(
        fused_forward_kernel,
        out_shape=jax.ShapeDtypeStruct((B, OUT_LANES), jnp.float32),
    )(x_bcs, fused["w_feat"], fused["w1"], fused["b1"], fused["w2"], fused["b2"])

    # Drop the lane padding on the class dimension.
    return out[:, :NUM_CLASSES]


# ----------------------------------------------------------------------------
# Parameter prep: fold BN, concat stub weights, pad head, cast to bf16.
# ----------------------------------------------------------------------------
def prepare_params(p):
    scale = p["bn_gamma"] * jax.lax.rsqrt(p["bn_var"] + BN_EPS)          # [1, 512]
    w1_folded = p["w1"] * scale                                          # [3072, 512]
    b1_folded = (p["b1"] - p["bn_mean"]) * scale + p["bn_beta"]          # [1, 512]
    w2_pad = jnp.zeros((HIDDEN, OUT_LANES), jnp.float32).at[:, :NUM_CLASSES].set(p["w2"])
    b2_pad = jnp.zeros((1, OUT_LANES), jnp.float32).at[:, :NUM_CLASSES].set(p["b2"])
    return {
        "w_feat": jnp.concatenate([p["w_dense"], p["w_eff"]], axis=1),   # [3, 3072] f32
        "w1": w1_folded.astype(jnp.bfloat16),
        "b1": b1_folded.astype(jnp.float32),
        "w2": w2_pad.astype(jnp.bfloat16),
        "b2": b2_pad,
    }


def init_params(key):
    ks = jax.random.split(key, 8)
    in_ch = 3
    comb = COMBINED_FEAT
    return {
        # backbone stubs (deterministic, not pretrained)
        "w_dense": 0.05 * jax.random.normal(ks[0], (in_ch, DENSE_FEAT), jnp.float32),
        "w_eff":   0.05 * jax.random.normal(ks[1], (in_ch, EFF_FEAT), jnp.float32),
        # classifier
        "w1": (1.0 / jnp.sqrt(comb)) * jax.random.normal(ks[2], (comb, HIDDEN), jnp.float32),
        "b1": 0.01 * jax.random.normal(ks[3], (1, HIDDEN), jnp.float32),
        "bn_gamma": jnp.ones((1, HIDDEN), jnp.float32),
        "bn_beta": jnp.zeros((1, HIDDEN), jnp.float32),
        "bn_mean": 0.1 * jax.random.normal(ks[4], (1, HIDDEN), jnp.float32),
        "bn_var": 1.0 + 0.1 * jax.random.uniform(ks[5], (1, HIDDEN), jnp.float32),
        "w2": (1.0 / jnp.sqrt(512.0)) * jax.random.normal(ks[6], (HIDDEN, NUM_CLASSES), jnp.float32),
        "b2": 0.01 * jax.random.normal(ks[7], (1, NUM_CLASSES), jnp.float32),
    }


if __name__ == "__main__":
    key = jax.random.PRNGKey(0)
    pkey, xkey = jax.random.split(key)
    params = init_params(pkey)
    fused = prepare_params(params)

    # Small NCHW input consistent with an RGB image model: [B=2, C=3, H=16, W=16]
    x = jax.random.normal(xkey, (2, 3, 16, 16), jnp.float32)

    out = jax.jit(hybrid_lung_model)(x, fused)
    out = jax.block_until_ready(out)

    assert out.shape == (2, NUM_CLASSES), out.shape
    assert out.dtype == jnp.float32
    assert bool(jnp.all((out >= 0.0) & (out <= 1.0)))  # sigmoid output range
    print("KERNEL_OK")
</pallas_src>

<mosaic_0001>
module attributes {stable_mosaic.version = 11 : i64} {
  func.func @fused_forward_kernel(%arg0: memref<2x3x256xf32, #tpu.memory_space<vmem>>, %arg1: memref<3x3072xf32, #tpu.memory_space<vmem>>, %arg2: memref<3072x512xbf16, #tpu.memory_space<vmem>>, %arg3: memref<1x512xf32, #tpu.memory_space<vmem>>, %arg4: memref<512x128xbf16, #tpu.memory_space<vmem>>, %arg5: memref<1x128xf32, #tpu.memory_space<vmem>>, %arg6: memref<2x128xf32, #tpu.memory_space<vmem>>) attributes {dimension_semantics = [], scalar_prefetch = 0 : i64, scratch_operands = 0 : i64, tpu.core_type = #tpu.core_type<tc>} {
    %c0 = arith.constant 0 : index
    %c0_0 = arith.constant 0 : index
    %c0_1 = arith.constant 0 : index
    %0 = vector.load %arg0[%c0, %c0_0, %c0_1] : memref<2x3x256xf32, #tpu.memory_space<vmem>>, vector<2x3x256xf32>
    %cst = arith.constant dense<0.000000e+00> : vector<2x3xf32>
    %1 = vector.multi_reduction <add>, %0, %cst [2] : vector<2x3x256xf32> to vector<2x3xf32>
    %cst_2 = arith.constant 2.560000e+02 : f32
    %2 = vector.broadcast %cst_2 : f32 to vector<2x3xf32>
    %3 = arith.divf %1, %2 : vector<2x3xf32>
    %c0_3 = arith.constant 0 : index
    %c0_4 = arith.constant 0 : index
    %4 = vector.load %arg1[%c0_3, %c0_4] : memref<3x3072xf32, #tpu.memory_space<vmem>>, vector<3x3072xf32>
    %cst_5 = arith.constant dense<0.000000e+00> : vector<2x3072xf32>
    %5 = tpu.matmul %3, %4, %cst_5 {dimension_numbers = #tpu.dot_dimension_numbers<[1], [0], [0], [1], [0, 0, 1, 1], [], []>} : vector<2x3xf32>, vector<3x3072xf32>, vector<2x3072xf32> -> vector<2x3072xf32>
    %6 = arith.truncf %5 : vector<2x3072xf32> to vector<2x3072xbf16>
    %c0_6 = arith.constant 0 : index
    %c0_7 = arith.constant 0 : index
    %7 = vector.load %arg2[%c0_6, %c0_7] : memref<3072x512xbf16, #tpu.memory_space<vmem>>, vector<3072x512xbf16>
    %cst_8 = arith.constant dense<0.000000e+00> : vector<2x512xf32>
    %8 = tpu.matmul %6, %7, %cst_8 {dimension_numbers = #tpu.dot_dimension_numbers<[1], [0], [0], [1], [0, 0, 1, 1], [], []>} : vector<2x3072xbf16>, vector<3072x512xbf16>, vector<2x512xf32> -> vector<2x512xf32>
    %c0_9 = arith.constant 0 : index
    %c0_10 = arith.constant 0 : index
    %9 = vector.load %arg3[%c0_9, %c0_10] : memref<1x512xf32, #tpu.memory_space<vmem>>, vector<1x512xf32>
    %10 = vector.broadcast %9 : vector<1x512xf32> to vector<2x512xf32>
    %11 = arith.addf %8, %10 : vector<2x512xf32>
    %cst_11 = arith.constant 0.000000e+00 : f32
    %12 = vector.broadcast %cst_11 : f32 to vector<2x512xf32>
    %13 = arith.maximumf %11, %12 : vector<2x512xf32>
    %14 = arith.truncf %13 : vector<2x512xf32> to vector<2x512xbf16>
    %c0_12 = arith.constant 0 : index
    %c0_13 = arith.constant 0 : index
    %15 = vector.load %arg4[%c0_12, %c0_13] : memref<512x128xbf16, #tpu.memory_space<vmem>>, vector<512x128xbf16>
    %cst_14 = arith.constant dense<0.000000e+00> : vector<2x128xf32>
    %16 = tpu.matmul %14, %15, %cst_14 {dimension_numbers = #tpu.dot_dimension_numbers<[1], [0], [0], [1], [0, 0, 1, 1], [], []>} : vector<2x512xbf16>, vector<512x128xbf16>, vector<2x128xf32> -> vector<2x128xf32>
    %c0_15 = arith.constant 0 : index
    %c0_16 = arith.constant 0 : index
    %17 = vector.load %arg5[%c0_15, %c0_16] : memref<1x128xf32, #tpu.memory_space<vmem>>, vector<1x128xf32>
    %18 = vector.broadcast %17 : vector<1x128xf32> to vector<2x128xf32>
    %19 = arith.addf %16, %18 : vector<2x128xf32>
    %20 = arith.negf %19 : vector<2x128xf32>
    %21 = math.exp %20 : vector<2x128xf32>
    %cst_17 = arith.constant 1.000000e+00 : f32
    %22 = vector.broadcast %cst_17 : f32 to vector<2x128xf32>
    %23 = arith.addf %22, %21 : vector<2x128xf32>
    %24 = arith.divf %22, %23 : vector<2x128xf32>
    %c0_18 = arith.constant 0 : index
    %c0_19 = arith.constant 0 : index
    %25 = vector.load %arg6[%c0_18, %c0_19] : memref<2x128xf32, #tpu.memory_space<vmem>>, vector<2x128xf32>
    tpu.vector_store %arg6[%c0_18, %c0_19], %24 {strides = array<i32>} : memref<2x128xf32, #tpu.memory_space<vmem>>, vector<2x128xf32>,
    return
  }
}

</mosaic_0001>

<bundles_post_ra>
// kernel: hybrid_lung_model.1
= control target key start
LH: loop header
LB: loop body
LE: loop exit
PB: predicated region body
PF: predicated region fallthrough
CT: control target
= control target key end

     0   :  { %11 = vsyncpa [#allocation3], 0  ;;  %s11544_s0 = inlined_call_operand.vmem [shape: f32[2,3,256], index: 0, kind: input, shape index: {}]   ;;  %s11545_s1 = inlined_call_operand.hbm [shape: f32[3,3072], index: 1, kind: input, shape index: {}]   ;;  %s11546_s2 = inlined_call_operand.hbm [shape: bf16[3072,512], index: 2, kind: input, shape index: {}]   ;;  %s11547_s3 = inlined_call_operand.hbm [shape: f32[1,512], index: 3, kind: input, shape index: {}]   ;;  %s11548_s4 = inlined_call_operand.hbm [shape: bf16[512,128], index: 4, kind: input, shape index: {}]   ;;  %s11549_s5 = inlined_call_operand.hbm [shape: f32[1,128], index: 5, kind: input, shape index: {}]   ;;  %s11550_s6 = inlined_call_operand.hbm [shape: f32[2,128], index: 6, kind: output, shape index: {}]  }
   0x1   :  { %12 = vsyncpa [#allocation6], 0 }
   0x2   :  { %13 = vsyncpa [#allocation9], 0  ;;  %s32_s23 = sshll.u32 %s11546_s2, 4  ;;  %s33_s23 = int_to_ptr.hbm [resolvable:$true] %s32_s23 }
   0x3   :  { %14 = vsyncpa [#allocation4], 0  ;;  %s11204_s24 = smov [#allocation5]   ;;  %s56_s28 = sshll.u32 %s11548_s4, 4  ;;  %s57_s28 = int_to_ptr.hbm [resolvable:$true] %s56_s28 }
   0x4   :  { %s34_s25 = sshll.u32 %s11204_s24, 4  ;;  %s11205_s29 = smov 256   ;;  %s35_s25 = int_to_ptr.vmem [resolvable:$true] %s34_s25 }
   0x5   :  { %s11206_s30 = smov 16   ;;  %s11207_s7 = smov [#allocation8]  }
   0x6   :  { %40 = dma.hbm_to_vmem [thread:$0]  %s33_s23, 98304, %s35_s25, [#allocation6], %s11205_s29, %s11205_s29, %s11206_s30  }
   0x7   :  { %s58_s8 = sshll.u32 %s11207_s7, 4  ;;  %s11208_s9 = smov 64   ;;  %s59_s8 = int_to_ptr.vmem [resolvable:$true] %s58_s8 }
   0x8   :  { %s11209_s10 = smov 4   ;;  %s22_s12 = sshll.u32 %s11545_s1, 4  ;;  %s23_s12 = int_to_ptr.hbm [resolvable:$true] %s22_s12 }
   0x9   :  { %64 = dma.hbm_to_vmem [thread:$0]  %s57_s28, 4096, %s59_s8, [#allocation9], %s11208_s9, %s11208_s9, %s11209_s10  }
   0xa   :  { %s11210_s13 = smov [#allocation2]   ;;  %s46_s16 = sshll.u32 %s11547_s3, 4  ;;  %s47_s16 = int_to_ptr.hbm [resolvable:$true] %s46_s16 }
   0xb   :  { %s24_s14 = sshll.u32 %s11210_s13, 4  ;;  %s11211_s17 = smov [#allocation7]   ;;  %s25_s14 = int_to_ptr.vmem [resolvable:$true] %s24_s14 }
   0xc   :  { %27 = dma.hbm_to_vmem [thread:$0]  %s23_s12, 1536, %s25_s14, [#allocation3]  }
   0xd   :  { %s48_s18 = sshll.u32 %s11211_s17, 4  ;;  %s70_s21 = sshll.u32 %s11549_s5, 4  ;;  %s49_s18 = int_to_ptr.vmem [resolvable:$true] %s48_s18  ;;  %s71_s21 = int_to_ptr.hbm [resolvable:$true] %s70_s21 }
   0xe   :  { %51 = dma.hbm_to_vmem [thread:$0]  %s47_s16, 64, %s49_s18, [#allocation6]  }
   0xf   :  { %s11212_s1 = smov [#allocation10]  }
  0x10   :  { %s72_s22 = sshll.u32 %s11212_s1, 4  ;;  %s73_s22 = int_to_ptr.vmem [resolvable:$true] %s72_s22 }
  0x11   :  { %75 = dma.hbm_to_vmem [thread:$0]  %s71_s21, 16, %s73_s22, [#allocation9]  }
  0x12   :  { %11196 = dma.done.wait [#allocation3], 1536  }
  0x13   :  { %11197 = vsyncadd [#allocation3], 4294965760 }
  0x14   :  { %11198 = dma.done.wait [#allocation6], 98368  }
  0x15   :  { %11199 = vsyncadd [#allocation6], 4294868928 }
  0x16   :  { %11200 = dma.done.wait [#allocation9], 4112  }
  0x17   :  { %11201 = vsyncadd [#allocation9], 4294963184  ;;  %v96_v0 = vld [vmem:[%s11544_s0] sm:$0x77]  ;;  %v97_v1 = vld [vmem:[%s11544_s0 + $0x8] sm:$0x77]  ;;  %v145_v47 = vlaneseq }
  0x18   :  { %100 = vst [vmem:[#allocation1] ss:$2 sm:$0xff] %v96_v0  ;;  %vm111_vm0 = vcmask 1042432   ;;  %v131_v2 = vld [vmem:[#allocation2] sm:$0x77]  ;;  %v11213_v14 = vmov 256.0  }
  0x19   :  { %104 = vst [vmem:[#allocation1 + $0x10] ss:$2 sm:$0xff] %v97_v1  ;;  %v132_v3 = vld [vmem:[#allocation2 + $0x8] sm:$0x77]  ;;  %11043 = vrcp.f32 %v11213_v14  ;;  %v135_v17 = vld [vmem:[#allocation2 + $0x20] sm:$0x77] }
  0x1a   :  { %v136_v19 = vld [vmem:[#allocation2 + $0x28] sm:$0x77]  ;;  %v133_v20 = vld [vmem:[#allocation2 + $0x10] sm:$0x77]  ;;  %v134_v23 = vld [vmem:[#allocation2 + $0x18] sm:$0x77] }
  0x1b   :  { %167 = vst [vmem:[#allocation1 + $0x20] ss:$2 sm:$0xff] %v133_v20  ;;  %v137_v25 = vld [vmem:[#allocation2 + $0x30] sm:$0x77]  ;;  %v138_v26 = vld [vmem:[#allocation2 + $0x38] sm:$0x77] }
  0x1c   :  { %169 = vst [vmem:[#allocation1 + $0x30] ss:$2 sm:$0xff] %v134_v23  ;;  %v139_v33 = vld [vmem:[#allocation2 + $0x40] sm:$0x77]  ;;  %v140_v34 = vld [vmem:[#allocation2 + $0x48] sm:$0x77] }
  0x1d   :  { %v141_v39 = vld [vmem:[#allocation2 + $0x50] sm:$0x77]  ;;  %v142_v44 = vld [vmem:[#allocation2 + $0x58] sm:$0x77]  ;;  %v146_v49 = vand.u32 127, %v145_v47  ;;  %vm149_vm2 = vcmask 1041409  }
  0x1e   :  { %vm202_vm3 = vcmask 23552   ;;  %v7144_v0 = vld [vmem:[#allocation5 + $0xe0] sm:$0xf]  ;;  %v10261_v1 = vld [vmem:[#allocation5 + $0xec] sm:$0xf0]  ;;  %s11214_s0 = smov [#allocation11]  }
  0x1f   :  { %v101_v4 = vld.sshfl [vmem:[#allocation1] sm:$0xff pattern:$0x75316420]  ;;  %v102_v5 = vld.sshfl [vmem:[#allocation1 + $0x8] sm:$0xff pattern:$0x75316420]  ;;  %v11044_v22 = vpop.eup %11043 }
  0x20   :  { %v112_v6 = vsel %vm111_vm0, %v101_v4, 0.0  ;;  %v113_v7 = vsel %vm111_vm0, %v102_v5, 0.0  ;;  %163 = vst [vmem:[#allocation1] ss:$2 sm:$0xff] %v131_v2  ;;  %v123_v24 = vmul.f32 256.0, %v11044_v22  ;;  %vm127_vm1 = vweird.f32 %v11044_v22  ;;  %s6968_s5 = sshll.u32 %s11214_s0, 4  ;;  %s6969_s5 = int_to_ptr.vmem [resolvable:$true] %s6968_s5 }
  0x21   :  { %v114_v8 = vadd.f32 %v113_v7, %v112_v6  ;;  %v105_v9 = vld.sshfl [vmem:[#allocation1 + $0x10] sm:$0xff pattern:$0x75316420]  ;;  %v106_v10 = vld.sshfl [vmem:[#allocation1 + $0x18] sm:$0xff pattern:$0x75316420] }
  0x22   :  { %165 = vst [vmem:[#allocation1 + $0x10] ss:$2 sm:$0xff] %v132_v3  ;;  %v117_v11 = vsel %vm111_vm0, %v105_v9, 0.0  ;;  %v118_v12 = vsel %vm111_vm0, %v106_v10, 0.0  ;;  %v124_v29 = vsub.f32 1.0, %v123_v24  ;;  %s6970_s28 = sshll.u32 %s11550_s6, 4  ;;  %s6971_s28 = int_to_ptr.hbm [resolvable:$true] %s6970_s28 }
  0x23   :  { %115 = vadd.xlane.f32.xlu0 %v114_v8  ;;  %v119_v13 = vadd.f32 %v118_v12, %v117_v11  ;;  %v174_v27 = vld.sshfl [vmem:[#allocation1 + $0x20] sm:$0xff pattern:$0x75316420]  ;;  %v175_v28 = vld.sshfl [vmem:[#allocation1 + $0x28] sm:$0xff pattern:$0x75316420]  ;;  %v7145_v8 = vor.u32 %v10261_v1, %v7144_v0 }
  0x24   :  { %180 = vst [vmem:[#allocation1 + $0x20] ss:$2 sm:$0xff] %v137_v25  ;;  %v176_v30 = vld.sshfl [vmem:[#allocation1 + $0x30] sm:$0xff pattern:$0x75316420]  ;;  %v125_v38 = vmul.f32 %v11044_v22, %v124_v29 }
  0x25   :  { %v177_v31 = vld.sshfl [vmem:[#allocation1 + $0x38] sm:$0xff pattern:$0x75316420]  ;;  %v7272_v2 = vld [vmem:[#allocation5 + $0x1e0] sm:$0xf] }
  0x26   :  { %181 = vst [vmem:[#allocation1 + $0x30] ss:$2 sm:$0xff] %v138_v26  ;;  %v126_v40 = vadd.f32 %v11044_v22, %v125_v38  ;;  %v10293_v3 = vld [vmem:[#allocation5 + $0x1ec] sm:$0xf0]  ;;  %v7400_v4 = vld [vmem:[#allocation5 + $0x2e0] sm:$0xf] }
  0x27   :  { %v170_v15 = vld.sshfl [vmem:[#allocation1] sm:$0xff pattern:$0x75316420]  ;;  %v171_v16 = vld.sshfl [vmem:[#allocation1 + $0x8] sm:$0xff pattern:$0x75316420]  ;;  %v7273_v9 = vor.u32 %v10293_v3, %v7272_v2 }
  0x28   :  { %6982 = vmatpush.msk.msra.mxu0 %vm111_vm0, %v170_v15  ;;  %6984 = vmatpush.msk.msra.mxu1 %vm111_vm0, %v171_v16  ;;  %178 = vst [vmem:[#allocation1] ss:$2 sm:$0xff] %v135_v17  ;;  %v128_v48 = vsel %vm127_vm1, %v11044_v22, %v126_v40  ;;  %v10325_v5 = vld [vmem:[#allocation5 + $0x2ec] sm:$0xf0]  ;;  %v7528_v6 = vld [vmem:[#allocation5 + $0x3e0] sm:$0xf] }
  0x29   :  { %v172_v18 = vld.sshfl [vmem:[#allocation1 + $0x10] sm:$0xff pattern:$0x75316420]  ;;  %v173_v21 = vld.sshfl [vmem:[#allocation1 + $0x18] sm:$0xff pattern:$0x75316420]  ;;  %v7401_v14 = vor.u32 %v10325_v5, %v7400_v4 }
  0x2a   :  { %6986 = vmatpush.msk.msra.mxu2 %vm111_vm0, %v172_v18  ;;  %179 = vst [vmem:[#allocation1 + $0x10] ss:$2 sm:$0xff] %v136_v19  ;;  %6988 = vmatpush.msk.msra.mxu3 %vm111_vm0, %v173_v21  ;;  %v10357_v7 = vld [vmem:[#allocation5 + $0x3ec] sm:$0xf0]  ;;  %v7128_v10 = vld [vmem:[#allocation5 + $0xc0] sm:$0xf] }
  0x2b   :  { %120 = vadd.xlane.f32.xlu0 %v119_v13  ;;  %6990 = vmatpush.msk.msrb.mxu0 %vm111_vm0, %v174_v27  ;;  %v186_v42 = vld.sshfl [vmem:[#allocation1 + $0x20] sm:$0xff pattern:$0x75316420]  ;;  %v187_v43 = vld.sshfl [vmem:[#allocation1 + $0x28] sm:$0xff pattern:$0x75316420]  ;;  %v7529_v15 = vor.u32 %v10357_v7, %v7528_v6 }
  0x2c   :  { %6992 = vmatpush.msk.msrb.mxu1 %vm111_vm0, %v175_v28  ;;  %6994 = vmatpush.msk.msrb.mxu2 %vm111_vm0, %v176_v30  ;;  %192 = vst [vmem:[#allocation1 + $0x20] ss:$2 sm:$0xff] %v141_v39  ;;  %v10257_v11 = vld [vmem:[#allocation5 + $0xcc] sm:$0xf0]  ;;  %v7256_v12 = vld [vmem:[#allocation5 + $0x1c0] sm:$0xf] }
  0x2d   :  { %6996 = vmatpush.msk.msrb.mxu3 %vm111_vm0, %v177_v31  ;;  %v188_v45 = vld.sshfl [vmem:[#allocation1 + $0x30] sm:$0xff pattern:$0x75316420]  ;;  %v189_v46 = vld.sshfl [vmem:[#allocation1 + $0x38] sm:$0xff pattern:$0x75316420]  ;;  %v7129_v20 = vor.u32 %v10257_v11, %v7128_v10 }
  0x2e   :  { %193 = vst [vmem:[#allocation1 + $0x30] ss:$2 sm:$0xff] %v142_v44  ;;  %v10289_v13 = vld [vmem:[#allocation5 + $0x1cc] sm:$0xf0]  ;;  %v7384_v16 = vld [vmem:[#allocation5 + $0x2c0] sm:$0xf] }
  0x2f   :  { %v182_v32 = vld.sshfl [vmem:[#allocation1] sm:$0xff pattern:$0x75316420]  ;;  %v183_v35 = vld.sshfl [vmem:[#allocation1 + $0x8] sm:$0xff pattern:$0x75316420]  ;;  %v7257_v21 = vor.u32 %v10289_v13, %v7256_v12 }
  0x30   :  { %190 = vst [vmem:[#allocation1] ss:$2 sm:$0xff] %v139_v33  ;;  %v10321_v17 = vld [vmem:[#allocation5 + $0x2cc] sm:$0xf0]  ;;  %v7512_v18 = vld [vmem:[#allocation5 + $0x3c0] sm:$0xf] }
  0x31   :  { %v184_v36 = vld.sshfl [vmem:[#allocation1 + $0x10] sm:$0xff pattern:$0x75316420]  ;;  %v185_v37 = vld.sshfl [vmem:[#allocation1 + $0x18] sm:$0xff pattern:$0x75316420]  ;;  %v7385_v26 = vor.u32 %v10321_v17, %v7384_v16 }
  0x32   :  { %191 = vst [vmem:[#allocation1 + $0x10] ss:$2 sm:$0xff] %v140_v34  ;;  %v10353_v19 = vld [vmem:[#allocation5 + $0x3cc] sm:$0xf0]  ;;  %v7112_v22 = vld [vmem:[#allocation5 + $0xa0] sm:$0xf] }
  0x33   :  { %v198_v60 = vld.sshfl [vmem:[#allocation1 + $0x20] sm:$0xff pattern:$0x75316420]  ;;  %v199_v61 = vld.sshfl [vmem:[#allocation1 + $0x28] sm:$0xff pattern:$0x75316420]  ;;  %v7513_v27 = vor.u32 %v10353_v19, %v7512_v18 }
  0x34   :  { %v10253_v23 = vld [vmem:[#allocation5 + $0xac] sm:$0xf0]  ;;  %v7240_v24 = vld [vmem:[#allocation5 + $0x1a0] sm:$0xf] }
  0x35   :  { %v200_v62 = vld.sshfl [vmem:[#allocation1 + $0x30] sm:$0xff pattern:$0x75316420]  ;;  %v201_v63 = vld.sshfl [vmem:[#allocation1 + $0x38] sm:$0xff pattern:$0x75316420] }
  0x36   :  { %v10285_v25 = vld [vmem:[#allocation5 + $0x1ac] sm:$0xf0]  ;;  %v7368_v28 = vld [vmem:[#allocation5 + $0x2a0] sm:$0xf] }
  0x37   :  { %v194_v56 = vld.sshfl [vmem:[#allocation1] sm:$0xff pattern:$0x75316420]  ;;  %v195_v57 = vld.sshfl [vmem:[#allocation1 + $0x8] sm:$0xff pattern:$0x75316420]  ;;  %v7241_v33 = vor.u32 %v10285_v25, %v7240_v24 }
  0x38   :  { %v10317_v29 = vld [vmem:[#allocation5 + $0x2ac] sm:$0xf0]  ;;  %v7496_v30 = vld [vmem:[#allocation5 + $0x3a0] sm:$0xf] }
  0x39   :  { %v196_v58 = vld.sshfl [vmem:[#allocation1 + $0x10] sm:$0xff pattern:$0x75316420]  ;;  %v197_v59 = vld.sshfl [vmem:[#allocation1 + $0x18] sm:$0xff pattern:$0x75316420]  ;;  %v7369_v38 = vor.u32 %v10317_v29, %v7368_v28 }
  0x3a   :  { %v10349_v31 = vld [vmem:[#allocation5 + $0x3ac] sm:$0xf0]  ;;  %v7096_v34 = vld [vmem:[#allocation5 + $0x80] sm:$0xf] }
  0x3b   :  { %v7497_v39 = vor.u32 %v10349_v31, %v7496_v30  ;;  %v7352_v40 = vld [vmem:[#allocation5 + $0x280] sm:$0xf]  ;;  %v10245_v47 = vld [vmem:[#allocation5 + $0x6c] sm:$0xf0] }
  0x3c   :  { %v7320_v0 = vld [vmem:[#allocation5 + $0x240] sm:$0xf]  ;;  %v10305_v1 = vld [vmem:[#allocation5 + $0x24c] sm:$0xf0] }
  0x3d   :  { %v7448_v2 = vld [vmem:[#allocation5 + $0x340] sm:$0xf]  ;;  %v10337_v3 = vld [vmem:[#allocation5 + $0x34c] sm:$0xf0]  ;;  %v7321_v10 = vor.u32 %v10305_v1, %v7320_v0 }
  0x3e   :  { %v7048_v6 = vld [vmem:[#allocation5 + $0x20] sm:$0xf]  ;;  %v10237_v7 = vld [vmem:[#allocation5 + $0x2c] sm:$0xf0]  ;;  %v7449_v11 = vor.u32 %v10337_v3, %v7448_v2 }
  0x3f   :  { %v7304_v12 = vld [vmem:[#allocation5 + $0x220] sm:$0xf]  ;;  %v10301_v13 = vld [vmem:[#allocation5 + $0x22c] sm:$0xf0]  ;;  %v7049_v17 = vor.u32 %v10237_v7, %v7048_v6 }
  0x40   :  { %v7032_v16 = vld [vmem:[#allocation5] sm:$0xf]  ;;  %v10233_v19 = vld [vmem:[#allocation5 + $0xc] sm:$0xf0]  ;;  %v7305_v25 = vor.u32 %v10301_v13, %v7304_v12 }
  0x41   :  { %v7784_v24 = vld [vmem:[#allocation5 + $0x5e0] sm:$0xf]  ;;  %v10297_v29 = vld [vmem:[#allocation5 + $0x20c] sm:$0xf0] }
  0x42   :  { %v7288_v28 = vld [vmem:[#allocation5 + $0x200] sm:$0xf]  ;;  %v10329_v31 = vld [vmem:[#allocation5 + $0x30c] sm:$0xf0] }
  0x43   :  { %v7416_v30 = vld [vmem:[#allocation5 + $0x300] sm:$0xf]  ;;  %v10377_v3 = vld [vmem:[#allocation5 + $0x48c] sm:$0xf0] }
  0x44   :  { %v7608_v2 = vld [vmem:[#allocation5 + $0x480] sm:$0xf] }
  0x45   :  { %v7609_v12 = vor.u32 %v10377_v3, %v7608_v2  ;;  %v8296_v2 = vld [vmem:[#allocation5 + $0x9e0] sm:$0xf]  ;;  %v10549_v3 = vld [vmem:[#allocation5 + $0x9ec] sm:$0xf0] }
  0x96   :  { %v116_v41 = vpop.xlane.xlu0 %115 }
  0x97   :  { %v129_v50 = vmul.f32 %v128_v48, %v116_v41  ;;  %v10313_v41 = vld [vmem:[#allocation5 + $0x28c] sm:$0xf0] }
  0x99   :  { %v147_v53 = vperm.slane %v129_v50, %v146_v49  ;;  %v7353_v50 = vor.u32 %v10313_v41, %v7352_v40  ;;  %v7640_v40 = vld [vmem:[#allocation5 + $0x4c0] sm:$0xf]  ;;  %v10385_v41 = vld [vmem:[#allocation5 + $0x4cc] sm:$0xf0] }
  0x9e   :  { %v121_v51 = vpop.xlane.xlu0 %120 }
  0x9f   :  { %v130_v52 = vmul.f32 %v128_v48, %v121_v51  ;;  %v7208_v48 = vld [vmem:[#allocation5 + $0x160] sm:$0xf] }
  0xa1   :  { %v148_v54 = vperm.slane %v130_v52, %v146_v49  ;;  %v10277_v49 = vld [vmem:[#allocation5 + $0x16c] sm:$0xf0]  ;;  %v7336_v52 = vld [vmem:[#allocation5 + $0x260] sm:$0xf] }
  0xa3   :  { %v11283_v55 = vsel %vm149_vm2, %v148_v54, %v147_v53  ;;  %v10309_v53 = vld [vmem:[#allocation5 + $0x26c] sm:$0xf0]  ;;  %v7464_v54 = vld [vmem:[#allocation5 + $0x360] sm:$0xf] }
  0xa4   :  { %6983 = vmatmul.msk.f32.vlgmr.msra.gmra.mxu0 %vm202_vm3, %v11283_v55  ;;  %6985 = vmatmul.msk.f32.vlgmr.msra.gmra.mxu1 %vm202_vm3, %v11283_v55 }
  0xa5   :  { %6987 = vmatmul.msk.f32.vlgmr.msra.gmra.mxu2 %vm202_vm3, %v11283_v55  ;;  %6989 = vmatmul.msk.f32.vlgmr.msra.gmra.mxu3 %vm202_vm3, %v11283_v55 }
  0xa6   :  { %6998 = vmatpush.msk.msra.mxu0 %vm111_vm0, %v182_v32  ;;  %7000 = vmatpush.msk.msra.mxu1 %vm111_vm0, %v183_v35  ;;  %v7113_v32 = vor.u32 %v10253_v23, %v7112_v22  ;;  %v10249_v35 = vld [vmem:[#allocation5 + $0x8c] sm:$0xf0]  ;;  %v7656_v22 = vld [vmem:[#allocation5 + $0x4e0] sm:$0xf] }
  0xa7   :  { %7002 = vmatpush.msk.msra.mxu2 %vm111_vm0, %v184_v36  ;;  %7004 = vmatpush.msk.msra.mxu3 %vm111_vm0, %v185_v37  ;;  %v7224_v36 = vld [vmem:[#allocation5 + $0x180] sm:$0xf]  ;;  %v10281_v37 = vld [vmem:[#allocation5 + $0x18c] sm:$0xf0]  ;;  %v7097_v44 = vor.u32 %v10249_v35, %v7096_v34 }
  0xa8   :  { %v10389_v23 = vld [vmem:[#allocation5 + $0x4ec] sm:$0xf0] }
  0xa9   :  { %v10453_v35 = vld [vmem:[#allocation5 + $0x6ec] sm:$0xf0] }
  0xac   :  { %6991 = vmatmul.msk.f32.vlgmr.msrb.gmra.mxu0 %vm202_vm3, %v11283_v55  ;;  %6993 = vmatmul.msk.f32.vlgmr.msrb.gmra.mxu1 %vm202_vm3, %v11283_v55 }
  0xad   :  { %6995 = vmatmul.msk.f32.vlgmr.msrb.gmra.mxu2 %vm202_vm3, %v11283_v55  ;;  %6997 = vmatmul.msk.f32.vlgmr.msrb.gmra.mxu3 %vm202_vm3, %v11283_v55 }
  0xae   :  { %7006 = vmatpush.msk.msrb.mxu0 %vm111_vm0, %v186_v42  ;;  %7008 = vmatpush.msk.msrb.mxu1 %vm111_vm0, %v187_v43  ;;  %v7480_v42 = vld [vmem:[#allocation5 + $0x380] sm:$0xf]  ;;  %v10345_v43 = vld [vmem:[#allocation5 + $0x38c] sm:$0xf0] }
  0xaf   :  { %7010 = vmatpush.msk.msrb.mxu2 %vm111_vm0, %v188_v45  ;;  %7012 = vmatpush.msk.msrb.mxu3 %vm111_vm0, %v189_v46  ;;  %v7225_v45 = vor.u32 %v10281_v37, %v7224_v36  ;;  %v7080_v46 = vld [vmem:[#allocation5 + $0x60] sm:$0xf]  ;;  %v7481_v51 = vor.u32 %v10345_v43, %v7480_v42  ;;  %v10485_v37 = vld [vmem:[#allocation5 + $0x7ec] sm:$0xf0] }
  0xb0   :  { %v8040_v36 = vld [vmem:[#allocation5 + $0x7e0] sm:$0xf]  ;;  %v10417_v43 = vld [vmem:[#allocation5 + $0x5cc] sm:$0xf0] }
  0xb1   :  { %v7768_v42 = vld [vmem:[#allocation5 + $0x5c0] sm:$0xf] }
  0xb4   :  { %6999 = vmatmul.msk.f32.vlgmr.msra.gmra.mxu0 %vm202_vm3, %v11283_v55  ;;  %7001 = vmatmul.msk.f32.vlgmr.msra.gmra.mxu1 %vm202_vm3, %v11283_v55 }
  0xb5   :  { %7003 = vmatmul.msk.f32.vlgmr.msra.gmra.mxu2 %vm202_vm3, %v11283_v55  ;;  %7005 = vmatmul.msk.f32.vlgmr.msra.gmra.mxu3 %vm202_vm3, %v11283_v55 }
  0xb6   :  { %7014 = vmatpush.msk.msra.mxu0 %vm111_vm0, %v194_v56  ;;  %7016 = vmatpush.msk.msra.mxu1 %vm111_vm0, %v195_v57  ;;  %v10341_v56 = vld [vmem:[#allocation5 + $0x36c] sm:$0xf0]  ;;  %v7081_v57 = vor.u32 %v10245_v47, %v7080_v46  ;;  %v8041_v47 = vor.u32 %v10485_v37, %v8040_v36  ;;  %v7688_v36 = vld [vmem:[#allocation5 + $0x520] sm:$0xf] }
  0xb7   :  { %7018 = vmatpush.msk.msra.mxu2 %vm111_vm0, %v196_v58  ;;  %7020 = vmatpush.msk.msra.mxu3 %vm111_vm0, %v197_v59  ;;  %v7064_v58 = vld [vmem:[#allocation5 + $0x40] sm:$0xf]  ;;  %v10241_v59 = vld [vmem:[#allocation5 + $0x4c] sm:$0xf0] }
  0xb8   :  { %v7065_v4 = vor.u32 %v10241_v59, %v7064_v58  ;;  %v10397_v37 = vld [vmem:[#allocation5 + $0x52c] sm:$0xf0] }
  0xbc   :  { %7007 = vmatmul.msk.f32.vlgmr.msrb.gmra.mxu0 %vm202_vm3, %v11283_v55  ;;  %7009 = vmatmul.msk.f32.vlgmr.msrb.gmra.mxu1 %vm202_vm3, %v11283_v55 }
  0xbd   :  { %7011 = vmatmul.msk.f32.vlgmr.msrb.gmra.mxu2 %vm202_vm3, %v11283_v55  ;;  %7013 = vmatmul.msk.f32.vlgmr.msrb.gmra.mxu3 %vm202_vm3, %v11283_v55 }
  0xbe   :  { %7022 = vmatpush.msk.msrb.mxu0 %vm111_vm0, %v198_v60  ;;  %7024 = vmatpush.msk.msrb.mxu1 %vm111_vm0, %v199_v61  ;;  %v7192_v60 = vld [vmem:[#allocation5 + $0x140] sm:$0xf]  ;;  %v10273_v61 = vld [vmem:[#allocation5 + $0x14c] sm:$0xf0] }
  0xbf   :  { %7026 = vmatpush.msk.msrb.mxu2 %vm111_vm0, %v200_v62  ;;  %7028 = vmatpush.msk.msrb.mxu3 %vm111_vm0, %v201_v63  ;;  %v7337_v62 = vor.u32 %v10309_v53, %v7336_v52  ;;  %v7465_v63 = vor.u32 %v10341_v56, %v7464_v54  ;;  %v7193_v5 = vor.u32 %v10273_v61, %v7192_v60  ;;  %v7624_v54 = vld [vmem:[#allocation5 + $0x4a0] sm:$0xf]  ;;  %v10381_v56 = vld [vmem:[#allocation5 + $0x4ac] sm:$0xf0] }
  0xc0   :  { %v7641_v52 = vor.u32 %v10385_v41, %v7640_v40  ;;  %v7769_v53 = vor.u32 %v10417_v43, %v7768_v42  ;;  %v7880_v60 = vld [vmem:[#allocation5 + $0x6a0] sm:$0xf]  ;;  %v10445_v61 = vld [vmem:[#allocation5 + $0x6ac] sm:$0xf0]  ;;  %v7625_v0 = vor.u32 %v10381_v56, %v7624_v54 }
  0xc1   :  { %v7881_v6 = vor.u32 %v10445_v61, %v7880_v60  ;;  %v7832_v40 = vld [vmem:[#allocation5 + $0x640] sm:$0xf]  ;;  %v10433_v41 = vld [vmem:[#allocation5 + $0x64c] sm:$0xf0] }
  0xc2   :  { %v7960_v42 = vld [vmem:[#allocation5 + $0x740] sm:$0xf]  ;;  %v7833_v43 = vor.u32 %v10433_v41, %v7832_v40  ;;  %v10461_v56 = vld [vmem:[#allocation5 + $0x72c] sm:$0xf0] }
  0xc3   :  { %v7944_v54 = vld [vmem:[#allocation5 + $0x720] sm:$0xf] }
  0xc4   :  { %7015 = vmatmul.msk.f32.vlgmr.msra.gmra.mxu0 %vm202_vm3, %v11283_v55  ;;  %7017 = vmatmul.msk.f32.vlgmr.msra.gmra.mxu1 %vm202_vm3, %v11283_v55  ;;  %v7928_v61 = vld [vmem:[#allocation5 + $0x700] sm:$0xf] }
  0xc5   :  { %7019 = vmatmul.msk.f32.vlgmr.msra.gmra.mxu2 %vm202_vm3, %v11283_v55  ;;  %7021 = vmatmul.msk.f32.vlgmr.msra.gmra.mxu3 %vm202_vm3, %v11283_v55 }
  0xc6   :  { %5375 = vmatpush.bf16.msra.mxu0 %v7145_v8  ;;  %5388 = vmatpush.bf16.msra.mxu1 %v7273_v9  ;;  %v7176_v8 = vld [vmem:[#allocation5 + $0x120] sm:$0xf]  ;;  %v10269_v9 = vld [vmem:[#allocation5 + $0x12c] sm:$0xf0] }
  0xc7   :  { %5401 = vmatpush.bf16.msra.mxu2 %v7401_v14  ;;  %5414 = vmatpush.bf16.msra.mxu3 %v7529_v15  ;;  %v7432_v14 = vld [vmem:[#allocation5 + $0x320] sm:$0xf]  ;;  %v10333_v15 = vld [vmem:[#allocation5 + $0x32c] sm:$0xf0]  ;;  %v7177_v18 = vor.u32 %v10269_v9, %v7176_v8 }
  0xc8   :  { %v7864_v8 = vld [vmem:[#allocation5 + $0x680] sm:$0xf]  ;;  %v10441_v9 = vld [vmem:[#allocation5 + $0x68c] sm:$0xf0] }
  0xca   :  { %5376 = vmatpush.bf16.msra.mxu0 %v7129_v20  ;;  %5389 = vmatpush.bf16.msra.mxu1 %v7257_v21  ;;  %v7160_v20 = vld [vmem:[#allocation5 + $0x100] sm:$0xf]  ;;  %v10265_v21 = vld [vmem:[#allocation5 + $0x10c] sm:$0xf0] }
  0xcb   :  { %5402 = vmatpush.bf16.msra.mxu2 %v7385_v26  ;;  %5415 = vmatpush.bf16.msra.mxu3 %v7513_v27  ;;  %v7433_v26 = vor.u32 %v10333_v15, %v7432_v14  ;;  %v10421_v27 = vld [vmem:[#allocation5 + $0x5ec] sm:$0xf0]  ;;  %v7161_v34 = vor.u32 %v10265_v21, %v7160_v20  ;;  %v7592_v14 = vld [vmem:[#allocation5 + $0x460] sm:$0xf] }
  0xcc   :  { %7023 = vmatmul.msk.f32.vlgmr.msrb.gmra.mxu0 %vm202_vm3, %v11283_v55  ;;  %7025 = vmatmul.msk.f32.vlgmr.msrb.gmra.mxu1 %vm202_vm3, %v11283_v55  ;;  %v10373_v15 = vld [vmem:[#allocation5 + $0x46c] sm:$0xf0]  ;;  %v7848_v20 = vld [vmem:[#allocation5 + $0x660] sm:$0xf] }
  0xcd   :  { %7027 = vmatmul.msk.f32.vlgmr.msrb.gmra.mxu2 %vm202_vm3, %v11283_v55  ;;  %7029 = vmatmul.msk.f32.vlgmr.msrb.gmra.mxu3 %vm202_vm3, %v11283_v55  ;;  %v7209_v55 = vor.u32 %v10277_v49, %v7208_v48  ;;  %v7896_v48 = vld [vmem:[#allocation5 + $0x6c0] sm:$0xf]  ;;  %v10449_v49 = vld [vmem:[#allocation5 + $0x6cc] sm:$0xf0] }
  0xce   :  { %5377 = vmatpush.bf16.msra.mxu0 %v7113_v32  ;;  %5390 = vmatpush.bf16.msra.mxu1 %v7241_v33  ;;  %v7912_v32 = vld [vmem:[#allocation5 + $0x6e0] sm:$0xf]  ;;  %v7033_v33 = vor.u32 %v10233_v19, %v7032_v16  ;;  %v7897_v58 = vor.u32 %v10449_v49, %v7896_v48  ;;  %v10437_v21 = vld [vmem:[#allocation5 + $0x66c] sm:$0xf0] }
  0xcf   :  { %5403 = vmatpush.bf16.msra.mxu2 %v7369_v38  ;;  %5416 = vmatpush.bf16.msra.mxu3 %v7497_v39  ;;  %v7657_v38 = vor.u32 %v10389_v23, %v7656_v22  ;;  %v7785_v39 = vor.u32 %v10421_v27, %v7784_v24  ;;  %v7913_v46 = vor.u32 %v10453_v35, %v7912_v32  ;;  %v7720_v16 = vld [vmem:[#allocation5 + $0x560] sm:$0xf]  ;;  %v10469_v23 = vld [vmem:[#allocation5 + $0x76c] sm:$0xf0] }
  0xd0   :  { %v7976_v22 = vld [vmem:[#allocation5 + $0x760] sm:$0xf]  ;;  %v7593_v24 = vor.u32 %v10373_v15, %v7592_v14  ;;  %v10369_v27 = vld [vmem:[#allocation5 + $0x44c] sm:$0xf0] }
  0xd1   :  { %v10365_v35 = vld [vmem:[#allocation5 + $0x42c] sm:$0xf0]  ;;  %v7672_v48 = vld [vmem:[#allocation5 + $0x500] sm:$0xf] }
  0xd2   :  { %5378 = vmatpush.bf16.msra.mxu0 %v7097_v44  ;;  %5391 = vmatpush.bf16.msra.mxu1 %v7225_v45  ;;  %v7289_v44 = vor.u32 %v10297_v29, %v7288_v28  ;;  %v7417_v45 = vor.u32 %v10329_v31, %v7416_v30  ;;  %v7704_v28 = vld [vmem:[#allocation5 + $0x540] sm:$0xf]  ;;  %v10401_v29 = vld [vmem:[#allocation5 + $0x54c] sm:$0xf0]  ;;  %v7849_v30 = vor.u32 %v10437_v21, %v7848_v20 }
  0xd3   :  { %5404 = vmatpush.bf16.msra.mxu2 %v7353_v50  ;;  %5417 = vmatpush.bf16.msra.mxu3 %v7481_v51  ;;  %v8024_v50 = vld [vmem:[#allocation5 + $0x7c0] sm:$0xf]  ;;  %v10481_v51 = vld [vmem:[#allocation5 + $0x7cc] sm:$0xf0]  ;;  %v7977_v31 = vor.u32 %v10469_v23, %v7976_v22 }
  0xd4   :  { %v8025_v59 = vor.u32 %v10481_v51, %v8024_v50  ;;  %v10393_v50 = vld [vmem:[#allocation5 + $0x50c] sm:$0xf0]  ;;  %v8424_v14 = vld [vmem:[#allocation5 + $0xae0] sm:$0xf] }
  0xd5   :  { %v7673_v51 = vor.u32 %v10393_v50, %v7672_v48  ;;  %v10581_v15 = vld [vmem:[#allocation5 + $0xaec] sm:$0xf0]  ;;  %v8136_v20 = vld [vmem:[#allocation5 + $0x8a0] sm:$0xf] }
  0xd6   :  { %5379 = vmatpush.bf16.msra.mxu0 %v7081_v57  ;;  %5392 = vmatpush.bf16.msra.mxu1 %v7209_v55  ;;  %v7752_v57 = vld [vmem:[#allocation5 + $0x5a0] sm:$0xf]  ;;  %v10413_v55 = vld [vmem:[#allocation5 + $0x5ac] sm:$0xf0] }
  0xd7   :  { %5405 = vmatpush.bf16.msra.mxu2 %v7337_v62  ;;  %5418 = vmatpush.bf16.msra.mxu3 %v7465_v63  ;;  %v8008_v62 = vld [vmem:[#allocation5 + $0x7a0] sm:$0xf]  ;;  %v10477_v63 = vld [vmem:[#allocation5 + $0x7ac] sm:$0xf0]  ;;  %v7753_v1 = vor.u32 %v10413_v55, %v7752_v57  ;;  %v7945_v55 = vor.u32 %v10461_v56, %v7944_v54 }
  0xd8   :  { %v8009_v7 = vor.u32 %v10477_v63, %v8008_v62  ;;  %v10457_v62 = vld [vmem:[#allocation5 + $0x70c] sm:$0xf0]  ;;  %v8264_v22 = vld [vmem:[#allocation5 + $0x9a0] sm:$0xf] }
  0xd9   :  { %v7929_v63 = vor.u32 %v10457_v62, %v7928_v61  ;;  %v10509_v21 = vld [vmem:[#allocation5 + $0x8ac] sm:$0xf0]  ;;  %v8104_v48 = vld [vmem:[#allocation5 + $0x860] sm:$0xf] }
  0xda   :  { %5380 = vmatpush.bf16.msra.mxu0 %v7065_v4  ;;  %5393 = vmatpush.bf16.msra.mxu1 %v7193_v5  ;;  %v7736_v4 = vld [vmem:[#allocation5 + $0x580] sm:$0xf]  ;;  %v10409_v5 = vld [vmem:[#allocation5 + $0x58c] sm:$0xf0] }
  0xdb   :  { %5406 = vmatpush.bf16.msra.mxu2 %v7321_v10  ;;  %5419 = vmatpush.bf16.msra.mxu3 %v7449_v11  ;;  %v7992_v10 = vld [vmem:[#allocation5 + $0x780] sm:$0xf]  ;;  %v10473_v11 = vld [vmem:[#allocation5 + $0x78c] sm:$0xf0]  ;;  %v7737_v13 = vor.u32 %v10409_v5, %v7736_v4 }
  0xdc   :  { %v7993_v19 = vor.u32 %v10473_v11, %v7992_v10  ;;  %v10513_v11 = vld [vmem:[#allocation5 + $0x8cc] sm:$0xf0]  ;;  %v8232_v50 = vld [vmem:[#allocation5 + $0x960] sm:$0xf] }
  0xdd   :  { %v10541_v23 = vld [vmem:[#allocation5 + $0x9ac] sm:$0xf0]  ;;  %v8088_v62 = vld [vmem:[#allocation5 + $0x840] sm:$0xf] }
  0xde   :  { %5381 = vmatpush.bf16.msra.mxu0 %v7049_v17  ;;  %5394 = vmatpush.bf16.msra.mxu1 %v7177_v18  ;;  %v10405_v17 = vld [vmem:[#allocation5 + $0x56c] sm:$0xf0]  ;;  %v7865_v18 = vor.u32 %v10441_v9, %v7864_v8  ;;  %v8152_v8 = vld [vmem:[#allocation5 + $0x8c0] sm:$0xf] }
  0xdf   :  { %5407 = vmatpush.bf16.msra.mxu2 %v7305_v25  ;;  %5420 = vmatpush.bf16.msra.mxu3 %v7433_v26  ;;  %v7721_v25 = vor.u32 %v10405_v17, %v7720_v16  ;;  %v7576_v26 = vld [vmem:[#allocation5 + $0x440] sm:$0xf]  ;;  %v8153_v17 = vor.u32 %v10513_v11, %v8152_v8  ;;  %v10597_v11 = vld [vmem:[#allocation5 + $0xb6c] sm:$0xf0] }
  0xe0   :  { %v7577_v32 = vor.u32 %v10369_v27, %v7576_v26  ;;  %v8552_v16 = vld [vmem:[#allocation5 + $0xbe0] sm:$0xf]  ;;  %v8425_v26 = vor.u32 %v10581_v15, %v8424_v14 }
  0xe1   :  { %v8488_v8 = vld [vmem:[#allocation5 + $0xb60] sm:$0xf] }
  0xe2   :  { %5382 = vmatpush.bf16.msra.mxu0 %v7033_v33  ;;  %5395 = vmatpush.bf16.msra.mxu1 %v7161_v34  ;;  %v7705_v33 = vor.u32 %v10401_v29, %v7704_v28  ;;  %v7560_v34 = vld [vmem:[#allocation5 + $0x420] sm:$0xf]  ;;  %v8137_v28 = vor.u32 %v10509_v21, %v8136_v20  ;;  %v8489_v21 = vor.u32 %v10597_v11, %v8488_v8 }
  0xe3   :  { %5408 = vmatpush.bf16.msra.mxu2 %v7289_v44  ;;  %5421 = vmatpush.bf16.msra.mxu3 %v7417_v45  ;;  %v10465_v44 = vld [vmem:[#allocation5 + $0x74c] sm:$0xf0]  ;;  %v8408_v29 = vld [vmem:[#allocation5 + $0xac0] sm:$0xf] }
  0xe4   :  { %v7961_v45 = vor.u32 %v10465_v44, %v7960_v42  ;;  %v8392_v42 = vld [vmem:[#allocation5 + $0xaa0] sm:$0xf] }
  0xe5   :  { %v8648_v8 = vld [vmem:[#allocation5 + $0xca0] sm:$0xf] }
  0xe6   :  { %5427 = vmatpush.bf16.msrb.mxu0 %v7657_v38  ;;  %5440 = vmatpush.bf16.msrb.mxu1 %v7785_v39  ;;  %v7561_v38 = vor.u32 %v10365_v35, %v7560_v34  ;;  %v7689_v39 = vor.u32 %v10397_v37, %v7688_v36  ;;  %v8536_v34 = vld [vmem:[#allocation5 + $0xbc0] sm:$0xf]  ;;  %v10609_v35 = vld [vmem:[#allocation5 + $0xbcc] sm:$0xf0] }
  0xe7   :  { %5453 = vmatpush.bf16.msrb.mxu2 %v7913_v46  ;;  %5466 = vmatpush.bf16.msrb.mxu3 %v8041_v47  ;;  %v7544_v46 = vld [vmem:[#allocation5 + $0x400] sm:$0xf]  ;;  %v10361_v47 = vld [vmem:[#allocation5 + $0x40c] sm:$0xf0]  ;;  %v8537_v41 = vor.u32 %v10609_v35, %v8536_v34 }
  0xe8   :  { %v7545_v49 = vor.u32 %v10361_v47, %v7544_v46  ;;  %v8120_v36 = vld [vmem:[#allocation5 + $0x880] sm:$0xf]  ;;  %v10505_v37 = vld [vmem:[#allocation5 + $0x88c] sm:$0xf0] }
  0xe9   :  { %v8520_v46 = vld [vmem:[#allocation5 + $0xba0] sm:$0xf]  ;;  %v10605_v47 = vld [vmem:[#allocation5 + $0xbac] sm:$0xf0] }
  0xea   :  { %5428 = vmatpush.bf16.msrb.mxu0 %v7641_v52  ;;  %5441 = vmatpush.bf16.msrb.mxu1 %v7769_v53  ;;  %v7816_v52 = vld [vmem:[#allocation5 + $0x620] sm:$0xf]  ;;  %v10429_v53 = vld [vmem:[#allocation5 + $0x62c] sm:$0xf0]  ;;  %v8521_v56 = vor.u32 %v10605_v47, %v8520_v46 }
  0xeb   :  { %5454 = vmatpush.bf16.msrb.mxu2 %v7897_v58  ;;  %5467 = vmatpush.bf16.msrb.mxu3 %v8025_v59  ;;  %v7817_v57 = vor.u32 %v10429_v53, %v7816_v52  ;;  %v7800_v58 = vld [vmem:[#allocation5 + $0x600] sm:$0xf]  ;;  %v10425_v59 = vld [vmem:[#allocation5 + $0x60c] sm:$0xf0] }
  0xec   :  { %v7801_v60 = vor.u32 %v10425_v59, %v7800_v58  ;;  %v8504_v58 = vld [vmem:[#allocation5 + $0xb80] sm:$0xf]  ;;  %v10601_v59 = vld [vmem:[#allocation5 + $0xb8c] sm:$0xf0] }
  0xed   :  { %v8184_v34 = vld [vmem:[#allocation5 + $0x900] sm:$0xf]  ;;  %v10521_v35 = vld [vmem:[#allocation5 + $0x90c] sm:$0xf0] }
  0xee   :  { %5429 = vmatpush.bf16.msrb.mxu0 %v7625_v0  ;;  %5442 = vmatpush.bf16.msrb.mxu1 %v7753_v1  ;;  %v8168_v0 = vld [vmem:[#allocation5 + $0x8e0] sm:$0xf]  ;;  %v10517_v1 = vld [vmem:[#allocation5 + $0x8ec] sm:$0xf0]  ;;  %v8185_v47 = vor.u32 %v10521_v35, %v8184_v34 }
  0xef   :  { %5455 = vmatpush.bf16.msrb.mxu2 %v7881_v6  ;;  %5468 = vmatpush.bf16.msrb.mxu3 %v8009_v7  ;;  %v8169_v6 = vor.u32 %v10517_v1, %v8168_v0  ;;  %v8297_v7 = vor.u32 %v10549_v3, %v8296_v2  ;;  %v10497_v1 = vld [vmem:[#allocation5 + $0x84c] sm:$0xf0]  ;;  %v8216_v2 = vld [vmem:[#allocation5 + $0x940] sm:$0xf] }
  0xf0   :  { %v10529_v3 = vld [vmem:[#allocation5 + $0x94c] sm:$0xf0]  ;;  %v8089_v14 = vor.u32 %v10497_v1, %v8088_v62  ;;  %v8936_v62 = vld [vmem:[#allocation5 + $0xee0] sm:$0xf] }
  0xf1   :  { %v8217_v15 = vor.u32 %v10529_v3, %v8216_v2  ;;  %v10709_v2 = vld [vmem:[#allocation5 + $0xeec] sm:$0xf0]  ;;  %v9064_v3 = vld [vmem:[#allocation5 + $0xfe0] sm:$0xf] }
  0xf2   :  { %5430 = vmatpush.bf16.msrb.mxu0 %v7609_v12  ;;  %5443 = vmatpush.bf16.msrb.mxu1 %v7737_v13  ;;  %v8280_v12 = vld [vmem:[#allocation5 + $0x9c0] sm:$0xf]  ;;  %v10545_v13 = vld [vmem:[#allocation5 + $0x9cc] sm:$0xf0] }
  0xf3   :  { %5456 = vmatpush.bf16.msrb.mxu2 %v7865_v18  ;;  %5469 = vmatpush.bf16.msrb.mxu3 %v7993_v19  ;;  %v8281_v18 = vor.u32 %v10545_v13, %v8280_v12  ;;  %v10613_v19 = vld [vmem:[#allocation5 + $0xbec] sm:$0xf0] }
  0xf4   :  { %v8553_v27 = vor.u32 %v10613_v19, %v8552_v16  ;;  %v8072_v16 = vld [vmem:[#allocation5 + $0x820] sm:$0xf]  ;;  %v10525_v19 = vld [vmem:[#allocation5 + $0x92c] sm:$0xf0] }
  0xf6   :  { %5431 = vmatpush.bf16.msrb.mxu0 %v7593_v24  ;;  %5444 = vmatpush.bf16.msrb.mxu1 %v7721_v25 }
  0xf7   :  { %5457 = vmatpush.bf16.msrb.mxu2 %v7849_v30  ;;  %5470 = vmatpush.bf16.msrb.mxu3 %v7977_v31  ;;  %v10577_v30 = vld [vmem:[#allocation5 + $0xacc] sm:$0xf0] }
  0xf8   :  { %v8409_v40 = vor.u32 %v10577_v30, %v8408_v29  ;;  %v8056_v30 = vld [vmem:[#allocation5 + $0x800] sm:$0xf] }
  0xfa   :  { %5432 = vmatpush.bf16.msrb.mxu0 %v7577_v32  ;;  %5445 = vmatpush.bf16.msrb.mxu1 %v7705_v33  ;;  %v8265_v33 = vor.u32 %v10541_v23, %v8264_v22  ;;  %v8344_v22 = vld [vmem:[#allocation5 + $0xa40] sm:$0xf] }
  0xfb   :  { %5458 = vmatpush.bf16.msrb.mxu2 %v7833_v43  ;;  %5471 = vmatpush.bf16.msrb.mxu3 %v7961_v45  ;;  %v8121_v43 = vor.u32 %v10505_v37, %v8120_v36  ;;  %v10573_v45 = vld [vmem:[#allocation5 + $0xaac] sm:$0xf0]  ;;  %v8680_v36 = vld [vmem:[#allocation5 + $0xce0] sm:$0xf] }
  0xfc   :  { %v8393_v54 = vor.u32 %v10573_v45, %v8392_v42  ;;  %v10645_v37 = vld [vmem:[#allocation5 + $0xcec] sm:$0xf0]  ;;  %v8328_v42 = vld [vmem:[#allocation5 + $0xa20] sm:$0xf] }
  0xfd   :  { %v10589_v45 = vld [vmem:[#allocation5 + $0xb2c] sm:$0xf0] }
  0xfe   :  { %5433 = vmatpush.bf16.msrb.mxu0 %v7561_v38  ;;  %5446 = vmatpush.bf16.msrb.mxu1 %v7689_v39  ;;  %v8248_v38 = vld [vmem:[#allocation5 + $0x980] sm:$0xf]  ;;  %v10537_v39 = vld [vmem:[#allocation5 + $0x98c] sm:$0xf0] }
  0xff   :  { %5459 = vmatpush.bf16.msrb.mxu2 %v7817_v57  ;;  %5472 = vmatpush.bf16.msrb.mxu3 %v7945_v55  ;;  %v8249_v44 = vor.u32 %v10537_v39, %v8248_v38  ;;  %v8376_v57 = vld [vmem:[#allocation5 + $0xa80] sm:$0xf]  ;;  %v10569_v55 = vld [vmem:[#allocation5 + $0xa8c] sm:$0xf0] }
 0x102   :  { %5434 = vmatpush.bf16.msrb.mxu0 %v7545_v49  ;;  %5447 = vmatpush.bf16.msrb.mxu1 %v7673_v51  ;;  %v10501_v49 = vld [vmem:[#allocation5 + $0x86c] sm:$0xf0] }
 0x103   :  { %5460 = vmatpush.bf16.msrb.mxu2 %v7801_v60  ;;  %5473 = vmatpush.bf16.msrb.mxu3 %v7929_v63  ;;  %v10533_v51 = vld [vmem:[#allocation5 + $0x96c] sm:$0xf0]  ;;  %v8105_v60 = vor.u32 %v10501_v49, %v8104_v48  ;;  %v8681_v48 = vor.u32 %v10645_v37, %v8680_v36  ;;  %v8904_v36 = vld [vmem:[#allocation5 + $0xea0] sm:$0xf] }
 0x104   :  { %v8233_v61 = vor.u32 %v10533_v51, %v8232_v50  ;;  %v8664_v50 = vld [vmem:[#allocation5 + $0xcc0] sm:$0xf]  ;;  %v10641_v51 = vld [vmem:[#allocation5 + $0xccc] sm:$0xf0] }
 0x105   :  { %v8665_v1 = vor.u32 %v10641_v51, %v8664_v50  ;;  %v8888_v50 = vld [vmem:[#allocation5 + $0xe80] sm:$0xf]  ;;  %v10697_v51 = vld [vmem:[#allocation5 + $0xe8c] sm:$0xf0] }
 0x121   :  { %v270_v4 = vpop.f32.mrf.mxu0  ;;  %v290_v5 = vpop.f32.mrf.mxu1 }
 0x122   :  { %v11349_v9 = vpack.c.bf16 %v270_v4, %v270_v4  ;;  %v11351_v10 = vpack.c.bf16 %v290_v5, %v290_v5  ;;  %v8377_v4 = vor.u32 %v10569_v55, %v8376_v57  ;;  %v8505_v5 = vor.u32 %v10601_v59, %v8504_v58  ;;  %v10673_v55 = vld [vmem:[#allocation5 + $0xdcc] sm:$0xf0]  ;;  %v8312_v58 = vld [vmem:[#allocation5 + $0xa00] sm:$0xf] }
 0x123   :  { %v10553_v59 = vld [vmem:[#allocation5 + $0xa0c] sm:$0xf0] }
 0x124   :  { %5383 = vmatmul.bf16.vlgmr.msra.gmra.mxu0 %v11349_v9  ;;  %5396 = vmatmul.bf16.vlgmr.msra.gmra.mxu1 %v11351_v10  ;;  %v8313_v11 = vor.u32 %v10553_v59, %v8312_v58  ;;  %v8728_v58 = vld [vmem:[#allocation5 + $0xd40] sm:$0xf]  ;;  %v10657_v59 = vld [vmem:[#allocation5 + $0xd4c] sm:$0xf0] }
 0x125   :  { %5479 = vmatpush.bf16.msra.mxu0 %v8169_v6  ;;  %5492 = vmatpush.bf16.msra.mxu1 %v8297_v7  ;;  %v8360_v6 = vld [vmem:[#allocation5 + $0xa60] sm:$0xf]  ;;  %v10565_v7 = vld [vmem:[#allocation5 + $0xa6c] sm:$0xf0] }
 0x126   :  { %v8361_v20 = vor.u32 %v10565_v7, %v8360_v6 }
 0x128   :  { %v310_v24 = vpop.f32.mrf.mxu2  ;;  %v330_v25 = vpop.f32.mrf.mxu3 }
 0x129   :  { %v11355_v31 = vpack.c.bf16 %v310_v24, %v310_v24  ;;  %v11357_v32 = vpack.c.bf16 %v330_v25, %v330_v25  ;;  %5480 = vmatpush.bf16.msra.mxu0 %v8153_v17  ;;  %5493 = vmatpush.bf16.msra.mxu1 %v8281_v18  ;;  %v350_v52 = vpop.f32.mrf.mxu0  ;;  %v370_v53 = vpop.f32.mrf.mxu1  ;;  %v10493_v17 = vld [vmem:[#allocation5 + $0x82c] sm:$0xf0]  ;;  %v8200_v18 = vld [vmem:[#allocation5 + $0x920] sm:$0xf] }
 0x12a   :  { %v11361_v63 = vpack.c.bf16 %v350_v52, %v350_v52  ;;  %v11363_v0 = vpack.c.bf16 %v370_v53, %v370_v53  ;;  %v10561_v25 = vld [vmem:[#allocation5 + $0xa4c] sm:$0xf0]  ;;  %v8201_v29 = vor.u32 %v10525_v19, %v8200_v18  ;;  %v8792_v52 = vld [vmem:[#allocation5 + $0xdc0] sm:$0xf] }
 0x12b   :  { %5409 = vmatmul.bf16.vlgmr.msra.gmra.mxu2 %v11355_v31  ;;  %5422 = vmatmul.bf16.vlgmr.msra.gmra.mxu3 %v11357_v32  ;;  %v8345_v38 = vor.u32 %v10561_v25, %v8344_v22  ;;  %v8793_v7 = vor.u32 %v10673_v55, %v8792_v52  ;;  %v8920_v18 = vld [vmem:[#allocation5 + $0xec0] sm:$0xf]  ;;  %v10705_v19 = vld [vmem:[#allocation5 + $0xecc] sm:$0xf0] }
 0x12c   :  { %5505 = vmatpush.bf16.msra.mxu2 %v8425_v26  ;;  %5518 = vmatpush.bf16.msra.mxu3 %v8553_v27  ;;  %v8472_v26 = vld [vmem:[#allocation5 + $0xb40] sm:$0xf]  ;;  %v10593_v27 = vld [vmem:[#allocation5 + $0xb4c] sm:$0xf0]  ;;  %v8921_v34 = vor.u32 %v10705_v19, %v8920_v18 }
 0x12d   :  { %5481 = vmatpush.bf16.msra.mxu0 %v8137_v28  ;;  %5494 = vmatpush.bf16.msra.mxu1 %v8265_v33  ;;  %v8073_v28 = vor.u32 %v10493_v17, %v8072_v16  ;;  %v10489_v33 = vld [vmem:[#allocation5 + $0x80c] sm:$0xf0]  ;;  %v8473_v39 = vor.u32 %v10593_v27, %v8472_v26  ;;  %v8937_v16 = vor.u32 %v10709_v2, %v8936_v62  ;;  %v9016_v52 = vld [vmem:[#allocation5 + $0xf80] sm:$0xf] }
 0x12e   :  { %v8057_v46 = vor.u32 %v10489_v33, %v8056_v30  ;;  %v8760_v30 = vld [vmem:[#allocation5 + $0xd80] sm:$0xf]  ;;  %v10665_v33 = vld [vmem:[#allocation5 + $0xd8c] sm:$0xf0] }
 0x12f   :  { %v10625_v55 = vld [vmem:[#allocation5 + $0xc4c] sm:$0xf0]  ;;  %v8872_v62 = vld [vmem:[#allocation5 + $0xe60] sm:$0xf] }
 0x130   :  { %5506 = vmatpush.bf16.msra.mxu2 %v8409_v40  ;;  %5519 = vmatpush.bf16.msra.mxu3 %v8537_v41  ;;  %v390_v12 = vpop.f32.mrf.mxu2  ;;  %v410_v13 = vpop.f32.mrf.mxu3  ;;  %v8808_v40 = vld [vmem:[#allocation5 + $0xde0] sm:$0xf]  ;;  %v10677_v41 = vld [vmem:[#allocation5 + $0xdec] sm:$0xf0] }
 0x131   :  { %5482 = vmatpush.bf16.msra.mxu0 %v8121_v43  ;;  %5495 = vmatpush.bf16.msra.mxu1 %v8249_v44  ;;  %v11367_v23 = vpack.c.bf16 %v390_v12, %v390_v12  ;;  %v11369_v24 = vpack.c.bf16 %v410_v13, %v410_v13  ;;  %v10557_v43 = vld [vmem:[#allocation5 + $0xa2c] sm:$0xf0]  ;;  %v8456_v44 = vld [vmem:[#allocation5 + $0xb20] sm:$0xf]  ;;  %v8809_v49 = vor.u32 %v10677_v41, %v8808_v40  ;;  %v430_v53 = vpop.f32.mrf.mxu0 }
 0x132   :  { %v8457_v57 = vor.u32 %v10589_v45, %v8456_v44  ;;  %v10637_v13 = vld [vmem:[#allocation5 + $0xcac] sm:$0xf0]  ;;  %v9032_v40 = vld [vmem:[#allocation5 + $0xfa0] sm:$0xf] }
 0x133   :  { %v8649_v26 = vor.u32 %v10637_v13, %v8648_v8  ;;  %v10733_v41 = vld [vmem:[#allocation5 + $0xfac] sm:$0xf0]  ;;  %v8616_v44 = vld [vmem:[#allocation5 + $0xc60] sm:$0xf] }
 0x134   :  { %5507 = vmatpush.bf16.msra.mxu2 %v8393_v54  ;;  %5520 = vmatpush.bf16.msra.mxu3 %v8521_v56  ;;  %v450_v54 = vpop.f32.mrf.mxu1  ;;  %v8329_v56 = vor.u32 %v10557_v43, %v8328_v42  ;;  %v8761_v43 = vor.u32 %v10665_v33, %v8760_v30  ;;  %v10629_v45 = vld [vmem:[#allocation5 + $0xc6c] sm:$0xf0]  ;;  %v9000_v2 = vld [vmem:[#allocation5 + $0xf60] sm:$0xf] }
 0x135   :  { %5435 = vmatmul.bf16.vlgmr.msrb.gmra.mxu0 %v11361_v63  ;;  %5448 = vmatmul.bf16.vlgmr.msrb.gmra.mxu1 %v11363_v0  ;;  %v11375_v6 = vpack.c.bf16 %v450_v54, %v450_v54  ;;  %v8617_v54 = vor.u32 %v10629_v45, %v8616_v44  ;;  %v8584_v8 = vld [vmem:[#allocation5 + $0xc20] sm:$0xf]  ;;  %v10653_v13 = vld [vmem:[#allocation5 + $0xd2c] sm:$0xf0] }
 0x136   :  { %5483 = vmatpush.bf16.msra.mxu0 %v8105_v60  ;;  %5496 = vmatpush.bf16.msra.mxu1 %v8233_v61  ;;  %v8440_v60 = vld [vmem:[#allocation5 + $0xb00] sm:$0xf]  ;;  %v10585_v61 = vld [vmem:[#allocation5 + $0xb0c] sm:$0xf0] }
 0x137   :  { %v8441_v12 = vor.u32 %v10585_v61, %v8440_v60  ;;  %v8889_v60 = vor.u32 %v10697_v51, %v8888_v50  ;;  %v8984_v18 = vld [vmem:[#allocation5 + $0xf40] sm:$0xf]  ;;  %v10721_v19 = vld [vmem:[#allocation5 + $0xf4c] sm:$0xf0] }
 0x138   :  { %5508 = vmatpush.bf16.msra.mxu2 %v8377_v4  ;;  %5521 = vmatpush.bf16.msra.mxu3 %v8505_v5  ;;  %v10741_v4 = vld [vmem:[#allocation5 + $0xfec] sm:$0xf0]  ;;  %v11373_v5 = vpack.c.bf16 %v430_v53, %v430_v53  ;;  %v470_v22 = vpop.f32.mrf.mxu2  ;;  %v490_v25 = vpop.f32.mrf.mxu3  ;;  %v8985_v33 = vor.u32 %v10721_v19, %v8984_v18 }
 0x139   :  { %v9065_v17 = vor.u32 %v10741_v4, %v9064_v3  ;;  %v11379_v37 = vpack.c.bf16 %v470_v22, %v470_v22  ;;  %v10729_v53 = vld [vmem:[#allocation5 + $0xf8c] sm:$0xf0]  ;;  %v8568_v22 = vld [vmem:[#allocation5 + $0xc00] sm:$0xf]  ;;  %v510_v44 = vpop.f32.mrf.mxu0 }
 0x13a   :  { %5484 = vmatpush.bf16.msra.mxu0 %v8089_v14  ;;  %5497 = vmatpush.bf16.msra.mxu1 %v8217_v15  ;;  %v8776_v14 = vld [vmem:[#allocation5 + $0xda0] sm:$0xf]  ;;  %v10669_v15 = vld [vmem:[#allocation5 + $0xdac] sm:$0xf0]  ;;  %v9017_v61 = vor.u32 %v10729_v53, %v9016_v52 }
 0x13b   :  { %5461 = vmatmul.bf16.vlgmr.msrb.gmra.mxu2 %v11367_v23  ;;  %5474 = vmatmul.bf16.vlgmr.msrb.gmra.mxu3 %v11369_v24  ;;  %v8777_v27 = vor.u32 %v10669_v15, %v8776_v14  ;;  %v10725_v3 = vld [vmem:[#allocation5 + $0xf6c] sm:$0xf0] }
 0x13c   :  { %5509 = vmatpush.bf16.msra.mxu2 %v8361_v20  ;;  %5522 = vmatpush.bf16.msra.mxu3 %v8489_v21  ;;  %v9048_v20 = vld [vmem:[#allocation5 + $0xfc0] sm:$0xf]  ;;  %v10737_v21 = vld [vmem:[#allocation5 + $0xfcc] sm:$0xf0]  ;;  %v9001_v15 = vor.u32 %v10725_v3, %v9000_v2  ;;  %v530_v50 = vpop.f32.mrf.mxu1 }
 0x13d   :  { %v9049_v35 = vor.u32 %v10737_v21, %v9048_v20  ;;  %v10801_v53 = vld [vmem:[#allocation5 + $0x11cc] sm:$0xf0] }
 0x13e   :  { %5485 = vmatpush.bf16.msra.mxu0 %v8073_v28  ;;  %5498 = vmatpush.bf16.msra.mxu1 %v8201_v29  ;;  %v8632_v28 = vld [vmem:[#allocation5 + $0xc80] sm:$0xf]  ;;  %v10633_v29 = vld [vmem:[#allocation5 + $0xc8c] sm:$0xf0] }
 0x13f   :  { %v8633_v42 = vor.u32 %v10633_v29, %v8632_v28  ;;  %v9192_v28 = vld [vmem:[#allocation5 + $0x10e0] sm:$0xf]  ;;  %v10773_v29 = vld [vmem:[#allocation5 + $0x10ec] sm:$0xf0] }
 0x140   :  { %5510 = vmatpush.bf16.msra.mxu2 %v8345_v38  ;;  %5523 = vmatpush.bf16.msra.mxu3 %v8473_v39  ;;  %v11381_v38 = vpack.c.bf16 %v490_v25, %v490_v25  ;;  %v10701_v39 = vld [vmem:[#allocation5 + $0xeac] sm:$0xf0]  ;;  %v9193_v45 = vor.u32 %v10773_v29, %v9192_v28  ;;  %v570_v18 = vpop.f32.mrf.mxu3 }
 0x141   :  { %v10617_v25 = vld [vmem:[#allocation5 + $0xc0c] sm:$0xf0]  ;;  %v11393_v29 = vpack.c.bf16 %v570_v18, %v570_v18  ;;  %v9368_v18 = vld [vmem:[#allocation5 + $0x1240] sm:$0xf] }
 0x142   :  { %5486 = vmatpush.bf16.msra.mxu0 %v8057_v46  ;;  %5499 = vmatpush.bf16.msra.mxu1 %v8185_v47  ;;  %v8744_v46 = vld [vmem:[#allocation5 + $0xd60] sm:$0xf]  ;;  %v10661_v47 = vld [vmem:[#allocation5 + $0xd6c] sm:$0xf0] }
 0x143   :  { %v10833_v19 = vld [vmem:[#allocation5 + $0x12cc] sm:$0xf0] }
 0x144   :  { %5511 = vmatpush.bf16.msra.mxu2 %v8329_v56  ;;  %5524 = vmatpush.bf16.msra.mxu3 %v8457_v57  ;;  %v8745_v56 = vor.u32 %v10661_v47, %v8744_v46  ;;  %v8600_v57 = vld [vmem:[#allocation5 + $0xc40] sm:$0xf]  ;;  %v10761_v28 = vld [vmem:[#allocation5 + $0x108c] sm:$0xf0] }
 0x145   :  { %5487 = vmatmul.bf16.vlgmr.msra.gmra.mxu0 %v11373_v5  ;;  %5500 = vmatmul.bf16.vlgmr.msra.gmra.mxu1 %v11375_v6  ;;  %v8601_v4 = vor.u32 %v10625_v55, %v8600_v57  ;;  %v9176_v47 = vld [vmem:[#allocation5 + $0x10c0] sm:$0xf]  ;;  %v10713_v55 = vld [vmem:[#allocation5 + $0xf0c] sm:$0xf0] }
 0x146   :  { %5531 = vmatpush.bf16.msrb.mxu0 %v8681_v48  ;;  %5544 = vmatpush.bf16.msrb.mxu1 %v8809_v49  ;;  %v8905_v48 = vor.u32 %v10701_v39, %v8904_v36  ;;  %v9033_v49 = vor.u32 %v10733_v41, %v9032_v40  ;;  %v8840_v36 = vld [vmem:[#allocation5 + $0xe20] sm:$0xf]  ;;  %v10685_v39 = vld [vmem:[#allocation5 + $0xe2c] sm:$0xf0] }
 0x147   :  { %v8968_v40 = vld [vmem:[#allocation5 + $0xf20] sm:$0xf]  ;;  %v10717_v41 = vld [vmem:[#allocation5 + $0xf2c] sm:$0xf0]  ;;  %v8841_v51 = vor.u32 %v10685_v39, %v8840_v36 }
 0x148   :  { %5512 = vmatpush.bf16.msra.mxu2 %v8313_v11  ;;  %5525 = vmatpush.bf16.msra.mxu3 %v8441_v12  ;;  %v10621_v11 = vld [vmem:[#allocation5 + $0xc2c] sm:$0xf0]  ;;  %v8712_v12 = vld [vmem:[#allocation5 + $0xd20] sm:$0xf]  ;;  %v8969_v52 = vor.u32 %v10717_v41, %v8968_v40 }
 0x149   :  { %v8585_v20 = vor.u32 %v10621_v11, %v8584_v8  ;;  %v8713_v21 = vor.u32 %v10653_v13, %v8712_v12  ;;  %v8952_v57 = vld [vmem:[#allocation5 + $0xf00] sm:$0xf]  ;;  %v10765_v11 = vld [vmem:[#allocation5 + $0x10ac] sm:$0xf0]  ;;  %v550_v12 = vpop.f32.mrf.mxu2 }
 0x14a   :  { %5532 = vmatpush.bf16.msrb.mxu0 %v8665_v1  ;;  %5545 = vmatpush.bf16.msrb.mxu1 %v8793_v7  ;;  %v10693_v1 = vld [vmem:[#allocation5 + $0xe6c] sm:$0xf0]  ;;  %v8729_v7 = vor.u32 %v10657_v59, %v8728_v58  ;;  %v9448_v58 = vld [vmem:[#allocation5 + $0x12e0] sm:$0xf]  ;;  %v11385_v59 = vpack.c.bf16 %v510_v44, %v510_v44 }
 0x14b   :  { %5513 = vmatmul.bf16.vlgmr.msra.gmra.mxu2 %v11379_v37  ;;  %5526 = vmatmul.bf16.vlgmr.msra.gmra.mxu3 %v11381_v38  ;;  %v8873_v14 = vor.u32 %v10693_v1, %v8872_v62  ;;  %v10869_v62 = vld [vmem:[#allocation5 + $0x13ec] sm:$0xf0]  ;;  %v11387_v1 = vpack.c.bf16 %v530_v50, %v530_v50  ;;  %v9160_v8 = vld [vmem:[#allocation5 + $0x10a0] sm:$0xf] }
 0x14c   :  { %5557 = vmatpush.bf16.msrb.mxu2 %v8937_v16  ;;  %5570 = vmatpush.bf16.msrb.mxu3 %v9065_v17  ;;  %v8856_v16 = vld [vmem:[#allocation5 + $0xe40] sm:$0xf]  ;;  %v10689_v17 = vld [vmem:[#allocation5 + $0xe4c] sm:$0xf0] }
 0x14d   :  { %v8857_v30 = vor.u32 %v10689_v17, %v8856_v16  ;;  %v10797_v16 = vld [vmem:[#allocation5 + $0x11ac] sm:$0xf0]  ;;  %v9432_v17 = vld [vmem:[#allocation5 + $0x12c0] sm:$0xf] }
 0x14e   :  { %5533 = vmatpush.bf16.msrb.mxu0 %v8649_v26  ;;  %5546 = vmatpush.bf16.msrb.mxu1 %v8777_v27  ;;  %v8696_v26 = vld [vmem:[#allocation5 + $0xd00] sm:$0xf]  ;;  %v10649_v27 = vld [vmem:[#allocation5 + $0xd0c] sm:$0xf0] }
 0x14f   :  { %v9416_v36 = vld [vmem:[#allocation5 + $0x12a0] sm:$0xf]  ;;  %v10829_v39 = vld [vmem:[#allocation5 + $0x12ac] sm:$0xf0] }
 0x150   :  { %5558 = vmatpush.bf16.msrb.mxu2 %v8921_v34  ;;  %5571 = vmatpush.bf16.msrb.mxu3 %v9049_v35  ;;  %v9320_v34 = vld [vmem:[#allocation5 + $0x11e0] sm:$0xf]  ;;  %v10805_v35 = vld [vmem:[#allocation5 + $0x11ec] sm:$0xf0] }
 0x151   :  { %v9321_v46 = vor.u32 %v10805_v35, %v9320_v34  ;;  %v9272_v34 = vld [vmem:[#allocation5 + $0x1180] sm:$0xf]  ;;  %v10793_v35 = vld [vmem:[#allocation5 + $0x118c] sm:$0xf0] }
 0x152   :  { %5534 = vmatpush.bf16.msrb.mxu0 %v8633_v42  ;;  %5547 = vmatpush.bf16.msrb.mxu1 %v8761_v43  ;;  %v8569_v42 = vor.u32 %v10617_v25, %v8568_v22  ;;  %v8697_v43 = vor.u32 %v10649_v27, %v8696_v26  ;;  %v11391_v22 = vpack.c.bf16 %v550_v12, %v550_v12  ;;  %v9144_v27 = vld [vmem:[#allocation5 + $0x1080] sm:$0xf]  ;;  %v10861_v41 = vld [vmem:[#allocation5 + $0x13ac] sm:$0xf0] }
 0x153   :  { %v9161_v25 = vor.u32 %v10765_v11, %v9160_v8  ;;  %v9544_v40 = vld [vmem:[#allocation5 + $0x13a0] sm:$0xf] }
 0x154   :  { %5559 = vmatpush.bf16.msrb.mxu2 %v8905_v48  ;;  %5572 = vmatpush.bf16.msrb.mxu3 %v9033_v49  ;;  %v10769_v48 = vld [vmem:[#allocation5 + $0x10cc] sm:$0xf0]  ;;  %v9304_v49 = vld [vmem:[#allocation5 + $0x11c0] sm:$0xf] }
 0x155   :  { %v9177_v2 = vor.u32 %v10769_v48, %v9176_v47  ;;  %v9305_v3 = vor.u32 %v10801_v53, %v9304_v49  ;;  %v9128_v44 = vld [vmem:[#allocation5 + $0x1060] sm:$0xf]  ;;  %v9545_v47 = vor.u32 %v10861_v41, %v9544_v40  ;;  %v10789_v49 = vld [vmem:[#allocation5 + $0x116c] sm:$0xf0] }
 0x156   :  { %5535 = vmatpush.bf16.msrb.mxu0 %v8617_v54  ;;  %5548 = vmatpush.bf16.msrb.mxu1 %v8745_v56  ;;  %v8824_v54 = vld [vmem:[#allocation5 + $0xe00] sm:$0xf]  ;;  %v10681_v56 = vld [vmem:[#allocation5 + $0xe0c] sm:$0xf0] }
 0x157   :  { %v9256_v48 = vld [vmem:[#allocation5 + $0x1160] sm:$0xf]  ;;  %v10857_v53 = vld [vmem:[#allocation5 + $0x138c] sm:$0xf0] }
 0x158   :  { %5560 = vmatpush.bf16.msrb.mxu2 %v8889_v60  ;;  %5573 = vmatpush.bf16.msrb.mxu3 %v9017_v61  ;;  %v10837_v60 = vld [vmem:[#allocation5 + $0x12ec] sm:$0xf0]  ;;  %v9576_v61 = vld [vmem:[#allocation5 + $0x13e0] sm:$0xf] }
 0x159   :  { %v9449_v13 = vor.u32 %v10837_v60, %v9448_v58  ;;  %v9400_v50 = vld [vmem:[#allocation5 + $0x1280] sm:$0xf]  ;;  %v10933_v41 = vld [vmem:[#allocation5 + $0x15ec] sm:$0xf0] }
 0x15a   :  { %5536 = vmatpush.bf16.msrb.mxu0 %v8601_v4  ;;  %5549 = vmatpush.bf16.msrb.mxu1 %v8729_v7  ;;  %v8825_v4 = vor.u32 %v10681_v56, %v8824_v54  ;;  %v8953_v7 = vor.u32 %v10713_v55, %v8952_v57  ;;  %v9257_v56 = vor.u32 %v10789_v49, %v9256_v48  ;;  %v9112_v57 = vld [vmem:[#allocation5 + $0x1040] sm:$0xf]  ;;  %v10753_v55 = vld [vmem:[#allocation5 + $0x104c] sm:$0xf0]  ;;  %v590_v48 = vpop.f32.mrf.mxu0 }
 0x15b   :  { %v9113_v8 = vor.u32 %v10753_v55, %v9112_v57  ;;  %v9096_v12 = vld [vmem:[#allocation5 + $0x1020] sm:$0xf]  ;;  %v10929_v55 = vld [vmem:[#allocation5 + $0x15cc] sm:$0xf0] }
 0x15c   :  { %5561 = vmatpush.bf16.msrb.mxu2 %v8873_v14  ;;  %5574 = vmatpush.bf16.msrb.mxu3 %v9001_v15  ;;  %v9577_v14 = vor.u32 %v10869_v62, %v9576_v61  ;;  %v9288_v15 = vld [vmem:[#allocation5 + $0x11a0] sm:$0xf]  ;;  %v10785_v62 = vld [vmem:[#allocation5 + $0x114c] sm:$0xf0] }
 0x15d   :  { %v9289_v26 = vor.u32 %v10797_v16, %v9288_v15  ;;  %v9240_v61 = vld [vmem:[#allocation5 + $0x1140] sm:$0xf] }
 0x15e   :  { %5537 = vmatpush.bf16.msrb.mxu0 %v8585_v20  ;;  %5550 = vmatpush.bf16.msrb.mxu1 %v8713_v21  ;;  %v9560_v20 = vld [vmem:[#allocation5 + $0x13c0] sm:$0xf]  ;;  %v10865_v21 = vld [vmem:[#allocation5 + $0x13cc] sm:$0xf0]  ;;  %v9241_v11 = vor.u32 %v10785_v62, %v9240_v61 }
 0x15f   :  { %v9224_v16 = vld [vmem:[#allocation5 + $0x1120] sm:$0xf]  ;;  %v10841_v62 = vld [vmem:[#allocation5 + $0x130c] sm:$0xf0] }
 0x160   :  { %5562 = vmatpush.bf16.msrb.mxu2 %v8857_v30  ;;  %5575 = vmatpush.bf16.msrb.mxu3 %v8985_v33  ;;  %v9433_v30 = vor.u32 %v10833_v19, %v9432_v17  ;;  %v9561_v33 = vor.u32 %v10865_v21, %v9560_v20  ;;  %v10781_v17 = vld [vmem:[#allocation5 + $0x112c] sm:$0xf0]  ;;  %v9496_v20 = vld [vmem:[#allocation5 + $0x1340] sm:$0xf] }
 0x161   :  { %v10817_v19 = vld [vmem:[#allocation5 + $0x124c] sm:$0xf0]  ;;  %v9832_v40 = vld [vmem:[#allocation5 + $0x15e0] sm:$0xf] }
 0x162   :  { %5538 = vmatpush.bf16.msrb.mxu0 %v8569_v42  ;;  %5551 = vmatpush.bf16.msrb.mxu1 %v8697_v43  ;;  %v9145_v42 = vor.u32 %v10761_v28, %v9144_v27  ;;  %v9273_v43 = vor.u32 %v10793_v35, %v9272_v34  ;;  %v10849_v21 = vld [vmem:[#allocation5 + $0x134c] sm:$0xf0]  ;;  %v9080_v27 = vld [vmem:[#allocation5 + $0x1000] sm:$0xf] }
 0x163   :  { %v10745_v28 = vld [vmem:[#allocation5 + $0x100c] sm:$0xf0]  ;;  %v9497_v34 = vor.u32 %v10849_v21, %v9496_v20  ;;  %v9464_v61 = vld [vmem:[#allocation5 + $0x1300] sm:$0xf] }
 0x164   :  { %5563 = vmatpush.bf16.msrb.mxu2 %v8841_v51  ;;  %5576 = vmatpush.bf16.msrb.mxu3 %v8969_v52  ;;  %v10825_v51 = vld [vmem:[#allocation5 + $0x128c] sm:$0xf0]  ;;  %v9528_v52 = vld [vmem:[#allocation5 + $0x1380] sm:$0xf] }
 0x165   :  { %5539 = vmatmul.bf16.vlgmr.msrb.gmra.mxu0 %v11385_v59  ;;  %5552 = vmatmul.bf16.vlgmr.msrb.gmra.mxu1 %v11387_v1  ;;  %v9401_v58 = vor.u32 %v10825_v51, %v9400_v50  ;;  %v9529_v60 = vor.u32 %v10857_v53, %v9528_v52  ;;  %v10777_v35 = vld [vmem:[#allocation5 + $0x110c] sm:$0xf0]  ;;  %v9833_v50 = vor.u32 %v10933_v41, %v9832_v40  ;;  %v9688_v51 = vld [vmem:[#allocation5 + $0x14c0] sm:$0xf] }
 0x166   :  { %5583 = vmatpush.bf16.msra.mxu0 %v9193_v45  ;;  %5596 = vmatpush.bf16.msra.mxu1 %v9321_v46  ;;  %v10757_v45 = vld [vmem:[#allocation5 + $0x106c] sm:$0xf0]  ;;  %v9417_v46 = vor.u32 %v10829_v39, %v9416_v36  ;;  %v9704_v36 = vld [vmem:[#allocation5 + $0x14e0] sm:$0xf] }
 0x167   :  { %v9129_v54 = vor.u32 %v10757_v45, %v9128_v44  ;;  %v10901_v39 = vld [vmem:[#allocation5 + $0x14ec] sm:$0xf0]  ;;  %v9480_v44 = vld [vmem:[#allocation5 + $0x1320] sm:$0xf] }
 0x168   :  { %5564 = vmatpush.bf16.msrb.mxu2 %v8825_v4  ;;  %5577 = vmatpush.bf16.msrb.mxu3 %v8953_v7  ;;  %v9512_v4 = vld [vmem:[#allocation5 + $0x1360] sm:$0xf]  ;;  %v10853_v7 = vld [vmem:[#allocation5 + $0x136c] sm:$0xf0]  ;;  %v9705_v49 = vor.u32 %v10901_v39, %v9704_v36 }
 0x169   :  { %v9513_v15 = vor.u32 %v10853_v7, %v9512_v4  ;;  %v10845_v45 = vld [vmem:[#allocation5 + $0x132c] sm:$0xf0]  ;;  %v9816_v53 = vld [vmem:[#allocation5 + $0x15c0] sm:$0xf] }
 0x16a   :  { %5584 = vmatpush.bf16.msra.mxu0 %v9177_v2  ;;  %5597 = vmatpush.bf16.msra.mxu1 %v9305_v3  ;;  %v9384_v2 = vld [vmem:[#allocation5 + $0x1260] sm:$0xf]  ;;  %v10821_v3 = vld [vmem:[#allocation5 + $0x126c] sm:$0xf0]  ;;  %v9481_v57 = vor.u32 %v10845_v45, %v9480_v44 }
 0x16b   :  { %5565 = vmatmul.bf16.vlgmr.msrb.gmra.mxu2 %v11391_v22  ;;  %5578 = vmatmul.bf16.vlgmr.msrb.gmra.mxu3 %v11393_v29  ;;  %v10897_v52 = vld [vmem:[#allocation5 + $0x14cc] sm:$0xf0]  ;;  %v10088_v7 = vld [vmem:[#allocation5 + $0x17e0] sm:$0xf] }
 0x16c   :  { %5609 = vmatpush.bf16.msra.mxu2 %v9449_v13  ;;  %5622 = vmatpush.bf16.msra.mxu3 %v9577_v14  ;;  %v10749_v13 = vld [vmem:[#allocation5 + $0x102c] sm:$0xf0]  ;;  %v9385_v14 = vor.u32 %v10821_v3, %v9384_v2  ;;  %v9960_v2 = vld [vmem:[#allocation5 + $0x16e0] sm:$0xf]  ;;  %v11397_v3 = vpack.c.bf16 %v590_v48, %v590_v48 }
 0x16d   :  { %v10965_v4 = vld [vmem:[#allocation5 + $0x16ec] sm:$0xf0]  ;;  %v9800_v21 = vld [vmem:[#allocation5 + $0x15a0] sm:$0xf] }
 0x16e   :  { %5585 = vmatpush.bf16.msra.mxu0 %v9161_v25  ;;  %5598 = vmatpush.bf16.msra.mxu1 %v9289_v26  ;;  %v9097_v25 = vor.u32 %v10749_v13, %v9096_v12  ;;  %v9225_v26 = vor.u32 %v10781_v17, %v9224_v16  ;;  %v9689_v12 = vor.u32 %v10897_v52, %v9688_v51  ;;  %v9672_v16 = vld [vmem:[#allocation5 + $0x14a0] sm:$0xf]  ;;  %v10893_v17 = vld [vmem:[#allocation5 + $0x14ac] sm:$0xf0] }
 0x16f   :  { %v9817_v13 = vor.u32 %v10929_v55, %v9816_v53  ;;  %v9656_v39 = vld [vmem:[#allocation5 + $0x1480] sm:$0xf]  ;;  %v10889_v40 = vld [vmem:[#allocation5 + $0x148c] sm:$0xf0] }
 0x170   :  { %5610 = vmatpush.bf16.msra.mxu2 %v9433_v30  ;;  %5623 = vmatpush.bf16.msra.mxu3 %v9561_v33  ;;  %v9208_v30 = vld [vmem:[#allocation5 + $0x1100] sm:$0xf]  ;;  %v9369_v33 = vor.u32 %v10817_v19, %v9368_v18  ;;  %v630_v18 = vpop.f32.mrf.mxu2  ;;  %v9961_v19 = vor.u32 %v10965_v4, %v9960_v2  ;;  %v10921_v45 = vld [vmem:[#allocation5 + $0x158c] sm:$0xf0] }
 0x171   :  { %v9784_v44 = vld [vmem:[#allocation5 + $0x1580] sm:$0xf]  ;;  %v10885_v53 = vld [vmem:[#allocation5 + $0x146c] sm:$0xf0] }
 0x172   :  { %5586 = vmatpush.bf16.msra.mxu0 %v9145_v42  ;;  %5599 = vmatpush.bf16.msra.mxu1 %v9273_v43  ;;  %v9352_v42 = vld [vmem:[#allocation5 + $0x1220] sm:$0xf]  ;;  %v10813_v43 = vld [vmem:[#allocation5 + $0x122c] sm:$0xf0]  ;;  %v9785_v51 = vor.u32 %v10921_v45, %v9784_v44 }
 0x173   :  { %v10056_v48 = vld [vmem:[#allocation5 + $0x17a0] sm:$0xf]  ;;  %v10917_v55 = vld [vmem:[#allocation5 + $0x156c] sm:$0xf0] }
 0x174   :  { %5611 = vmatpush.bf16.msra.mxu2 %v9417_v46  ;;  %5624 = vmatpush.bf16.msra.mxu3 %v9545_v47  ;;  %v9081_v46 = vor.u32 %v10745_v28, %v9080_v27  ;;  %v9209_v47 = vor.u32 %v10777_v35, %v9208_v30  ;;  %v650_v27 = vpop.f32.mrf.mxu3  ;;  %v10961_v28 = vld [vmem:[#allocation5 + $0x16cc] sm:$0xf0]  ;;  %v10072_v30 = vld [vmem:[#allocation5 + $0x17c0] sm:$0xf]  ;;  %v9673_v35 = vor.u32 %v10893_v17, %v9672_v16 }
 0x175   :  { %v11405_v41 = vpack.c.bf16 %v650_v27, %v650_v27  ;;  %v9640_v52 = vld [vmem:[#allocation5 + $0x1460] sm:$0xf]  ;;  %v10949_v17 = vld [vmem:[#allocation5 + $0x166c] sm:$0xf0] }
 0x176   :  { %5587 = vmatpush.bf16.msra.mxu0 %v9129_v54  ;;  %5600 = vmatpush.bf16.msra.mxu1 %v9257_v56  ;;  %v610_v54 = vpop.f32.mrf.mxu1  ;;  %v9353_v56 = vor.u32 %v10813_v43, %v9352_v42  ;;  %v9641_v2 = vor.u32 %v10885_v53, %v9640_v52  ;;  %v9896_v16 = vld [vmem:[#allocation5 + $0x1660] sm:$0xf]  ;;  %v10873_v45 = vld [vmem:[#allocation5 + $0x140c] sm:$0xf0]  ;;  %v10291_v52 = vld [vmem:[#allocation5 + $0x1e4] sm:$0xf] }
 0x177   :  { %v9897_v27 = vor.u32 %v10949_v17, %v9896_v16  ;;  %v9592_v44 = vld [vmem:[#allocation5 + $0x1400] sm:$0xf]  ;;  %v7274_v53 = vld [vmem:[#allocation5 + $0x1f0] sm:$0xf0]  ;;  %v10937_v17 = vld [vmem:[#allocation5 + $0x160c] sm:$0xf0] }
 0x178   :  { %5612 = vmatpush.bf16.msra.mxu2 %v9401_v58  ;;  %5625 = vmatpush.bf16.msra.mxu3 %v9529_v60  ;;  %v9336_v58 = vld [vmem:[#allocation5 + $0x1200] sm:$0xf]  ;;  %v10809_v60 = vld [vmem:[#allocation5 + $0x120c] sm:$0xf0] }
 0x179   :  { %v9848_v16 = vld [vmem:[#allocation5 + $0x1600] sm:$0xf] }
 0x17a   :  { %5588 = vmatpush.bf16.msra.mxu0 %v9113_v8  ;;  %5601 = vmatpush.bf16.msra.mxu1 %v9241_v11  ;;  %v10997_v8 = vld [vmem:[#allocation5 + $0x17ec] sm:$0xf0]  ;;  %v11399_v11 = vpack.c.bf16 %v610_v54, %v610_v54 }
 0x17b   :  { %v10089_v20 = vor.u32 %v10997_v8, %v10088_v7  ;;  %v9624_v7 = vld [vmem:[#allocation5 + $0x1440] sm:$0xf]  ;;  %v10881_v8 = vld [vmem:[#allocation5 + $0x144c] sm:$0xf0] }
 0x17c   :  { %5613 = vmatpush.bf16.msra.mxu2 %v9385_v14  ;;  %5626 = vmatpush.bf16.msra.mxu3 %v9513_v15  ;;  %v9337_v14 = vor.u32 %v10809_v60, %v9336_v58  ;;  %v9465_v15 = vor.u32 %v10841_v62, %v9464_v61  ;;  %v9912_v58 = vld [vmem:[#allocation5 + $0x1680] sm:$0xf]  ;;  %v10953_v60 = vld [vmem:[#allocation5 + $0x168c] sm:$0xf0] }
 0x17d   :  { %v10040_v61 = vld [vmem:[#allocation5 + $0x1780] sm:$0xf]  ;;  %v10985_v62 = vld [vmem:[#allocation5 + $0x178c] sm:$0xf0] }
 0x17e   :  { %5589 = vmatpush.bf16.msra.mxu0 %v9097_v25  ;;  %5602 = vmatpush.bf16.msra.mxu1 %v9225_v26  ;;  %v10925_v25 = vld [vmem:[#allocation5 + $0x15ac] sm:$0xf0]  ;;  %v9944_v26 = vld [vmem:[#allocation5 + $0x16c0] sm:$0xf] }
 0x17f   :  { %v9801_v36 = vor.u32 %v10925_v25, %v9800_v21  ;;  %v9945_v42 = vor.u32 %v10961_v28, %v9944_v26  ;;  %v9608_v25 = vld [vmem:[#allocation5 + $0x1420] sm:$0xf]  ;;  %v10877_v26 = vld [vmem:[#allocation5 + $0x142c] sm:$0xf0] }
 0x180   :  { %5614 = vmatpush.bf16.msra.mxu2 %v9369_v33  ;;  %5627 = vmatpush.bf16.msra.mxu3 %v9497_v34  ;;  %v10993_v33 = vld [vmem:[#allocation5 + $0x17cc] sm:$0xf0]  ;;  %v11403_v34 = vpack.c.bf16 %v630_v18, %v630_v18  ;;  %v10024_v18 = vld [vmem:[#allocation5 + $0x1760] sm:$0xf] }
 0x181   :  { %v10073_v43 = vor.u32 %v10993_v33, %v10072_v30  ;;  %v9736_v30 = vld [vmem:[#allocation5 + $0x1520] sm:$0xf]  ;;  %v10909_v33 = vld [vmem:[#allocation5 + $0x152c] sm:$0xf0] }
 0x182   :  { %5590 = vmatpush.bf16.msra.mxu0 %v9081_v46  ;;  %5603 = vmatpush.bf16.msra.mxu1 %v9209_v47  ;;  %v9928_v46 = vld [vmem:[#allocation5 + $0x16a0] sm:$0xf]  ;;  %v10957_v47 = vld [vmem:[#allocation5 + $0x16ac] sm:$0xf0] }
 0x183   :  { %v9929_v54 = vor.u32 %v10957_v47, %v9928_v46  ;;  %v9720_v46 = vld [vmem:[#allocation5 + $0x1500] sm:$0xf] }
 0x184   :  { %5615 = vmatpush.bf16.msra.mxu2 %v9353_v56  ;;  %5628 = vmatpush.bf16.msra.mxu3 %v9481_v57  ;;  %v9768_v57 = vld [vmem:[#allocation5 + $0x1560] sm:$0xf] }
 0x185   :  { %5591 = vmatmul.bf16.vlgmr.msra.gmra.mxu0 %v11397_v3  ;;  %5604 = vmatmul.bf16.vlgmr.msra.gmra.mxu1 %v11399_v11  ;;  %v9769_v4 = vor.u32 %v10917_v55, %v9768_v57  ;;  %v9992_v57 = vld [vmem:[#allocation5 + $0x1720] sm:$0xf]  ;;  %v10973_v55 = vld [vmem:[#allocation5 + $0x172c] sm:$0xf0] }
 0x186   :  { %5635 = vmatpush.bf16.msrb.mxu0 %v9705_v49  ;;  %5648 = vmatpush.bf16.msrb.mxu1 %v9833_v50  ;;  %v10989_v49 = vld [vmem:[#allocation5 + $0x17ac] sm:$0xf0]  ;;  %v9657_v50 = vor.u32 %v10889_v40, %v9656_v39  ;;  %v10008_v39 = vld [vmem:[#allocation5 + $0x1740] sm:$0xf] }
 0x187   :  { %v10057_v56 = vor.u32 %v10989_v49, %v10056_v48  ;;  %v10977_v40 = vld [vmem:[#allocation5 + $0x174c] sm:$0xf0] }
 0x188   :  { %5616 = vmatpush.bf16.msra.mxu2 %v9337_v14  ;;  %5629 = vmatpush.bf16.msra.mxu3 %v9465_v15  ;;  %v9752_v14 = vld [vmem:[#allocation5 + $0x1540] sm:$0xf]  ;;  %v10913_v15 = vld [vmem:[#allocation5 + $0x154c] sm:$0xf0]  ;;  %v10009_v48 = vor.u32 %v10977_v40, %v10008_v39  ;;  %v9849_v39 = vor.u32 %v10937_v17, %v9848_v16  ;;  %v7498_v16 = vld [vmem:[#allocation5 + $0x3b0] sm:$0xf0] }
 0x189   :  { %v9753_v21 = vor.u32 %v10913_v15, %v9752_v14  ;;  %v10905_v49 = vld [vmem:[#allocation5 + $0x150c] sm:$0xf0]  ;;  %v9993_v15 = vor.u32 %v10973_v55, %v9992_v57 }
 0x18a   :  { %5636 = vmatpush.bf16.msrb.mxu0 %v9689_v12  ;;  %5649 = vmatpush.bf16.msrb.mxu1 %v9817_v13  ;;  %v9913_v12 = vor.u32 %v10953_v60, %v9912_v58  ;;  %v10041_v13 = vor.u32 %v10985_v62, %v10040_v61  ;;  %v9593_v58 = vor.u32 %v10873_v45, %v9592_v44  ;;  %v10255_v61 = vld [vmem:[#allocation5 + $0xc4] sm:$0xf]  ;;  %v670_v62 = vpop.f32.mrf.mxu0  ;;  %v730_v45 = vpop.f32.mrf.mxu3 }
 0x18b   :  { %5617 = vmatmul.bf16.vlgmr.msra.gmra.mxu2 %v11403_v34  ;;  %5630 = vmatmul.bf16.vlgmr.msra.gmra.mxu3 %v11405_v41  ;;  %v9721_v60 = vor.u32 %v10905_v49, %v9720_v46  ;;  %v10283_v44 = vld [vmem:[#allocation5 + $0x1a4] sm:$0xf] }
 0x18c   :  { %5661 = vmatpush.bf16.msrb.mxu2 %v9961_v19  ;;  %5674 = vmatpush.bf16.msrb.mxu3 %v10089_v20  ;;  %v10981_v19 = vld [vmem:[#allocation5 + $0x176c] sm:$0xf0]  ;;  %v9625_v20 = vor.u32 %v10881_v8, %v9624_v7  ;;  %v7130_v7 = vld [vmem:[#allocation5 + $0xd0] sm:$0xf0]  ;;  %v10287_v8 = vld [vmem:[#allocation5 + $0x1c4] sm:$0xf] }
 0x18d   :  { %v10025_v28 = vor.u32 %v10981_v19, %v10024_v18  ;;  %v9976_v18 = vld [vmem:[#allocation5 + $0x1700] sm:$0xf]  ;;  %v10969_v19 = vld [vmem:[#allocation5 + $0x170c] sm:$0xf0] }
 0x18e   :  { %5637 = vmatpush.bf16.msrb.mxu0 %v9673_v35  ;;  %5650 = vmatpush.bf16.msrb.mxu1 %v9801_v36  ;;  %v9880_v35 = vld [vmem:[#allocation5 + $0x1640] sm:$0xf]  ;;  %v10945_v36 = vld [vmem:[#allocation5 + $0x164c] sm:$0xf0]  ;;  %v9977_v40 = vor.u32 %v10969_v19, %v9976_v18 }
 0x18f   :  { %v9881_v47 = vor.u32 %v10945_v36, %v9880_v35  ;;  %v710_v36 = vpop.f32.mrf.mxu2 }
 0x190   :  { %5662 = vmatpush.bf16.msrb.mxu2 %v9945_v42  ;;  %5675 = vmatpush.bf16.msrb.mxu3 %v10073_v43  ;;  %v9609_v42 = vor.u32 %v10877_v26, %v9608_v25  ;;  %v9737_v43 = vor.u32 %v10909_v33, %v9736_v30  ;;  %v11409_v25 = vpack.c.bf16 %v670_v62, %v670_v62  ;;  %v10355_v26 = vld [vmem:[#allocation5 + $0x3e4] sm:$0xf]  ;;  %v7098_v62 = vld [vmem:[#allocation5 + $0x90] sm:$0xf0] }
 0x191   :  { %v7133_v33 = vor.u32 %v10255_v61, %v7130_v7  ;;  %v10247_v61 = vld [vmem:[#allocation5 + $0x84] sm:$0xf] }
 0x192   :  { %5638 = vmatpush.bf16.msrb.mxu0 %v9657_v50  ;;  %5651 = vmatpush.bf16.msrb.mxu1 %v9785_v51  ;;  %v10259_v50 = vld [vmem:[#allocation5 + $0xe4] sm:$0xf]  ;;  %v7146_v51 = vld [vmem:[#allocation5 + $0xf0] sm:$0xf0]  ;;  %v7101_v18 = vor.u32 %v10247_v61, %v7098_v62 }
 0x193   :  { %v10235_v61 = vld [vmem:[#allocation5 + $0x24] sm:$0xf]  ;;  %v7050_v62 = vld [vmem:[#allocation5 + $0x30] sm:$0xf0] }
 0x194   :  { %5663 = vmatpush.bf16.msrb.mxu2 %v9929_v54  ;;  %5676 = vmatpush.bf16.msrb.mxu3 %v10057_v56  ;;  %v9864_v54 = vld [vmem:[#allocation5 + $0x1620] sm:$0xf]  ;;  %v10941_v56 = vld [vmem:[#allocation5 + $0x162c] sm:$0xf0] }
 0x195   :  { %v9865_v14 = vor.u32 %v10941_v56, %v9864_v54  ;;  %v11415_v54 = vpack.c.bf16 %v710_v36, %v710_v36  ;;  %v11417_v56 = vpack.c.bf16 %v730_v45, %v730_v45  ;;  %v7354_v36 = vld [vmem:[#allocation5 + $0x290] sm:$0xf0] }
 0x196   :  { %5639 = vmatpush.bf16.msrb.mxu0 %v9641_v2  ;;  %5652 = vmatpush.bf16.msrb.mxu1 %v9769_v4  ;;  %v7149_v2 = vor.u32 %v10259_v50, %v7146_v51  ;;  %v7277_v4 = vor.u32 %v10291_v52, %v7274_v53  ;;  %v10319_v50 = vld [vmem:[#allocation5 + $0x2c4] sm:$0xf]  ;;  %v7386_v51 = vld [vmem:[#allocation5 + $0x2d0] sm:$0xf0] }
 0x197   :  { %v10351_v52 = vld [vmem:[#allocation5 + $0x3c4] sm:$0xf]  ;;  %v7514_v53 = vld [vmem:[#allocation5 + $0x3d0] sm:$0xf0] }
 0x198   :  { %5664 = vmatpush.bf16.msrb.mxu2 %v9913_v12  ;;  %5677 = vmatpush.bf16.msrb.mxu3 %v10041_v13  ;;  %v7258_v12 = vld [vmem:[#allocation5 + $0x1d0] sm:$0xf0]  ;;  %v690_v13 = vpop.f32.mrf.mxu1  ;;  %v7517_v7 = vor.u32 %v10351_v52, %v7514_v53  ;;  %v10307_v52 = vld [vmem:[#allocation5 + $0x264] sm:$0xf] }
 0x199   :  { %v11411_v30 = vpack.c.bf16 %v690_v13, %v690_v13  ;;  %v7261_v35 = vor.u32 %v10287_v8, %v7258_v12  ;;  %v10279_v8 = vld [vmem:[#allocation5 + $0x184] sm:$0xf]  ;;  %v7226_v12 = vld [vmem:[#allocation5 + $0x190] sm:$0xf0] }
 0x19a   :  { %5640 = vmatpush.bf16.msrb.mxu0 %v9625_v20  ;;  %5653 = vmatpush.bf16.msrb.mxu1 %v9753_v21  ;;  %v10323_v20 = vld [vmem:[#allocation5 + $0x2e4] sm:$0xf]  ;;  %v7402_v21 = vld [vmem:[#allocation5 + $0x2f0] sm:$0xf0]  ;;  %v7229_v19 = vor.u32 %v10279_v8, %v7226_v12 }
 0x19b   :  { %v7405_v46 = vor.u32 %v10323_v20, %v7402_v21  ;;  %v10315_v13 = vld [vmem:[#allocation5 + $0x2a4] sm:$0xf]  ;;  %v7082_v21 = vld [vmem:[#allocation5 + $0x70] sm:$0xf0] }
 0x19c   :  { %5665 = vmatpush.bf16.msrb.mxu2 %v9897_v27  ;;  %5678 = vmatpush.bf16.msrb.mxu3 %v10025_v28  ;;  %v7530_v27 = vld [vmem:[#allocation5 + $0x3f0] sm:$0xf0]  ;;  %v1525_v28 = vld [vmem:[#allocation7] sm:$0xf]  ;;  %v10243_v20 = vld [vmem:[#allocation5 + $0x64] sm:$0xf] }
 0x19d   :  { %v1527_v49 = vperm.slane %v1525_v28, 0  ;;  %v10275_v28 = vld [vmem:[#allocation5 + $0x164] sm:$0xf]  ;;  %v7338_v53 = vld [vmem:[#allocation5 + $0x270] sm:$0xf0] }
 0x19e   :  { %5641 = vmatpush.bf16.msrb.mxu0 %v9609_v42  ;;  %5654 = vmatpush.bf16.msrb.mxu1 %v9737_v43  ;;  %v10251_v42 = vld [vmem:[#allocation5 + $0xa4] sm:$0xf]  ;;  %v7114_v43 = vld [vmem:[#allocation5 + $0xb0] sm:$0xf0] }
 0x19f   :  { %v7117_v57 = vor.u32 %v10251_v42, %v7114_v43  ;;  %v7085_v42 = vor.u32 %v10243_v20, %v7082_v21  ;;  %v10267_v12 = vld [vmem:[#allocation5 + $0x124] sm:$0xf]  ;;  %v7053_v21 = vor.u32 %v10235_v61, %v7050_v62  ;;  %v7642_v62 = vld [vmem:[#allocation5 + $0x4d0] sm:$0xf0] }
 0x1a0   :  { %5666 = vmatpush.bf16.msrb.mxu2 %v9881_v47  ;;  %5679 = vmatpush.bf16.msrb.mxu3 %v10009_v48  ;;  %v7533_v47 = vor.u32 %v10355_v26, %v7530_v27  ;;  %v7242_v48 = vld [vmem:[#allocation5 + $0x1b0] sm:$0xf0]  ;;  %v10383_v61 = vld [vmem:[#allocation5 + $0x4c4] sm:$0xf] }
 0x1a1   :  { %v7245_v55 = vor.u32 %v10283_v44, %v7242_v48 }
 0x1a2   :  { %5642 = vmatpush.bf16.msrb.mxu0 %v9593_v58  ;;  %5655 = vmatpush.bf16.msrb.mxu1 %v9721_v60  ;;  %v5384_v58 = vpop.f32.mrf.mxu0  ;;  %v5397_v60 = vpop.f32.mrf.mxu1 }
 0x1a4   :  { %5667 = vmatpush.bf16.msrb.mxu2 %v9865_v14  ;;  %5680 = vmatpush.bf16.msrb.mxu3 %v9993_v15  ;;  %v7370_v14 = vld [vmem:[#allocation5 + $0x2b0] sm:$0xf0]  ;;  %v10347_v15 = vld [vmem:[#allocation5 + $0x3a4] sm:$0xf] }
 0x1a5   :  { %5643 = vmatmul.bf16.vlgmr.msrb.gmra.mxu0 %v11409_v25  ;;  %5656 = vmatmul.bf16.vlgmr.msrb.gmra.mxu1 %v11411_v30  ;;  %v7373_v26 = vor.u32 %v10315_v13, %v7370_v14  ;;  %v7501_v27 = vor.u32 %v10347_v15, %v7498_v16  ;;  %v7178_v13 = vld [vmem:[#allocation5 + $0x130] sm:$0xf0]  ;;  %v10303_v14 = vld [vmem:[#allocation5 + $0x244] sm:$0xf] }
 0x1a6   :  { %5687 = vmatpush.bf16.msra.mxu0 %v7149_v2  ;;  %5700 = vmatpush.bf16.msra.mxu1 %v7277_v4  ;;  %v5385_v2 = vadd.f32 %v5384_v58, %v1527_v49  ;;  %v7389_v4 = vor.u32 %v10319_v50, %v7386_v51  ;;  %v10271_v50 = vld [vmem:[#allocation5 + $0x144] sm:$0xf]  ;;  %v7194_v51 = vld [vmem:[#allocation5 + $0x150] sm:$0xf0] }
 0x1a7   :  { %v7322_v16 = vld [vmem:[#allocation5 + $0x250] sm:$0xf0] }
 0x1a8   :  { %5668 = vmatpush.bf16.msrb.mxu2 %v9849_v39  ;;  %5681 = vmatpush.bf16.msrb.mxu3 %v9977_v40  ;;  %v5398_v17 = vadd.f32 %v5397_v60, %v5385_v2  ;;  %v10343_v39 = vld [vmem:[#allocation5 + $0x384] sm:$0xf]  ;;  %v7482_v40 = vld [vmem:[#allocation5 + $0x390] sm:$0xf0]  ;;  %v7197_v60 = vor.u32 %v10271_v50, %v7194_v51 }
 0x1a9   :  { %v7485_v49 = vor.u32 %v10343_v39, %v7482_v40  ;;  %v7325_v39 = vor.u32 %v10303_v14, %v7322_v16  ;;  %v7434_v50 = vld [vmem:[#allocation5 + $0x330] sm:$0xf0]  ;;  %v10327_v14 = vld [vmem:[#allocation5 + $0x304] sm:$0xf] }
 0x1aa   :  { %5688 = vmatpush.bf16.msra.mxu0 %v7133_v33  ;;  %5701 = vmatpush.bf16.msra.mxu1 %v7261_v35  ;;  %v7210_v33 = vld [vmem:[#allocation5 + $0x170] sm:$0xf0]  ;;  %v10311_v35 = vld [vmem:[#allocation5 + $0x284] sm:$0xf]  ;;  %v5386_v44 = vpop.f32.mrf.mxu0  ;;  %v5399_v45 = vpop.f32.mrf.mxu1 }
 0x1ab   :  { %5669 = vmatmul.bf16.vlgmr.msrb.gmra.mxu2 %v11415_v54  ;;  %5682 = vmatmul.bf16.vlgmr.msrb.gmra.mxu3 %v11417_v56  ;;  %v7213_v43 = vor.u32 %v10275_v28, %v7210_v33  ;;  %v7357_v48 = vor.u32 %v10311_v35, %v7354_v36  ;;  %v7034_v28 = vld [vmem:[#allocation5 + $0x10] sm:$0xf0]  ;;  %v10263_v33 = vld [vmem:[#allocation5 + $0x104] sm:$0xf] }
 0x1ac   :  { %5713 = vmatpush.bf16.msra.mxu2 %v7405_v46  ;;  %5726 = vmatpush.bf16.msra.mxu3 %v7533_v47  ;;  %v10239_v46 = vld [vmem:[#allocation5 + $0x44] sm:$0xf]  ;;  %v7066_v47 = vld [vmem:[#allocation5 + $0x50] sm:$0xf0] }
 0x1ad   :  { %v7069_v58 = vor.u32 %v10239_v46, %v7066_v47  ;;  %v10419_v45 = vld [vmem:[#allocation5 + $0x5e4] sm:$0xf]  ;;  %v7786_v46 = vld [vmem:[#allocation5 + $0x5f0] sm:$0xf0] }
 0x1ae   :  { %5689 = vmatpush.bf16.msra.mxu0 %v7117_v57  ;;  %5702 = vmatpush.bf16.msra.mxu1 %v7245_v55  ;;  %v10339_v57 = vld [vmem:[#allocation5 + $0x364] sm:$0xf]  ;;  %v7466_v55 = vld [vmem:[#allocation5 + $0x370] sm:$0xf0]  ;;  %v5410_v2 = vpop.f32.mrf.mxu2 }
 0x1af   :  { %v7469_v8 = vor.u32 %v10339_v57, %v7466_v55  ;;  %v5411_v15 = vadd.f32 %v5410_v2, %v5398_v17  ;;  %v7658_v17 = vld [vmem:[#allocation5 + $0x4f0] sm:$0xf0]  ;;  %v10299_v47 = vld [vmem:[#allocation5 + $0x224] sm:$0xf] }
 0x1b0   :  { %5714 = vmatpush.bf16.msra.mxu2 %v7389_v4  ;;  %5727 = vmatpush.bf16.msra.mxu3 %v7517_v7  ;;  %v5423_v4 = vpop.f32.mrf.mxu3  ;;  %v7341_v7 = vor.u32 %v10307_v52, %v7338_v53  ;;  %v10415_v2 = vld [vmem:[#allocation5 + $0x5c4] sm:$0xf] }
 0x1b1   :  { %v5424_v20 = vadd.f32 %v5423_v4, %v5411_v15  ;;  %v7418_v15 = vld [vmem:[#allocation5 + $0x310] sm:$0xf0]  ;;  %v10451_v16 = vld [vmem:[#allocation5 + $0x6e4] sm:$0xf] }
 0x1b2   :  { %5690 = vmatpush.bf16.msra.mxu0 %v7101_v18  ;;  %5703 = vmatpush.bf16.msra.mxu1 %v7229_v19  ;;  %v10335_v18 = vld [vmem:[#allocation5 + $0x344] sm:$0xf]  ;;  %v7450_v19 = vld [vmem:[#allocation5 + $0x350] sm:$0xf0]  ;;  %v5436_v35 = vpop.f32.mrf.mxu0  ;;  %v5449_v36 = vpop.f32.mrf.mxu1 }
 0x1b3   :  { %v7453_v40 = vor.u32 %v10335_v18, %v7450_v19  ;;  %v5437_v44 = vadd.f32 %v5436_v35, %v5424_v20  ;;  %v7914_v18 = vld [vmem:[#allocation5 + $0x6f0] sm:$0xf0]  ;;  %v10483_v19 = vld [vmem:[#allocation5 + $0x7e4] sm:$0xf]  ;;  %v7421_v35 = vor.u32 %v10327_v14, %v7418_v15 }
 0x1b4   :  { %5715 = vmatpush.bf16.msra.mxu2 %v7373_v26  ;;  %5728 = vmatpush.bf16.msra.mxu3 %v7501_v27  ;;  %v7181_v26 = vor.u32 %v10267_v12, %v7178_v13  ;;  %v10231_v27 = vld [vmem:[#allocation5 + $0x4] sm:$0xf]  ;;  %v7290_v13 = vld [vmem:[#allocation5 + $0x210] sm:$0xf0] }
 0x1b5   :  { %v5450_v51 = vadd.f32 %v5449_v36, %v5437_v44  ;;  %v7037_v52 = vor.u32 %v10231_v27, %v7034_v28  ;;  %v10295_v12 = vld [vmem:[#allocation5 + $0x204] sm:$0xf]  ;;  %v8042_v20 = vld [vmem:[#allocation5 + $0x7f0] sm:$0xf0]  ;;  %v7645_v27 = vor.u32 %v10383_v61, %v7642_v62 }
 0x1b6   :  { %5691 = vmatpush.bf16.msra.mxu0 %v7085_v42  ;;  %5704 = vmatpush.bf16.msra.mxu1 %v7213_v43  ;;  %v7162_v42 = vld [vmem:[#allocation5 + $0x110] sm:$0xf0]  ;;  %v10387_v43 = vld [vmem:[#allocation5 + $0x4e4] sm:$0xf]  ;;  %v5412_v57 = vpop.f32.mrf.mxu2 }
 0x1b7   :  { %v7165_v53 = vor.u32 %v10263_v33, %v7162_v42  ;;  %v7293_v33 = vor.u32 %v10295_v12, %v7290_v13  ;;  %v10379_v36 = vld [vmem:[#allocation5 + $0x4a4] sm:$0xf]  ;;  %v8045_v42 = vor.u32 %v10483_v19, %v8042_v20  ;;  %v7738_v62 = vld [vmem:[#allocation5 + $0x590] sm:$0xf0] }
 0x1b8   :  { %5716 = vmatpush.bf16.msra.mxu2 %v7357_v48  ;;  %5729 = vmatpush.bf16.msra.mxu3 %v7485_v49  ;;  %v7306_v48 = vld [vmem:[#allocation5 + $0x230] sm:$0xf0]  ;;  %v10331_v49 = vld [vmem:[#allocation5 + $0x324] sm:$0xf]  ;;  %v5425_v55 = vpop.f32.mrf.mxu3 }
 0x1b9   :  { %v7309_v4 = vor.u32 %v10299_v47, %v7306_v48  ;;  %v10447_v44 = vld [vmem:[#allocation5 + $0x6c4] sm:$0xf]  ;;  %v8026_v47 = vld [vmem:[#allocation5 + $0x7d0] sm:$0xf0] }
 0x1ba   :  { %5692 = vmatpush.bf16.msra.mxu0 %v7069_v58  ;;  %5705 = vmatpush.bf16.msra.mxu1 %v7197_v60  ;;  %v7661_v58 = vor.u32 %v10387_v43, %v7658_v17  ;;  %v7789_v60 = vor.u32 %v10419_v45, %v7786_v46  ;;  %v10411_v43 = vld [vmem:[#allocation5 + $0x5a4] sm:$0xf]  ;;  %v7754_v17 = vld [vmem:[#allocation5 + $0x5b0] sm:$0xf0] }
 0x1bb   :  { %v7898_v45 = vld [vmem:[#allocation5 + $0x6d0] sm:$0xf0]  ;;  %v10479_v46 = vld [vmem:[#allocation5 + $0x7c4] sm:$0xf] }
 0x1bc   :  { %5717 = vmatpush.bf16.msra.mxu2 %v7341_v7  ;;  %5730 = vmatpush.bf16.msra.mxu3 %v7469_v8  ;;  %v7437_v7 = vor.u32 %v10331_v49, %v7434_v50  ;;  %v7770_v8 = vld [vmem:[#allocation5 + $0x5d0] sm:$0xf0]  ;;  %v10375_v57 = vld [vmem:[#allocation5 + $0x484] sm:$0xf] }
 0x1bd   :  { %v7773_v28 = vor.u32 %v10415_v2, %v7770_v8  ;;  %v7610_v55 = vld [vmem:[#allocation5 + $0x490] sm:$0xf0]  ;;  %v10407_v61 = vld [vmem:[#allocation5 + $0x584] sm:$0xf] }
 0x1be   :  { %5693 = vmatpush.bf16.msra.mxu0 %v7053_v21  ;;  %5706 = vmatpush.bf16.msra.mxu1 %v7181_v26  ;;  %v5438_v21 = vpop.f32.mrf.mxu0  ;;  %v5451_v26 = vpop.f32.mrf.mxu1  ;;  %v10443_v2 = vld [vmem:[#allocation5 + $0x6a4] sm:$0xf]  ;;  %v8010_v12 = vld [vmem:[#allocation5 + $0x7b0] sm:$0xf0]  ;;  %v7613_v15 = vor.u32 %v10375_v57, %v7610_v55 }
 0x1bf   :  { %v5462_v48 = vpop.f32.mrf.mxu2  ;;  %v10475_v8 = vld [vmem:[#allocation5 + $0x7a4] sm:$0xf]  ;;  %v7594_v19 = vld [vmem:[#allocation5 + $0x470] sm:$0xf0] }
 0x1c0   :  { %5718 = vmatpush.bf16.msra.mxu2 %v7325_v39  ;;  %5731 = vmatpush.bf16.msra.mxu3 %v7453_v40  ;;  %v7626_v39 = vld [vmem:[#allocation5 + $0x4b0] sm:$0xf0]  ;;  %v7917_v40 = vor.u32 %v10451_v16, %v7914_v18  ;;  %v5475_v49 = vpop.f32.mrf.mxu3  ;;  %v5463_v50 = vadd.f32 %v5462_v48, %v5450_v51  ;;  %v7741_v16 = vor.u32 %v10407_v61, %v7738_v62  ;;  %v10371_v18 = vld [vmem:[#allocation5 + $0x464] sm:$0xf] }
 0x1c1   :  { %v8013_v21 = vor.u32 %v10475_v8, %v8010_v12  ;;  %v10403_v26 = vld [vmem:[#allocation5 + $0x564] sm:$0xf]  ;;  %v7978_v57 = vld [vmem:[#allocation5 + $0x770] sm:$0xf0] }
 0x1c2   :  { %5694 = vmatpush.bf16.msra.mxu0 %v7037_v52  ;;  %5707 = vmatpush.bf16.msra.mxu1 %v7165_v53  ;;  %v7629_v52 = vor.u32 %v10379_v36, %v7626_v39  ;;  %v7757_v53 = vor.u32 %v10411_v43, %v7754_v17  ;;  %v10471_v36 = vld [vmem:[#allocation5 + $0x784] sm:$0xf]  ;;  %v7994_v39 = vld [vmem:[#allocation5 + $0x790] sm:$0xf0]  ;;  %v7597_v43 = vor.u32 %v10371_v18, %v7594_v19 }
 0x1c3   :  { %v10399_v48 = vld [vmem:[#allocation5 + $0x544] sm:$0xf]  ;;  %v7690_v12 = vld [vmem:[#allocation5 + $0x530] sm:$0xf0] }
 0x1c4   :  { %5719 = vmatpush.bf16.msra.mxu2 %v7309_v4  ;;  %5732 = vmatpush.bf16.msra.mxu3 %v7437_v7  ;;  %v5476_v4 = vadd.f32 %v5475_v49, %v5463_v50  ;;  %v7882_v7 = vld [vmem:[#allocation5 + $0x6b0] sm:$0xf0]  ;;  %v10435_v50 = vld [vmem:[#allocation5 + $0x664] sm:$0xf] }
 0x1c5   :  { %5695 = vmatmul.bf16.vlgmr.msra.gmra.mxu0 %v11349_v9  ;;  %5708 = vmatmul.bf16.vlgmr.msra.gmra.mxu1 %v11351_v10  ;;  %v7885_v20 = vor.u32 %v10443_v2, %v7882_v7  ;;  %v7706_v49 = vld [vmem:[#allocation5 + $0x550] sm:$0xf0]  ;;  %v10363_v62 = vld [vmem:[#allocation5 + $0x424] sm:$0xf] }
 0x1c6   :  { %5739 = vmatpush.bf16.msrb.mxu0 %v7661_v58  ;;  %5752 = vmatpush.bf16.msrb.mxu1 %v7789_v60  ;;  %v7901_v58 = vor.u32 %v10447_v44, %v7898_v45  ;;  %v8029_v60 = vor.u32 %v10479_v46, %v8026_v47  ;;  %v5488_v51 = vpop.f32.mrf.mxu0  ;;  %v5501_v13 = vpop.f32.mrf.mxu1  ;;  %v10367_v44 = vld [vmem:[#allocation5 + $0x444] sm:$0xf]  ;;  %v7578_v45 = vld [vmem:[#allocation5 + $0x450] sm:$0xf0]  ;;  %v7997_v47 = vor.u32 %v10471_v36, %v7994_v39 }
 0x1c7   :  { %v5489_v14 = vadd.f32 %v5488_v51, %v5476_v4  ;;  %v7709_v61 = vor.u32 %v10399_v48, %v7706_v49  ;;  %v7562_v2 = vld [vmem:[#allocation5 + $0x430] sm:$0xf0]  ;;  %v10395_v8 = vld [vmem:[#allocation5 + $0x524] sm:$0xf] }
 0x1c8   :  { %5720 = vmatpush.bf16.msra.mxu2 %v7293_v33  ;;  %5733 = vmatpush.bf16.msra.mxu3 %v7421_v35  ;;  %v7866_v35 = vld [vmem:[#allocation5 + $0x690] sm:$0xf0]  ;;  %v10431_v51 = vld [vmem:[#allocation5 + $0x644] sm:$0xf]  ;;  %v7565_v19 = vor.u32 %v10363_v62, %v7562_v2 }
 0x1c9   :  { %v5502_v33 = vadd.f32 %v5501_v13, %v5489_v14  ;;  %v7834_v13 = vld [vmem:[#allocation5 + $0x650] sm:$0xf0]  ;;  %v10463_v14 = vld [vmem:[#allocation5 + $0x744] sm:$0xf] }
 0x1ca   :  { %5740 = vmatpush.bf16.msrb.mxu0 %v7645_v27  ;;  %5753 = vmatpush.bf16.msrb.mxu1 %v7773_v28  ;;  %v7722_v27 = vld [vmem:[#allocation5 + $0x570] sm:$0xf0]  ;;  %v10439_v28 = vld [vmem:[#allocation5 + $0x684] sm:$0xf] }
 0x1cb   :  { %5721 = vmatmul.bf16.vlgmr.msra.gmra.mxu2 %v11355_v31  ;;  %5734 = vmatmul.bf16.vlgmr.msra.gmra.mxu3 %v11357_v32  ;;  %v7725_v17 = vor.u32 %v10403_v26, %v7722_v27  ;;  %v7869_v46 = vor.u32 %v10439_v28, %v7866_v35  ;;  %v7546_v26 = vld [vmem:[#allocation5 + $0x410] sm:$0xf0]  ;;  %v10391_v27 = vld [vmem:[#allocation5 + $0x504] sm:$0xf]  ;;  %v7837_v35 = vor.u32 %v10431_v51, %v7834_v13 }
 0x1cc   :  { %5765 = vmatpush.bf16.msrb.mxu2 %v7917_v40  ;;  %5778 = vmatpush.bf16.msrb.mxu3 %v8045_v42  ;;  %v5464_v40 = vpop.f32.mrf.mxu2  ;;  %v5477_v42 = vpop.f32.mrf.mxu3  ;;  %v7674_v39 = vld [vmem:[#allocation5 + $0x510] sm:$0xf0]  ;;  %v10423_v62 = vld [vmem:[#allocation5 + $0x604] sm:$0xf] }
 0x1cd   :  { %v10515_v40 = vld [vmem:[#allocation5 + $0x8e4] sm:$0xf]  ;;  %v8170_v42 = vld [vmem:[#allocation5 + $0x8f0] sm:$0xf0] }
 0x1ce   :  { %5741 = vmatpush.bf16.msrb.mxu0 %v7629_v52  ;;  %5754 = vmatpush.bf16.msrb.mxu1 %v7757_v53  ;;  %v7850_v52 = vld [vmem:[#allocation5 + $0x670] sm:$0xf0]  ;;  %v10467_v53 = vld [vmem:[#allocation5 + $0x764] sm:$0xf]  ;;  %v5490_v55 = vpop.f32.mrf.mxu0 }
 0x1cf   :  { %v7853_v4 = vor.u32 %v10435_v50, %v7850_v52  ;;  %v7981_v7 = vor.u32 %v10467_v53, %v7978_v57  ;;  %v7946_v48 = vld [vmem:[#allocation5 + $0x730] sm:$0xf0]  ;;  %v7677_v50 = vor.u32 %v10391_v27, %v7674_v39  ;;  %v10511_v53 = vld [vmem:[#allocation5 + $0x8c4] sm:$0xf] }
 0x1d0   :  { %5766 = vmatpush.bf16.msrb.mxu2 %v7901_v58  ;;  %5779 = vmatpush.bf16.msrb.mxu3 %v8029_v60  ;;  %v5503_v58 = vpop.f32.mrf.mxu1  ;;  %v7581_v60 = vor.u32 %v10367_v44, %v7578_v45  ;;  %v10427_v44 = vld [vmem:[#allocation5 + $0x624] sm:$0xf]  ;;  %v8154_v57 = vld [vmem:[#allocation5 + $0x8d0] sm:$0xf0] }
 0x1d1   :  { %v10543_v55 = vld [vmem:[#allocation5 + $0x9c4] sm:$0xf]  ;;  %v7802_v2 = vld [vmem:[#allocation5 + $0x610] sm:$0xf0] }
 0x1d2   :  { %5742 = vmatpush.bf16.msrb.mxu0 %v7613_v15  ;;  %5755 = vmatpush.bf16.msrb.mxu1 %v7741_v16  ;;  %v7962_v15 = vld [vmem:[#allocation5 + $0x750] sm:$0xf0]  ;;  %v10575_v39 = vld [vmem:[#allocation5 + $0xac4] sm:$0xf] }
 0x1d3   :  { %v7965_v36 = vor.u32 %v10463_v14, %v7962_v15  ;;  %v8426_v13 = vld [vmem:[#allocation5 + $0xaf0] sm:$0xf0]  ;;  %v10611_v14 = vld [vmem:[#allocation5 + $0xbe4] sm:$0xf] }
 0x1d4   :  { %5767 = vmatpush.bf16.msrb.mxu2 %v7885_v20  ;;  %5780 = vmatpush.bf16.msrb.mxu3 %v8013_v21  ;;  %v5514_v16 = vpop.f32.mrf.mxu2  ;;  %v5527_v18 = vpop.f32.mrf.mxu3  ;;  %v7693_v20 = vor.u32 %v10395_v8, %v7690_v12  ;;  %v10359_v21 = vld [vmem:[#allocation5 + $0x404] sm:$0xf]  ;;  %v8554_v15 = vld [vmem:[#allocation5 + $0xbf0] sm:$0xf0] }
 0x1d5   :  { %v5515_v28 = vadd.f32 %v5514_v16, %v5502_v33  ;;  %v7549_v49 = vor.u32 %v10359_v21, %v7546_v26  ;;  %v8173_v33 = vor.u32 %v10515_v40, %v8170_v42  ;;  %v10579_v8 = vld [vmem:[#allocation5 + $0xae4] sm:$0xf]  ;;  %v8157_v16 = vor.u32 %v10511_v53, %v8154_v57  ;;  %v8138_v26 = vld [vmem:[#allocation5 + $0x8b0] sm:$0xf0] }
 0x1d6   :  { %5743 = vmatpush.bf16.msrb.mxu0 %v7597_v43  ;;  %5756 = vmatpush.bf16.msrb.mxu1 %v7725_v17  ;;  %v10547_v43 = vld [vmem:[#allocation5 + $0x9e4] sm:$0xf]  ;;  %v8298_v17 = vld [vmem:[#allocation5 + $0x9f0] sm:$0xf0]  ;;  %v8429_v27 = vor.u32 %v10579_v8, %v8426_v13 }
 0x1d7   :  { %v11425_v45 = vadd.f32 %v5527_v18, %v5515_v28  ;;  %v8301_v52 = vor.u32 %v10547_v43, %v8298_v17  ;;  %v10507_v21 = vld [vmem:[#allocation5 + $0x8a4] sm:$0xf]  ;;  %v8557_v28 = vor.u32 %v10611_v14, %v8554_v15  ;;  %v8410_v40 = vld [vmem:[#allocation5 + $0xad0] sm:$0xf0] }
 0x1d8   :  { %5768 = vmatpush.bf16.msrb.mxu2 %v7869_v46  ;;  %5781 = vmatpush.bf16.msrb.mxu3 %v7997_v47  ;;  %v7818_v46 = vld [vmem:[#allocation5 + $0x630] sm:$0xf0]  ;;  %v10459_v47 = vld [vmem:[#allocation5 + $0x724] sm:$0xf]  ;;  %v8141_v17 = vor.u32 %v10507_v21, %v8138_v26 }
 0x1d9   :  { %v7821_v58 = vor.u32 %v10427_v44, %v7818_v46  ;;  %v10607_v42 = vld [vmem:[#allocation5 + $0xbc4] sm:$0xf]  ;;  %v8538_v43 = vld [vmem:[#allocation5 + $0xbd0] sm:$0xf0] }
 0x1da   :  { %5744 = vmatpush.bf16.msrb.mxu0 %v7581_v60  ;;  %5757 = vmatpush.bf16.msrb.mxu1 %v7709_v61  ;;  %v7949_v60 = vor.u32 %v10459_v47, %v7946_v48  ;;  %v8282_v61 = vld [vmem:[#allocation5 + $0x9d0] sm:$0xf0]  ;;  %v10503_v46 = vld [vmem:[#allocation5 + $0x884] sm:$0xf]  ;;  %v8413_v48 = vor.u32 %v10575_v39, %v8410_v40 }
 0x1db   :  { %v8285_v18 = vor.u32 %v10543_v55, %v8282_v61  ;;  %v8122_v47 = vld [vmem:[#allocation5 + $0x890] sm:$0xf0]  ;;  %v10531_v13 = vld [vmem:[#allocation5 + $0x964] sm:$0xf] }
 0x1dc   :  { %5769 = vmatpush.bf16.msrb.mxu2 %v7853_v4  ;;  %5782 = vmatpush.bf16.msrb.mxu3 %v7981_v7  ;;  %v10455_v4 = vld [vmem:[#allocation5 + $0x704] sm:$0xf]  ;;  %v7930_v7 = vld [vmem:[#allocation5 + $0x710] sm:$0xf0]  ;;  %v5516_v12 = vpop.f32.mrf.mxu2  ;;  %v5529_v51 = vpop.f32.mrf.mxu3 }
 0x1dd   :  { %v8394_v55 = vld [vmem:[#allocation5 + $0xab0] sm:$0xf0]  ;;  %v10567_v15 = vld [vmem:[#allocation5 + $0xa84] sm:$0xf] }
 0x1de   :  { %5745 = vmatpush.bf16.msrb.mxu0 %v7565_v19  ;;  %5758 = vmatpush.bf16.msrb.mxu1 %v7693_v20  ;;  %v7805_v19 = vor.u32 %v10423_v62, %v7802_v2  ;;  %v7933_v20 = vor.u32 %v10455_v4, %v7930_v7  ;;  %v8125_v62 = vor.u32 %v10503_v46, %v8122_v47  ;;  %v10499_v4 = vld [vmem:[#allocation5 + $0x864] sm:$0xf]  ;;  %v8106_v7 = vld [vmem:[#allocation5 + $0x870] sm:$0xf0] }
 0x1df   :  { %v8234_v14 = vld [vmem:[#allocation5 + $0x970] sm:$0xf0]  ;;  %v10495_v21 = vld [vmem:[#allocation5 + $0x844] sm:$0xf] }
 0x1e0   :  { %5770 = vmatpush.bf16.msrb.mxu2 %v7837_v35  ;;  %5783 = vmatpush.bf16.msrb.mxu3 %v7965_v36  ;;  %v10539_v35 = vld [vmem:[#allocation5 + $0x9a4] sm:$0xf]  ;;  %v8266_v36 = vld [vmem:[#allocation5 + $0x9b0] sm:$0xf0] }
 0x1e1   :  { %v8269_v44 = vor.u32 %v10539_v35, %v8266_v36  ;;  %v8090_v26 = vld [vmem:[#allocation5 + $0x850] sm:$0xf0]  ;;  %v10527_v35 = vld [vmem:[#allocation5 + $0x944] sm:$0xf] }
 0x1e2   :  { %5746 = vmatpush.bf16.msrb.mxu0 %v7549_v49  ;;  %5759 = vmatpush.bf16.msrb.mxu1 %v7677_v50  ;;  %v8541_v49 = vor.u32 %v10607_v42, %v8538_v43  ;;  %v10535_v50 = vld [vmem:[#allocation5 + $0x984] sm:$0xf]  ;;  %v5540_v53 = vpop.f32.mrf.mxu0  ;;  %v5553_v57 = vpop.f32.mrf.mxu1  ;;  %v8218_v36 = vld [vmem:[#allocation5 + $0x950] sm:$0xf0]  ;;  %v8093_v46 = vor.u32 %v10495_v21, %v8090_v26 }
 0x1e3   :  { %v5541_v61 = vadd.f32 %v5540_v53, %v11425_v45  ;;  %v8109_v45 = vor.u32 %v10499_v4, %v8106_v7  ;;  %v10563_v39 = vld [vmem:[#allocation5 + $0xa64] sm:$0xf]  ;;  %v8362_v43 = vld [vmem:[#allocation5 + $0xa70] sm:$0xf0]  ;;  %v8221_v47 = vor.u32 %v10527_v35, %v8218_v36 }
 0x1e4   :  { %5771 = vmatpush.bf16.msrb.mxu2 %v7821_v58  ;;  %5784 = vmatpush.bf16.msrb.mxu3 %v7949_v60  ;;  %v10603_v58 = vld [vmem:[#allocation5 + $0xba4] sm:$0xf]  ;;  %v8522_v60 = vld [vmem:[#allocation5 + $0xbb0] sm:$0xf0] }
 0x1e5   :  { %5747 = vmatmul.bf16.vlgmr.msrb.gmra.mxu0 %v11361_v63  ;;  %5760 = vmatmul.bf16.vlgmr.msrb.gmra.mxu1 %v11363_v0  ;;  %v5554_v8 = vadd.f32 %v5553_v57, %v5541_v61  ;;  %v8525_v51 = vor.u32 %v10603_v58, %v8522_v60  ;;  %v8202_v53 = vld [vmem:[#allocation5 + $0x930] sm:$0xf0]  ;;  %v10559_v57 = vld [vmem:[#allocation5 + $0xa44] sm:$0xf] }
 0x1e6   :  { %5791 = vmatpush.bf16.msra.mxu0 %v8173_v33  ;;  %5804 = vmatpush.bf16.msra.mxu1 %v8301_v52  ;;  %v8250_v33 = vld [vmem:[#allocation5 + $0x990] sm:$0xf0]  ;;  %v10571_v52 = vld [vmem:[#allocation5 + $0xaa4] sm:$0xf] }
 0x1e7   :  { %v8253_v2 = vor.u32 %v10535_v50, %v8250_v33  ;;  %v8397_v12 = vor.u32 %v10571_v52, %v8394_v55  ;;  %v8365_v50 = vor.u32 %v10563_v39, %v8362_v43  ;;  %v10523_v52 = vld [vmem:[#allocation5 + $0x924] sm:$0xf]  ;;  %v8346_v60 = vld [vmem:[#allocation5 + $0xa50] sm:$0xf0] }
 0x1e8   :  { %5772 = vmatpush.bf16.msrb.mxu2 %v7805_v19  ;;  %5785 = vmatpush.bf16.msrb.mxu3 %v7933_v20  ;;  %v8506_v19 = vld [vmem:[#allocation5 + $0xb90] sm:$0xf0]  ;;  %v8237_v20 = vor.u32 %v10531_v13, %v8234_v14  ;;  %v10591_v61 = vld [vmem:[#allocation5 + $0xb44] sm:$0xf]  ;;  %v8205_v7 = vor.u32 %v10523_v52, %v8202_v53 }
 0x1e9   :  { %v10519_v13 = vld [vmem:[#allocation5 + $0x904] sm:$0xf]  ;;  %v8810_v21 = vld [vmem:[#allocation5 + $0xdf0] sm:$0xf0] }
 0x1ea   :  { %5792 = vmatpush.bf16.msra.mxu0 %v8157_v16  ;;  %5805 = vmatpush.bf16.msra.mxu1 %v8285_v18  ;;  %v8378_v16 = vld [vmem:[#allocation5 + $0xa90] sm:$0xf0]  ;;  %v10599_v18 = vld [vmem:[#allocation5 + $0xb84] sm:$0xf]  ;;  %v5542_v40 = vpop.f32.mrf.mxu0  ;;  %v5555_v42 = vpop.f32.mrf.mxu1 }
 0x1eb   :  { %5773 = vmatmul.bf16.vlgmr.msrb.gmra.mxu2 %v11367_v23  ;;  %5786 = vmatmul.bf16.vlgmr.msrb.gmra.mxu3 %v11369_v24  ;;  %v10555_v26 = vld [vmem:[#allocation5 + $0xa24] sm:$0xf]  ;;  %v8666_v43 = vld [vmem:[#allocation5 + $0xcd0] sm:$0xf0] }
 0x1ec   :  { %5817 = vmatpush.bf16.msra.mxu2 %v8429_v27  ;;  %5830 = vmatpush.bf16.msra.mxu3 %v8557_v28  ;;  %v8381_v27 = vor.u32 %v10567_v15, %v8378_v16  ;;  %v8509_v28 = vor.u32 %v10599_v18, %v8506_v19  ;;  %v8349_v15 = vor.u32 %v10559_v57, %v8346_v60  ;;  %v8186_v18 = vld [vmem:[#allocation5 + $0x910] sm:$0xf0]  ;;  %v10643_v19 = vld [vmem:[#allocation5 + $0xce4] sm:$0xf] }
 0x1ed   :  { %v8189_v36 = vor.u32 %v10519_v13, %v8186_v18  ;;  %v10639_v42 = vld [vmem:[#allocation5 + $0xcc4] sm:$0xf]  ;;  %v8442_v53 = vld [vmem:[#allocation5 + $0xb10] sm:$0xf0] }
 0x1ee   :  { %5793 = vmatpush.bf16.msra.mxu0 %v8141_v17  ;;  %5806 = vmatpush.bf16.msra.mxu1 %v8269_v44  ;;  %v10595_v17 = vld [vmem:[#allocation5 + $0xb64] sm:$0xf]  ;;  %v8490_v44 = vld [vmem:[#allocation5 + $0xb70] sm:$0xf0]  ;;  %v5566_v55 = vpop.f32.mrf.mxu2  ;;  %v5579_v58 = vpop.f32.mrf.mxu3 }
 0x1ef   :  { %v8493_v33 = vor.u32 %v10595_v17, %v8490_v44  ;;  %v10671_v17 = vld [vmem:[#allocation5 + $0xdc4] sm:$0xf]  ;;  %v9066_v60 = vld [vmem:[#allocation5 + $0xff0] sm:$0xf0] }
 0x1f0   :  { %5818 = vmatpush.bf16.msra.mxu2 %v8413_v48  ;;  %5831 = vmatpush.bf16.msra.mxu3 %v8541_v49  ;;  %v10491_v48 = vld [vmem:[#allocation5 + $0x824] sm:$0xf]  ;;  %v8074_v49 = vld [vmem:[#allocation5 + $0x830] sm:$0xf0] }
 0x1f1   :  { %v8077_v4 = vor.u32 %v10491_v48, %v8074_v49  ;;  %v8794_v49 = vld [vmem:[#allocation5 + $0xdd0] sm:$0xf0]  ;;  %v10583_v52 = vld [vmem:[#allocation5 + $0xb04] sm:$0xf] }
 0x1f2   :  { %5794 = vmatpush.bf16.msra.mxu0 %v8125_v62  ;;  %5807 = vmatpush.bf16.msra.mxu1 %v8253_v2  ;;  %v8474_v62 = vld [vmem:[#allocation5 + $0xb50] sm:$0xf0]  ;;  %v5567_v2 = vadd.f32 %v5566_v55, %v5554_v8  ;;  %v10707_v57 = vld [vmem:[#allocation5 + $0xee4] sm:$0xf] }
 0x1f3   :  { %v8477_v16 = vor.u32 %v10591_v61, %v8474_v62  ;;  %v8330_v8 = vld [vmem:[#allocation5 + $0xa30] sm:$0xf0]  ;;  %v8669_v61 = vor.u32 %v10639_v42, %v8666_v43  ;;  %v8797_v62 = vor.u32 %v10671_v17, %v8794_v49  ;;  %v10703_v18 = vld [vmem:[#allocation5 + $0xec4] sm:$0xf] }
 0x1f4   :  { %5819 = vmatpush.bf16.msra.mxu2 %v8397_v12  ;;  %5832 = vmatpush.bf16.msra.mxu3 %v8525_v51  ;;  %v10487_v12 = vld [vmem:[#allocation5 + $0x804] sm:$0xf]  ;;  %v8058_v51 = vld [vmem:[#allocation5 + $0x810] sm:$0xf0]  ;;  %v11432_v14 = vadd.f32 %v5579_v58, %v5567_v2  ;;  %v8333_v44 = vor.u32 %v10555_v26, %v8330_v8 }
 0x1f5   :  { %v8061_v35 = vor.u32 %v10487_v12, %v8058_v51  ;;  %v8938_v55 = vld [vmem:[#allocation5 + $0xef0] sm:$0xf0]  ;;  %v10739_v58 = vld [vmem:[#allocation5 + $0xfe4] sm:$0xf] }
 0x1f6   :  { %5795 = vmatpush.bf16.msra.mxu0 %v8109_v45  ;;  %5808 = vmatpush.bf16.msra.mxu1 %v8237_v20  ;;  %v8682_v45 = vld [vmem:[#allocation5 + $0xcf0] sm:$0xf0]  ;;  %v10675_v20 = vld [vmem:[#allocation5 + $0xde4] sm:$0xf]  ;;  %v5581_v48 = vpop.f32.mrf.mxu3  ;;  %v8941_v51 = vor.u32 %v10707_v57, %v8938_v55  ;;  %v9069_v13 = vor.u32 %v10739_v58, %v9066_v60 }
 0x1f7   :  { %v8685_v39 = vor.u32 %v10643_v19, %v8682_v45  ;;  %v8813_v40 = vor.u32 %v10675_v20, %v8810_v21  ;;  %v8650_v12 = vld [vmem:[#allocation5 + $0xcb0] sm:$0xf0]  ;;  %v10735_v45 = vld [vmem:[#allocation5 + $0xfc4] sm:$0xf] }
 0x1f8   :  { %5820 = vmatpush.bf16.msra.mxu2 %v8381_v27  ;;  %5833 = vmatpush.bf16.msra.mxu3 %v8509_v28  ;;  %v10587_v27 = vld [vmem:[#allocation5 + $0xb24] sm:$0xf]  ;;  %v8458_v28 = vld [vmem:[#allocation5 + $0xb30] sm:$0xf0] }
 0x1f9   :  { %v8922_v19 = vld [vmem:[#allocation5 + $0xed0] sm:$0xf0]  ;;  %v10631_v8 = vld [vmem:[#allocation5 + $0xc84] sm:$0xf] }
 0x1fa   :  { %5796 = vmatpush.bf16.msra.mxu0 %v8093_v46  ;;  %5809 = vmatpush.bf16.msra.mxu1 %v8221_v47  ;;  %v8461_v46 = vor.u32 %v10587_v27, %v8458_v28  ;;  %v5568_v47 = vpop.f32.mrf.mxu2  ;;  %v9050_v20 = vld [vmem:[#allocation5 + $0xfd0] sm:$0xf0]  ;;  %v8925_v28 = vor.u32 %v10703_v18, %v8922_v19  ;;  %v10659_v55 = vld [vmem:[#allocation5 + $0xd64] sm:$0xf] }
 0x1fb   :  { %v8634_v27 = vld [vmem:[#allocation5 + $0xc90] sm:$0xf0]  ;;  %v10695_v60 = vld [vmem:[#allocation5 + $0xe84] sm:$0xf] }
 0x1fc   :  { %5821 = vmatpush.bf16.msra.mxu2 %v8365_v50  ;;  %5834 = vmatpush.bf16.msra.mxu3 %v8493_v33  ;;  %v10551_v50 = vld [vmem:[#allocation5 + $0xa04] sm:$0xf]  ;;  %v8314_v33 = vld [vmem:[#allocation5 + $0xa10] sm:$0xf0]  ;;  %v8637_v48 = vor.u32 %v10631_v8, %v8634_v27 }
 0x1fd   :  { %v8317_v2 = vor.u32 %v10551_v50, %v8314_v33  ;;  %v8906_v17 = vld [vmem:[#allocation5 + $0xeb0] sm:$0xf0]  ;;  %v10627_v50 = vld [vmem:[#allocation5 + $0xc64] sm:$0xf] }
 0x1fe   :  { %5797 = vmatpush.bf16.msra.mxu0 %v8077_v4  ;;  %5810 = vmatpush.bf16.msra.mxu1 %v8205_v7  ;;  %v8445_v4 = vor.u32 %v10583_v52, %v8442_v53  ;;  %v10635_v7 = vld [vmem:[#allocation5 + $0xca4] sm:$0xf]  ;;  %v8618_v33 = vld [vmem:[#allocation5 + $0xc70] sm:$0xf0] }
 0x1ff   :  { %v8653_v21 = vor.u32 %v10635_v7, %v8650_v12  ;;  %v8746_v58 = vld [vmem:[#allocation5 + $0xd70] sm:$0xf0]  ;;  %v10623_v7 = vld [vmem:[#allocation5 + $0xc44] sm:$0xf] }
 0x200   :  { %5822 = vmatpush.bf16.msra.mxu2 %v8349_v15  ;;  %5835 = vmatpush.bf16.msra.mxu3 %v8477_v16  ;;  %v10667_v15 = vld [vmem:[#allocation5 + $0xda4] sm:$0xf]  ;;  %v8778_v16 = vld [vmem:[#allocation5 + $0xdb0] sm:$0xf0] }
 0x201   :  { %v8781_v26 = vor.u32 %v10667_v15, %v8778_v16  ;;  %v8602_v12 = vld [vmem:[#allocation5 + $0xc50] sm:$0xf0]  ;;  %v10655_v15 = vld [vmem:[#allocation5 + $0xd44] sm:$0xf] }
 0x202   :  { %5798 = vmatpush.bf16.msra.mxu0 %v8061_v35  ;;  %5811 = vmatpush.bf16.msra.mxu1 %v8189_v36  ;;  %v9053_v35 = vor.u32 %v10735_v45, %v9050_v20  ;;  %v10663_v36 = vld [vmem:[#allocation5 + $0xd84] sm:$0xf]  ;;  %v5592_v42 = vpop.f32.mrf.mxu0  ;;  %v5605_v43 = vpop.f32.mrf.mxu1  ;;  %v8730_v16 = vld [vmem:[#allocation5 + $0xd50] sm:$0xf0]  ;;  %v8605_v8 = vor.u32 %v10623_v7, %v8602_v12 }
 0x203   :  { %v5593_v47 = vadd.f32 %v5592_v42, %v11432_v14  ;;  %v8621_v14 = vor.u32 %v10627_v50, %v8618_v33  ;;  %v10691_v18 = vld [vmem:[#allocation5 + $0xe64] sm:$0xf]  ;;  %v8874_v20 = vld [vmem:[#allocation5 + $0xe70] sm:$0xf0]  ;;  %v8733_v27 = vor.u32 %v10655_v15, %v8730_v16 }
 0x204   :  { %5823 = vmatpush.bf16.msra.mxu2 %v8333_v44  ;;  %5836 = vmatpush.bf16.msra.mxu3 %v8461_v46  ;;  %v10731_v44 = vld [vmem:[#allocation5 + $0xfa4] sm:$0xf]  ;;  %v9034_v46 = vld [vmem:[#allocation5 + $0xfb0] sm:$0xf0] }
 0x205   :  { %5799 = vmatmul.bf16.vlgmr.msra.gmra.mxu0 %v11373_v5  ;;  %5812 = vmatmul.bf16.vlgmr.msra.gmra.mxu1 %v11375_v6  ;;  %v5606_v52 = vadd.f32 %v5605_v43, %v5593_v47  ;;  %v9037_v57 = vor.u32 %v10731_v44, %v9034_v46  ;;  %v8714_v42 = vld [vmem:[#allocation5 + $0xd30] sm:$0xf0]  ;;  %v10687_v43 = vld [vmem:[#allocation5 + $0xe44] sm:$0xf] }
 0x206   :  { %5843 = vmatpush.bf16.msrb.mxu0 %v8685_v39  ;;  %5856 = vmatpush.bf16.msrb.mxu1 %v8813_v40  ;;  %v8762_v39 = vld [vmem:[#allocation5 + $0xd90] sm:$0xf0]  ;;  %v10699_v40 = vld [vmem:[#allocation5 + $0xea4] sm:$0xf] }
 0x207   :  { %v8765_v49 = vor.u32 %v10663_v36, %v8762_v39  ;;  %v8909_v53 = vor.u32 %v10699_v40, %v8906_v17  ;;  %v8877_v36 = vor.u32 %v10691_v18, %v8874_v20  ;;  %v10651_v40 = vld [vmem:[#allocation5 + $0xd24] sm:$0xf]  ;;  %v8858_v46 = vld [vmem:[#allocation5 + $0xe50] sm:$0xf0] }
 0x208   :  { %5824 = vmatpush.bf16.msra.mxu2 %v8317_v2  ;;  %5837 = vmatpush.bf16.msra.mxu3 %v8445_v4  ;;  %v9018_v2 = vld [vmem:[#allocation5 + $0xf90] sm:$0xf0]  ;;  %v8749_v4 = vor.u32 %v10659_v55, %v8746_v58  ;;  %v10719_v47 = vld [vmem:[#allocation5 + $0xf44] sm:$0xf]  ;;  %v8717_v33 = vor.u32 %v10651_v40, %v8714_v42 }
 0x209   :  { %v10647_v55 = vld [vmem:[#allocation5 + $0xd04] sm:$0xf]  ;;  %v9322_v7 = vld [vmem:[#allocation5 + $0x11f0] sm:$0xf0] }
 0x20a   :  { %5844 = vmatpush.bf16.msrb.mxu0 %v8669_v61  ;;  %5857 = vmatpush.bf16.msrb.mxu1 %v8797_v62  ;;  %v8890_v61 = vld [vmem:[#allocation5 + $0xe90] sm:$0xf0]  ;;  %v10727_v62 = vld [vmem:[#allocation5 + $0xf84] sm:$0xf]  ;;  %v5594_v19 = vpop.f32.mrf.mxu0  ;;  %v5607_v45 = vpop.f32.mrf.mxu1 }
 0x20b   :  { %5825 = vmatmul.bf16.vlgmr.msra.gmra.mxu2 %v11379_v37  ;;  %5838 = vmatmul.bf16.vlgmr.msra.gmra.mxu3 %v11381_v38  ;;  %v10683_v12 = vld [vmem:[#allocation5 + $0xe24] sm:$0xf]  ;;  %v9178_v20 = vld [vmem:[#allocation5 + $0x10d0] sm:$0xf0] }
 0x20c   :  { %5869 = vmatpush.bf16.msrb.mxu2 %v8941_v51  ;;  %5882 = vmatpush.bf16.msrb.mxu3 %v9069_v13  ;;  %v8893_v51 = vor.u32 %v10695_v60, %v8890_v61  ;;  %v9021_v13 = vor.u32 %v10727_v62, %v9018_v2  ;;  %v8861_v60 = vor.u32 %v10687_v43, %v8858_v46  ;;  %v8698_v62 = vld [vmem:[#allocation5 + $0xd10] sm:$0xf0]  ;;  %v10771_v2 = vld [vmem:[#allocation5 + $0x10e4] sm:$0xf] }
 0x20d   :  { %v8701_v16 = vor.u32 %v10647_v55, %v8698_v62  ;;  %v10767_v45 = vld [vmem:[#allocation5 + $0x10c4] sm:$0xf]  ;;  %v8954_v42 = vld [vmem:[#allocation5 + $0xf10] sm:$0xf0] }
 0x20e   :  { %5845 = vmatpush.bf16.msrb.mxu0 %v8653_v21  ;;  %5858 = vmatpush.bf16.msrb.mxu1 %v8781_v26  ;;  %v10723_v21 = vld [vmem:[#allocation5 + $0xf64] sm:$0xf]  ;;  %v9002_v26 = vld [vmem:[#allocation5 + $0xf70] sm:$0xf0]  ;;  %v5618_v17 = vpop.f32.mrf.mxu2  ;;  %v5631_v44 = vpop.f32.mrf.mxu3 }
 0x20f   :  { %v9005_v39 = vor.u32 %v10723_v21, %v9002_v26  ;;  %v10799_v21 = vld [vmem:[#allocation5 + $0x11c4] sm:$0xf]  ;;  %v9578_v46 = vld [vmem:[#allocation5 + $0x13f0] sm:$0xf0] }
 0x210   :  { %5870 = vmatpush.bf16.msrb.mxu2 %v8925_v28  ;;  %5883 = vmatpush.bf16.msrb.mxu3 %v9053_v35  ;;  %v10619_v28 = vld [vmem:[#allocation5 + $0xc24] sm:$0xf]  ;;  %v8586_v35 = vld [vmem:[#allocation5 + $0xc30] sm:$0xf0] }
 0x211   :  { %v8589_v50 = vor.u32 %v10619_v28, %v8586_v35  ;;  %v9306_v35 = vld [vmem:[#allocation5 + $0x11d0] sm:$0xf0]  ;;  %v10711_v40 = vld [vmem:[#allocation5 + $0xf04] sm:$0xf] }
 0x212   :  { %5846 = vmatpush.bf16.msrb.mxu0 %v8637_v48  ;;  %5859 = vmatpush.bf16.msrb.mxu1 %v8765_v49  ;;  %v8986_v48 = vld [vmem:[#allocation5 + $0xf50] sm:$0xf0]  ;;  %v5619_v49 = vadd.f32 %v5618_v17, %v5606_v52  ;;  %v10835_v43 = vld [vmem:[#allocation5 + $0x12e4] sm:$0xf] }
 0x213   :  { %v8989_v61 = vor.u32 %v10719_v47, %v8986_v48  ;;  %v8842_v52 = vld [vmem:[#allocation5 + $0xe30] sm:$0xf0]  ;;  %v9181_v47 = vor.u32 %v10767_v45, %v9178_v20  ;;  %v9309_v48 = vor.u32 %v10799_v21, %v9306_v35  ;;  %v10831_v62 = vld [vmem:[#allocation5 + $0x12c4] sm:$0xf] }
 0x214   :  { %5871 = vmatpush.bf16.msrb.mxu2 %v8909_v53  ;;  %5884 = vmatpush.bf16.msrb.mxu3 %v9037_v57  ;;  %v10615_v53 = vld [vmem:[#allocation5 + $0xc04] sm:$0xf]  ;;  %v8570_v57 = vld [vmem:[#allocation5 + $0xc10] sm:$0xf0]  ;;  %v11439_v58 = vadd.f32 %v5631_v44, %v5619_v49  ;;  %v8845_v26 = vor.u32 %v10683_v12, %v8842_v52 }
 0x215   :  { %v8573_v15 = vor.u32 %v10615_v53, %v8570_v57  ;;  %v9450_v17 = vld [vmem:[#allocation5 + $0x12f0] sm:$0xf0]  ;;  %v10867_v44 = vld [vmem:[#allocation5 + $0x13e4] sm:$0xf] }
 0x216   :  { %5847 = vmatpush.bf16.msrb.mxu0 %v8621_v14  ;;  %5860 = vmatpush.bf16.msrb.mxu1 %v8749_v4  ;;  %v9194_v14 = vld [vmem:[#allocation5 + $0x10f0] sm:$0xf0]  ;;  %v10803_v4 = vld [vmem:[#allocation5 + $0x11e4] sm:$0xf]  ;;  %v5633_v28 = vpop.f32.mrf.mxu3  ;;  %v9453_v57 = vor.u32 %v10835_v43, %v9450_v17  ;;  %v9581_v55 = vor.u32 %v10867_v44, %v9578_v46 }
 0x217   :  { %v9197_v18 = vor.u32 %v10771_v2, %v9194_v14  ;;  %v9325_v19 = vor.u32 %v10803_v4, %v9322_v7  ;;  %v9162_v53 = vld [vmem:[#allocation5 + $0x10b0] sm:$0xf0]  ;;  %v10863_v14 = vld [vmem:[#allocation5 + $0x13c4] sm:$0xf] }
 0x218   :  { %5872 = vmatpush.bf16.msrb.mxu2 %v8893_v51  ;;  %5885 = vmatpush.bf16.msrb.mxu3 %v9021_v13  ;;  %v10715_v51 = vld [vmem:[#allocation5 + $0xf24] sm:$0xf]  ;;  %v8970_v13 = vld [vmem:[#allocation5 + $0xf30] sm:$0xf0] }
 0x219   :  { %v9434_v2 = vld [vmem:[#allocation5 + $0x12d0] sm:$0xf0]  ;;  %v10759_v52 = vld [vmem:[#allocation5 + $0x1084] sm:$0xf] }
 0x21a   :  { %5848 = vmatpush.bf16.msrb.mxu0 %v8605_v8  ;;  %5861 = vmatpush.bf16.msrb.mxu1 %v8733_v27  ;;  %v8973_v8 = vor.u32 %v10715_v51, %v8970_v13  ;;  %v5620_v27 = vpop.f32.mrf.mxu2  ;;  %v9562_v4 = vld [vmem:[#allocation5 + $0x13d0] sm:$0xf0]  ;;  %v9437_v13 = vor.u32 %v10831_v62, %v9434_v2  ;;  %v10787_v17 = vld [vmem:[#allocation5 + $0x1164] sm:$0xf] }
 0x21b   :  { %v9146_v51 = vld [vmem:[#allocation5 + $0x1090] sm:$0xf0]  ;;  %v10823_v46 = vld [vmem:[#allocation5 + $0x1284] sm:$0xf] }
 0x21c   :  { %5873 = vmatpush.bf16.msrb.mxu2 %v8877_v36  ;;  %5886 = vmatpush.bf16.msrb.mxu3 %v9005_v39  ;;  %v10679_v36 = vld [vmem:[#allocation5 + $0xe04] sm:$0xf]  ;;  %v8826_v39 = vld [vmem:[#allocation5 + $0xe10] sm:$0xf0]  ;;  %v9149_v28 = vor.u32 %v10759_v52, %v9146_v51 }
 0x21d   :  { %v8829_v49 = vor.u32 %v10679_v36, %v8826_v39  ;;  %v9418_v21 = vld [vmem:[#allocation5 + $0x12b0] sm:$0xf0]  ;;  %v10755_v36 = vld [vmem:[#allocation5 + $0x1064] sm:$0xf] }
 0x21e   :  { %5849 = vmatpush.bf16.msrb.mxu0 %v8589_v50  ;;  %5862 = vmatpush.bf16.msrb.mxu1 %v8717_v33  ;;  %v8957_v50 = vor.u32 %v10711_v40, %v8954_v42  ;;  %v10763_v33 = vld [vmem:[#allocation5 + $0x10a4] sm:$0xf]  ;;  %v9130_v39 = vld [vmem:[#allocation5 + $0x1070] sm:$0xf0] }
 0x21f   :  { %v9165_v7 = vor.u32 %v10763_v33, %v9162_v53  ;;  %v9258_v44 = vld [vmem:[#allocation5 + $0x1170] sm:$0xf0]  ;;  %v10751_v33 = vld [vmem:[#allocation5 + $0x1044] sm:$0xf] }
 0x220   :  { %5874 = vmatpush.bf16.msrb.mxu2 %v8861_v60  ;;  %5887 = vmatpush.bf16.msrb.mxu3 %v8989_v61  ;;  %v10795_v60 = vld [vmem:[#allocation5 + $0x11a4] sm:$0xf]  ;;  %v9290_v61 = vld [vmem:[#allocation5 + $0x11b0] sm:$0xf0] }
 0x221   :  { %v9293_v12 = vor.u32 %v10795_v60, %v9290_v61  ;;  %v9114_v53 = vld [vmem:[#allocation5 + $0x1050] sm:$0xf0]  ;;  %v10783_v60 = vld [vmem:[#allocation5 + $0x1144] sm:$0xf] }
 0x222   :  { %5850 = vmatpush.bf16.msrb.mxu0 %v8573_v15  ;;  %5863 = vmatpush.bf16.msrb.mxu1 %v8701_v16  ;;  %v9565_v15 = vor.u32 %v10863_v14, %v9562_v4  ;;  %v10791_v16 = vld [vmem:[#allocation5 + $0x1184] sm:$0xf]  ;;  %v5644_v45 = vpop.f32.mrf.mxu0  ;;  %v5657_v20 = vpop.f32.mrf.mxu1  ;;  %v9242_v61 = vld [vmem:[#allocation5 + $0x1150] sm:$0xf0]  ;;  %v9117_v52 = vor.u32 %v10751_v33, %v9114_v53 }
 0x223   :  { %v5645_v27 = vadd.f32 %v5644_v45, %v11439_v58  ;;  %v9133_v58 = vor.u32 %v10755_v36, %v9130_v39  ;;  %v10819_v62 = vld [vmem:[#allocation5 + $0x1264] sm:$0xf]  ;;  %v9386_v4 = vld [vmem:[#allocation5 + $0x1270] sm:$0xf0]  ;;  %v9245_v51 = vor.u32 %v10783_v60, %v9242_v61 }
 0x224   :  { %5875 = vmatpush.bf16.msrb.mxu2 %v8845_v26  ;;  %5888 = vmatpush.bf16.msrb.mxu3 %v8973_v8  ;;  %v10859_v26 = vld [vmem:[#allocation5 + $0x13a4] sm:$0xf]  ;;  %v9546_v8 = vld [vmem:[#allocation5 + $0x13b0] sm:$0xf0] }
 0x225   :  { %5851 = vmatmul.bf16.vlgmr.msrb.gmra.mxu0 %v11385_v59  ;;  %5864 = vmatmul.bf16.vlgmr.msrb.gmra.mxu1 %v11387_v1  ;;  %v5658_v40 = vadd.f32 %v5657_v20, %v5645_v27  ;;  %v9549_v43 = vor.u32 %v10859_v26, %v9546_v8  ;;  %v9226_v45 = vld [vmem:[#allocation5 + $0x1130] sm:$0xf0]  ;;  %v10815_v20 = vld [vmem:[#allocation5 + $0x1244] sm:$0xf] }
 0x226   :  { %5895 = vmatpush.bf16.msra.mxu0 %v9197_v18  ;;  %5908 = vmatpush.bf16.msra.mxu1 %v9325_v19  ;;  %v9274_v18 = vld [vmem:[#allocation5 + $0x1190] sm:$0xf0]  ;;  %v10827_v19 = vld [vmem:[#allocation5 + $0x12a4] sm:$0xf] }
 0x227   :  { %v9277_v35 = vor.u32 %v10791_v16, %v9274_v18  ;;  %v9421_v42 = vor.u32 %v10827_v19, %v9418_v21  ;;  %v9389_v16 = vor.u32 %v10819_v62, %v9386_v4  ;;  %v10779_v19 = vld [vmem:[#allocation5 + $0x1124] sm:$0xf]  ;;  %v9370_v8 = vld [vmem:[#allocation5 + $0x1250] sm:$0xf0] }
 0x228   :  { %5876 = vmatpush.bf16.msrb.mxu2 %v8829_v49  ;;  %5889 = vmatpush.bf16.msrb.mxu3 %v8957_v50  ;;  %v9530_v49 = vld [vmem:[#allocation5 + $0x1390] sm:$0xf0]  ;;  %v9261_v50 = vor.u32 %v10787_v17, %v9258_v44  ;;  %v10847_v27 = vld [vmem:[#allocation5 + $0x1344] sm:$0xf]  ;;  %v9229_v39 = vor.u32 %v10779_v19, %v9226_v45 }
 0x229   :  { %v10775_v17 = vld [vmem:[#allocation5 + $0x1104] sm:$0xf]  ;;  %v9834_v33 = vld [vmem:[#allocation5 + $0x15f0] sm:$0xf0] }
 0x22a   :  { %5896 = vmatpush.bf16.msra.mxu0 %v9181_v47  ;;  %5909 = vmatpush.bf16.msra.mxu1 %v9309_v48  ;;  %v9402_v47 = vld [vmem:[#allocation5 + $0x1290] sm:$0xf0]  ;;  %v10855_v48 = vld [vmem:[#allocation5 + $0x1384] sm:$0xf]  ;;  %v5646_v2 = vpop.f32.mrf.mxu0  ;;  %v5659_v14 = vpop.f32.mrf.mxu1 }
 0x22b   :  { %5877 = vmatmul.bf16.vlgmr.msrb.gmra.mxu2 %v11391_v22  ;;  %5890 = vmatmul.bf16.vlgmr.msrb.gmra.mxu3 %v11393_v29  ;;  %v10811_v53 = vld [vmem:[#allocation5 + $0x1224] sm:$0xf]  ;;  %v9690_v4 = vld [vmem:[#allocation5 + $0x14d0] sm:$0xf0] }
 0x22c   :  { %5921 = vmatpush.bf16.msra.mxu2 %v9453_v57  ;;  %5934 = vmatpush.bf16.msra.mxu3 %v9581_v55  ;;  %v9405_v57 = vor.u32 %v10823_v46, %v9402_v47  ;;  %v9533_v55 = vor.u32 %v10855_v48, %v9530_v49  ;;  %v9373_v46 = vor.u32 %v10815_v20, %v9370_v8  ;;  %v9210_v48 = vld [vmem:[#allocation5 + $0x1110] sm:$0xf0]  ;;  %v10899_v49 = vld [vmem:[#allocation5 + $0x14e4] sm:$0xf] }
 0x22d   :  { %v9213_v61 = vor.u32 %v10775_v17, %v9210_v48  ;;  %v10895_v14 = vld [vmem:[#allocation5 + $0x14c4] sm:$0xf]  ;;  %v9466_v45 = vld [vmem:[#allocation5 + $0x1310] sm:$0xf0] }
 0x22e   :  { %5897 = vmatpush.bf16.msra.mxu0 %v9165_v7  ;;  %5910 = vmatpush.bf16.msra.mxu1 %v9293_v12  ;;  %v10851_v7 = vld [vmem:[#allocation5 + $0x1364] sm:$0xf]  ;;  %v9514_v12 = vld [vmem:[#allocation5 + $0x1370] sm:$0xf0]  ;;  %v5670_v21 = vpop.f32.mrf.mxu2  ;;  %v5683_v26 = vpop.f32.mrf.mxu3 }
 0x22f   :  { %v9517_v18 = vor.u32 %v10851_v7, %v9514_v12  ;;  %v10927_v7 = vld [vmem:[#allocation5 + $0x15c4] sm:$0xf]  ;;  %v10090_v8 = vld [vmem:[#allocation5 + $0x17f0] sm:$0xf0] }
 0x230   :  { %5922 = vmatpush.bf16.msra.mxu2 %v9437_v13  ;;  %5935 = vmatpush.bf16.msra.mxu3 %v9565_v15  ;;  %v10747_v13 = vld [vmem:[#allocation5 + $0x1024] sm:$0xf]  ;;  %v9098_v15 = vld [vmem:[#allocation5 + $0x1030] sm:$0xf0] }
 0x231   :  { %v9101_v36 = vor.u32 %v10747_v13, %v9098_v15  ;;  %v9818_v15 = vld [vmem:[#allocation5 + $0x15d0] sm:$0xf0]  ;;  %v10839_v19 = vld [vmem:[#allocation5 + $0x1304] sm:$0xf] }
 0x232   :  { %5898 = vmatpush.bf16.msra.mxu0 %v9149_v28  ;;  %5911 = vmatpush.bf16.msra.mxu1 %v9277_v35  ;;  %v9498_v28 = vld [vmem:[#allocation5 + $0x1350] sm:$0xf0]  ;;  %v5671_v35 = vadd.f32 %v5670_v21, %v5658_v40  ;;  %v10963_v20 = vld [vmem:[#allocation5 + $0x16e4] sm:$0xf] }
 0x233   :  { %v9501_v47 = vor.u32 %v10847_v27, %v9498_v28  ;;  %v9354_v40 = vld [vmem:[#allocation5 + $0x1230] sm:$0xf0]  ;;  %v9693_v27 = vor.u32 %v10895_v14, %v9690_v4  ;;  %v9821_v28 = vor.u32 %v10927_v7, %v9818_v15  ;;  %v10959_v48 = vld [vmem:[#allocation5 + $0x16c4] sm:$0xf] }
 0x234   :  { %5923 = vmatpush.bf16.msra.mxu2 %v9421_v42  ;;  %5936 = vmatpush.bf16.msra.mxu3 %v9549_v43  ;;  %v10743_v42 = vld [vmem:[#allocation5 + $0x1004] sm:$0xf]  ;;  %v9082_v43 = vld [vmem:[#allocation5 + $0x1010] sm:$0xf0]  ;;  %v11446_v44 = vadd.f32 %v5683_v26, %v5671_v35  ;;  %v9357_v12 = vor.u32 %v10811_v53, %v9354_v40 }
 0x235   :  { %v9085_v60 = vor.u32 %v10743_v42, %v9082_v43  ;;  %v9962_v21 = vld [vmem:[#allocation5 + $0x16f0] sm:$0xf0]  ;;  %v10995_v26 = vld [vmem:[#allocation5 + $0x17e4] sm:$0xf] }
 0x236   :  { %5899 = vmatpush.bf16.msra.mxu0 %v9133_v58  ;;  %5912 = vmatpush.bf16.msra.mxu1 %v9261_v50  ;;  %v9706_v58 = vld [vmem:[#allocation5 + $0x14f0] sm:$0xf0]  ;;  %v10931_v50 = vld [vmem:[#allocation5 + $0x15e4] sm:$0xf]  ;;  %v5685_v13 = vpop.f32.mrf.mxu3  ;;  %v9965_v43 = vor.u32 %v10963_v20, %v9962_v21  ;;  %v10093_v17 = vor.u32 %v10995_v26, %v10090_v8 }
 0x237   :  { %v9709_v62 = vor.u32 %v10899_v49, %v9706_v58  ;;  %v9837_v2 = vor.u32 %v10931_v50, %v9834_v33  ;;  %v9674_v42 = vld [vmem:[#allocation5 + $0x14b0] sm:$0xf0]  ;;  %v10991_v58 = vld [vmem:[#allocation5 + $0x17c4] sm:$0xf]  ;;  %v11049_v33 = vld [vmem:[#allocation7] sm:$0xf] }
 0x238   :  { %5924 = vmatpush.bf16.msra.mxu2 %v9405_v57  ;;  %5937 = vmatpush.bf16.msra.mxu3 %v9533_v55  ;;  %v10843_v57 = vld [vmem:[#allocation5 + $0x1324] sm:$0xf]  ;;  %v9482_v55 = vld [vmem:[#allocation5 + $0x1330] sm:$0xf0]  ;;  %v1528_v53 = vperm.slane %v11049_v33, 1 }
 0x239   :  { %v9946_v49 = vld [vmem:[#allocation5 + $0x16d0] sm:$0xf0]  ;;  %v10955_v4 = vld [vmem:[#allocation5 + $0x16a4] sm:$0xf] }
 0x23a   :  { %5900 = vmatpush.bf16.msra.mxu0 %v9117_v52  ;;  %5913 = vmatpush.bf16.msra.mxu1 %v9245_v51  ;;  %v9485_v52 = vor.u32 %v10843_v57, %v9482_v55  ;;  %v5672_v51 = vpop.f32.mrf.mxu2  ;;  %v10074_v50 = vld [vmem:[#allocation5 + $0x17d0] sm:$0xf0]  ;;  %v10887_v55 = vld [vmem:[#allocation5 + $0x1484] sm:$0xf] }
 0x23b   :  { %v9786_v14 = vld [vmem:[#allocation5 + $0x1590] sm:$0xf0]  ;;  %v10987_v51 = vld [vmem:[#allocation5 + $0x17a4] sm:$0xf] }
 0x23c   :  { %5925 = vmatpush.bf16.msra.mxu2 %v9389_v16  ;;  %5938 = vmatpush.bf16.msra.mxu3 %v9517_v18  ;;  %v10807_v16 = vld [vmem:[#allocation5 + $0x1204] sm:$0xf]  ;;  %v9338_v18 = vld [vmem:[#allocation5 + $0x1210] sm:$0xf0] }
 0x23d   :  { %v9341_v35 = vor.u32 %v10807_v16, %v9338_v18  ;;  %v10058_v13 = vld [vmem:[#allocation5 + $0x17b0] sm:$0xf0]  ;;  %v10915_v8 = vld [vmem:[#allocation5 + $0x1564] sm:$0xf] }
 0x23e   :  { %5901 = vmatpush.bf16.msra.mxu0 %v9101_v36  ;;  %5914 = vmatpush.bf16.msra.mxu1 %v9229_v39  ;;  %v9469_v36 = vor.u32 %v10839_v19, %v9466_v45  ;;  %v10891_v39 = vld [vmem:[#allocation5 + $0x14a4] sm:$0xf]  ;;  %v9642_v45 = vld [vmem:[#allocation5 + $0x1470] sm:$0xf0]  ;;  %v10061_v26 = vor.u32 %v10987_v51, %v10058_v13 }
 0x23f   :  { %v9677_v40 = vor.u32 %v10891_v39, %v9674_v42  ;;  %v10883_v19 = vld [vmem:[#allocation5 + $0x1464] sm:$0xf]  ;;  %v10042_v39 = vld [vmem:[#allocation5 + $0x1790] sm:$0xf0] }
 0x240   :  { %5926 = vmatpush.bf16.msra.mxu2 %v9373_v46  ;;  %5939 = vmatpush.bf16.msra.mxu3 %v9501_v47  ;;  %v10923_v46 = vld [vmem:[#allocation5 + $0x15a4] sm:$0xf]  ;;  %v9802_v47 = vld [vmem:[#allocation5 + $0x15b0] sm:$0xf0]  ;;  %v9645_v42 = vor.u32 %v10883_v19, %v9642_v45 }
 0x241   :  { %v9805_v57 = vor.u32 %v10923_v46, %v9802_v47  ;;  %v9626_v46 = vld [vmem:[#allocation5 + $0x1450] sm:$0xf0] }
 0x242   :  { %5902 = vmatpush.bf16.msra.mxu0 %v9085_v60  ;;  %5915 = vmatpush.bf16.msra.mxu1 %v9213_v61  ;;  %v9658_v60 = vld [vmem:[#allocation5 + $0x1490] sm:$0xf0]  ;;  %v9949_v61 = vor.u32 %v10959_v48, %v9946_v49  ;;  %v5696_v7 = vpop.f32.mrf.mxu0  ;;  %v10911_v49 = vld [vmem:[#allocation5 + $0x1544] sm:$0xf] }
 0x243   :  { %v5697_v15 = vadd.f32 %v5696_v7, %v1528_v53  ;;  %v9661_v16 = vor.u32 %v10887_v55, %v9658_v60  ;;  %v10026_v55 = vld [vmem:[#allocation5 + $0x1770] sm:$0xf0]  ;;  %v10907_v7 = vld [vmem:[#allocation5 + $0x1524] sm:$0xf] }
 0x244   :  { %5927 = vmatpush.bf16.msra.mxu2 %v9357_v12  ;;  %5940 = vmatpush.bf16.msra.mxu3 %v9485_v52  ;;  %v5709_v12 = vpop.f32.mrf.mxu1  ;;  %v9930_v52 = vld [vmem:[#allocation5 + $0x16b0] sm:$0xf0] }
 0x245   :  { %5903 = vmatmul.bf16.vlgmr.msra.gmra.mxu0 %v11397_v3  ;;  %5916 = vmatmul.bf16.vlgmr.msra.gmra.mxu1 %v11399_v11  ;;  %v5710_v20 = vadd.f32 %v5709_v12, %v5697_v15  ;;  %v9933_v21 = vor.u32 %v10955_v4, %v9930_v52  ;;  %v9738_v12 = vld [vmem:[#allocation5 + $0x1530] sm:$0xf0]  ;;  %v10943_v52 = vld [vmem:[#allocation5 + $0x1644] sm:$0xf] }
 0x246   :  { %5947 = vmatpush.bf16.msrb.mxu0 %v9709_v62  ;;  %5960 = vmatpush.bf16.msrb.mxu1 %v9837_v2  ;;  %v10077_v62 = vor.u32 %v10991_v58, %v10074_v50  ;;  %v10919_v2 = vld [vmem:[#allocation5 + $0x1584] sm:$0xf]  ;;  %v9754_v58 = vld [vmem:[#allocation5 + $0x1550] sm:$0xf0] }
 0x247   :  { %v9789_v18 = vor.u32 %v10919_v2, %v9786_v14  ;;  %v10947_v50 = vld [vmem:[#allocation5 + $0x1664] sm:$0xf]  ;;  %v9610_v2 = vld [vmem:[#allocation5 + $0x1430] sm:$0xf0] }
 0x248   :  { %5928 = vmatpush.bf16.msra.mxu2 %v9341_v35  ;;  %5941 = vmatpush.bf16.msra.mxu3 %v9469_v36  ;;  %v9914_v35 = vld [vmem:[#allocation5 + $0x1690] sm:$0xf0]  ;;  %v10983_v36 = vld [vmem:[#allocation5 + $0x1784] sm:$0xf] }
 0x249   :  { %v10045_v48 = vor.u32 %v10983_v36, %v10042_v39  ;;  %v9882_v15 = vld [vmem:[#allocation5 + $0x1650] sm:$0xf0] }
 0x24a   :  { %5948 = vmatpush.bf16.msrb.mxu0 %v9693_v27  ;;  %5961 = vmatpush.bf16.msrb.mxu1 %v9821_v28  ;;  %v9770_v27 = vld [vmem:[#allocation5 + $0x1570] sm:$0xf0]  ;;  %v10951_v28 = vld [vmem:[#allocation5 + $0x1684] sm:$0xf]  ;;  %v5698_v33 = vpop.f32.mrf.mxu0 }
 0x24b   :  { %5929 = vmatmul.bf16.vlgmr.msra.gmra.mxu2 %v11403_v34  ;;  %5942 = vmatmul.bf16.vlgmr.msra.gmra.mxu3 %v11405_v41  ;;  %v9917_v47 = vor.u32 %v10951_v28, %v9914_v35  ;;  %v9885_v35 = vor.u32 %v10943_v52, %v9882_v15  ;;  %v9722_v39 = vld [vmem:[#allocation5 + $0x1510] sm:$0xf0]  ;;  %v7536_v15 = vld [vmem:[#allocation5 + $0x3e8] sm:$0xf] }
 0x24c   :  { %5973 = vmatpush.bf16.msrb.mxu2 %v9965_v43  ;;  %5986 = vmatpush.bf16.msrb.mxu3 %v10093_v17  ;;  %v9773_v43 = vor.u32 %v10915_v8, %v9770_v27  ;;  %v10879_v17 = vld [vmem:[#allocation5 + $0x1444] sm:$0xf]  ;;  %v5711_v53 = vpop.f32.mrf.mxu1  ;;  %v9594_v8 = vld [vmem:[#allocation5 + $0x1410] sm:$0xf0] }
 0x24d   :  { %v9629_v60 = vor.u32 %v10879_v17, %v9626_v46  ;;  %v10903_v27 = vld [vmem:[#allocation5 + $0x1504] sm:$0xf]  ;;  %v7280_v17 = vld [vmem:[#allocation5 + $0x1e8] sm:$0xf]  ;;  %v10294_v46 = vld [vmem:[#allocation5 + $0x1f4] sm:$0xf0] }
 0x24e   :  { %5949 = vmatpush.bf16.msrb.mxu0 %v9677_v40  ;;  %5962 = vmatpush.bf16.msrb.mxu1 %v9805_v57  ;;  %v9898_v40 = vld [vmem:[#allocation5 + $0x1670] sm:$0xf0]  ;;  %v10979_v57 = vld [vmem:[#allocation5 + $0x1764] sm:$0xf]  ;;  %v5722_v51 = vpop.f32.mrf.mxu2  ;;  %v5735_v13 = vpop.f32.mrf.mxu3  ;;  %v7281_v53 = vor.u32 %v10294_v46, %v7280_v17  ;;  %v7520_v17 = vld [vmem:[#allocation5 + $0x3c8] sm:$0xf] }
 0x24f   :  { %v9901_v14 = vor.u32 %v10947_v50, %v9898_v40  ;;  %v10029_v4 = vor.u32 %v10979_v57, %v10026_v55  ;;  %v5723_v19 = vadd.f32 %v5722_v51, %v5710_v20  ;;  %v9866_v20 = vld [vmem:[#allocation5 + $0x1630] sm:$0xf0]  ;;  %v9725_v50 = vor.u32 %v10903_v27, %v9722_v39  ;;  %v7136_v40 = vld [vmem:[#allocation5 + $0xc8] sm:$0xf]  ;;  %v10258_v57 = vld [vmem:[#allocation5 + $0xd4] sm:$0xf0] }
 0x250   :  { %5974 = vmatpush.bf16.msrb.mxu2 %v9949_v61  ;;  %5987 = vmatpush.bf16.msrb.mxu3 %v10077_v62  ;;  %v9757_v61 = vor.u32 %v10911_v49, %v9754_v58  ;;  %v10875_v62 = vld [vmem:[#allocation5 + $0x1424] sm:$0xf]  ;;  %v9994_v49 = vld [vmem:[#allocation5 + $0x1730] sm:$0xf0]  ;;  %v7264_v55 = vld [vmem:[#allocation5 + $0x1c8] sm:$0xf] }
 0x251   :  { %v9613_v45 = vor.u32 %v10875_v62, %v9610_v2  ;;  %v11452_v28 = vadd.f32 %v5735_v13, %v5723_v19  ;;  %v9978_v52 = vld [vmem:[#allocation5 + $0x1710] sm:$0xf0]  ;;  %v7408_v51 = vld [vmem:[#allocation5 + $0x2e8] sm:$0xf]  ;;  %v10326_v13 = vld [vmem:[#allocation5 + $0x2f4] sm:$0xf0] }
 0x252   :  { %5950 = vmatpush.bf16.msrb.mxu0 %v9661_v16  ;;  %5963 = vmatpush.bf16.msrb.mxu1 %v9789_v18  ;;  %v10975_v16 = vld [vmem:[#allocation5 + $0x1744] sm:$0xf]  ;;  %v10010_v18 = vld [vmem:[#allocation5 + $0x1750] sm:$0xf0]  ;;  %v7409_v27 = vor.u32 %v10326_v13, %v7408_v51  ;;  %v10286_v39 = vld [vmem:[#allocation5 + $0x1b4] sm:$0xf0] }
 0x253   :  { %v10013_v36 = vor.u32 %v10975_v16, %v10010_v18  ;;  %v10358_v16 = vld [vmem:[#allocation5 + $0x3f4] sm:$0xf0]  ;;  %v7137_v18 = vor.u32 %v10258_v57, %v7136_v40  ;;  %v7376_v40 = vld [vmem:[#allocation5 + $0x2a8] sm:$0xf] }
 0x254   :  { %5975 = vmatpush.bf16.msrb.mxu2 %v9933_v21  ;;  %5988 = vmatpush.bf16.msrb.mxu3 %v10061_v26  ;;  %v9741_v21 = vor.u32 %v10907_v7, %v9738_v12  ;;  %v10871_v26 = vld [vmem:[#allocation5 + $0x1404] sm:$0xf]  ;;  %v9850_v7 = vld [vmem:[#allocation5 + $0x1610] sm:$0xf0]  ;;  %v10354_v46 = vld [vmem:[#allocation5 + $0x3d4] sm:$0xf0] }
 0x255   :  { %v9597_v58 = vor.u32 %v10871_v26, %v9594_v8  ;;  %v10967_v12 = vld [vmem:[#allocation5 + $0x1704] sm:$0xf]  ;;  %v7120_v26 = vld [vmem:[#allocation5 + $0xa8] sm:$0xf]  ;;  %v10254_v8 = vld [vmem:[#allocation5 + $0xb4] sm:$0xf0] }
 0x256   :  { %5951 = vmatpush.bf16.msrb.mxu0 %v9645_v42  ;;  %5964 = vmatpush.bf16.msrb.mxu1 %v9773_v43  ;;  %v7152_v42 = vld [vmem:[#allocation5 + $0xe8] sm:$0xf]  ;;  %v10262_v43 = vld [vmem:[#allocation5 + $0xf4] sm:$0xf0]  ;;  %v5724_v62 = vpop.f32.mrf.mxu2  ;;  %v5737_v2 = vpop.f32.mrf.mxu3 }
 0x257   :  { %v7153_v33 = vor.u32 %v10262_v43, %v7152_v42  ;;  %v7392_v42 = vld [vmem:[#allocation5 + $0x2c8] sm:$0xf]  ;;  %v10322_v43 = vld [vmem:[#allocation5 + $0x2d4] sm:$0xf0] }
 0x258   :  { %5976 = vmatpush.bf16.msrb.mxu2 %v9917_v47  ;;  %5989 = vmatpush.bf16.msrb.mxu3 %v10045_v48  ;;  %v10939_v47 = vld [vmem:[#allocation5 + $0x1624] sm:$0xf]  ;;  %v10350_v62 = vld [vmem:[#allocation5 + $0x3b4] sm:$0xf0] }
 0x259   :  { %v10971_v48 = vld [vmem:[#allocation5 + $0x1724] sm:$0xf] }
 0x25a   :  { %5952 = vmatpush.bf16.msrb.mxu0 %v9629_v60  ;;  %5965 = vmatpush.bf16.msrb.mxu1 %v9757_v61  ;;  %v9869_v60 = vor.u32 %v10939_v47, %v9866_v20  ;;  %v9997_v61 = vor.u32 %v10971_v48, %v9994_v49  ;;  %v7121_v47 = vor.u32 %v10254_v8, %v7120_v26  ;;  %v7104_v48 = vld [vmem:[#allocation5 + $0x88] sm:$0xf]  ;;  %v10250_v49 = vld [vmem:[#allocation5 + $0x94] sm:$0xf0] }
 0x25b   :  { %v7072_v8 = vld [vmem:[#allocation5 + $0x48] sm:$0xf] }
 0x25c   :  { %5977 = vmatpush.bf16.msrb.mxu2 %v9901_v14  ;;  %5990 = vmatpush.bf16.msrb.mxu3 %v10029_v4  ;;  %v10290_v14 = vld [vmem:[#allocation5 + $0x1d4] sm:$0xf0]  ;;  %v10935_v4 = vld [vmem:[#allocation5 + $0x1604] sm:$0xf] }
 0x25d   :  { %v7265_v19 = vor.u32 %v10290_v14, %v7264_v55  ;;  %v7105_v14 = vor.u32 %v10250_v49, %v7104_v48  ;;  %v10342_v48 = vld [vmem:[#allocation5 + $0x374] sm:$0xf0] }
 0x25e   :  { %5953 = vmatpush.bf16.msrb.mxu0 %v9613_v45  ;;  %5966 = vmatpush.bf16.msrb.mxu1 %v9741_v21  ;;  %v9853_v45 = vor.u32 %v10935_v4, %v9850_v7  ;;  %v9981_v21 = vor.u32 %v10967_v12, %v9978_v52  ;;  %v7088_v7 = vld [vmem:[#allocation5 + $0x68] sm:$0xf]  ;;  %v10246_v12 = vld [vmem:[#allocation5 + $0x74] sm:$0xf0] }
 0x260   :  { %5978 = vmatpush.bf16.msrb.mxu2 %v9885_v35  ;;  %5991 = vmatpush.bf16.msrb.mxu3 %v10013_v36  ;;  %v7537_v35 = vor.u32 %v10358_v16, %v7536_v15  ;;  %v7248_v36 = vld [vmem:[#allocation5 + $0x1a8] sm:$0xf]  ;;  %v10278_v16 = vld [vmem:[#allocation5 + $0x174] sm:$0xf0] }
 0x261   :  { %v7249_v20 = vor.u32 %v10286_v39, %v7248_v36  ;;  %v7216_v15 = vld [vmem:[#allocation5 + $0x168] sm:$0xf] }
 0x262   :  { %5954 = vmatpush.bf16.msrb.mxu0 %v9597_v58  ;;  %5967 = vmatpush.bf16.msrb.mxu1 %v9725_v50  ;;  %v7393_v58 = vor.u32 %v10322_v43, %v7392_v42  ;;  %v7521_v50 = vor.u32 %v10354_v46, %v7520_v17  ;;  %v5748_v57 = vpop.f32.mrf.mxu0  ;;  %v5761_v55 = vpop.f32.mrf.mxu1  ;;  %v7217_v26 = vor.u32 %v10278_v16, %v7216_v15  ;;  %v7200_v39 = vld [vmem:[#allocation5 + $0x148] sm:$0xf]  ;;  %v10274_v42 = vld [vmem:[#allocation5 + $0x154] sm:$0xf0] }
 0x263   :  { %v5749_v2 = vadd.f32 %v5748_v57, %v11452_v28  ;;  %v7089_v28 = vor.u32 %v10246_v12, %v7088_v7  ;;  %v7344_v43 = vld [vmem:[#allocation5 + $0x268] sm:$0xf]  ;;  %v10234_v15 = vld [vmem:[#allocation5 + $0x14] sm:$0xf0] }
 0x264   :  { %5979 = vmatpush.bf16.msrb.mxu2 %v9869_v60  ;;  %5992 = vmatpush.bf16.msrb.mxu3 %v9997_v61  ;;  %v10318_v60 = vld [vmem:[#allocation5 + $0x2b4] sm:$0xf0]  ;;  %v7504_v61 = vld [vmem:[#allocation5 + $0x3a8] sm:$0xf] }
 0x265   :  { %5955 = vmatmul.bf16.vlgmr.msrb.gmra.mxu0 %v11409_v25  ;;  %5968 = vmatmul.bf16.vlgmr.msrb.gmra.mxu1 %v11411_v30  ;;  %v5762_v52 = vadd.f32 %v5761_v55, %v5749_v2  ;;  %v7377_v51 = vor.u32 %v10318_v60, %v7376_v40  ;;  %v7505_v13 = vor.u32 %v10350_v62, %v7504_v61  ;;  %v7184_v57 = vld [vmem:[#allocation5 + $0x128] sm:$0xf]  ;;  %v10270_v55 = vld [vmem:[#allocation5 + $0x134] sm:$0xf0] }
 0x266   :  { %5999 = vmatpush.bf16.msra.mxu0 %v7153_v33  ;;  %6012 = vmatpush.bf16.msra.mxu1 %v7281_v53  ;;  %v7232_v33 = vld [vmem:[#allocation5 + $0x188] sm:$0xf]  ;;  %v10282_v53 = vld [vmem:[#allocation5 + $0x194] sm:$0xf0] }
 0x267   :  { %v7233_v4 = vor.u32 %v10282_v53, %v7232_v33  ;;  %v10238_v33 = vld [vmem:[#allocation5 + $0x34] sm:$0xf0]  ;;  %v7328_v60 = vld [vmem:[#allocation5 + $0x248] sm:$0xf] }
 0x268   :  { %5980 = vmatpush.bf16.msrb.mxu2 %v9853_v45  ;;  %5993 = vmatpush.bf16.msrb.mxu3 %v9981_v21  ;;  %v7488_v45 = vld [vmem:[#allocation5 + $0x388] sm:$0xf]  ;;  %v10346_v21 = vld [vmem:[#allocation5 + $0x394] sm:$0xf0] }
 0x269   :  { %v7489_v36 = vor.u32 %v10346_v21, %v7488_v45  ;;  %v10306_v2 = vld [vmem:[#allocation5 + $0x254] sm:$0xf0]  ;;  %v7168_v16 = vld [vmem:[#allocation5 + $0x108] sm:$0xf] }
 0x26a   :  { %6000 = vmatpush.bf16.msra.mxu0 %v7137_v18  ;;  %6013 = vmatpush.bf16.msra.mxu1 %v7265_v19  ;;  %v7360_v18 = vld [vmem:[#allocation5 + $0x288] sm:$0xf]  ;;  %v10314_v19 = vld [vmem:[#allocation5 + $0x294] sm:$0xf0]  ;;  %v5750_v17 = vpop.f32.mrf.mxu0  ;;  %v5763_v46 = vpop.f32.mrf.mxu1 }
 0x26b   :  { %5981 = vmatmul.bf16.vlgmr.msrb.gmra.mxu2 %v11415_v54  ;;  %5994 = vmatmul.bf16.vlgmr.msrb.gmra.mxu3 %v11417_v56  ;;  %v10266_v21 = vld [vmem:[#allocation5 + $0x114] sm:$0xf0] }
 0x26c   :  { %6025 = vmatpush.bf16.msra.mxu2 %v7409_v27  ;;  %6038 = vmatpush.bf16.msra.mxu3 %v7537_v35  ;;  %v10242_v27 = vld [vmem:[#allocation5 + $0x54] sm:$0xf0]  ;;  %v7361_v35 = vor.u32 %v10314_v19, %v7360_v18  ;;  %v7329_v19 = vor.u32 %v10306_v2, %v7328_v60  ;;  %v8048_v2 = vld [vmem:[#allocation5 + $0x7e8] sm:$0xf] }
 0x26d   :  { %v7073_v49 = vor.u32 %v10242_v27, %v7072_v8  ;;  %v7792_v8 = vld [vmem:[#allocation5 + $0x5e8] sm:$0xf]  ;;  %v10422_v27 = vld [vmem:[#allocation5 + $0x5f4] sm:$0xf0] }
 0x26e   :  { %6001 = vmatpush.bf16.msra.mxu0 %v7121_v47  ;;  %6014 = vmatpush.bf16.msra.mxu1 %v7249_v20  ;;  %v10310_v47 = vld [vmem:[#allocation5 + $0x274] sm:$0xf0]  ;;  %v7472_v20 = vld [vmem:[#allocation5 + $0x368] sm:$0xf]  ;;  %v5774_v61 = vpop.f32.mrf.mxu2  ;;  %v5787_v62 = vpop.f32.mrf.mxu3  ;;  %v7793_v46 = vor.u32 %v10422_v27, %v7792_v8 }
 0x26f   :  { %v7345_v53 = vor.u32 %v10310_v47, %v7344_v43  ;;  %v7473_v40 = vor.u32 %v10342_v48, %v7472_v20  ;;  %v5775_v7 = vadd.f32 %v5774_v61, %v5762_v52  ;;  %v10302_v52 = vld [vmem:[#allocation5 + $0x234] sm:$0xf0]  ;;  %v7169_v43 = vor.u32 %v10266_v21, %v7168_v16  ;;  %v7648_v47 = vld [vmem:[#allocation5 + $0x4c8] sm:$0xf] }
 0x270   :  { %6026 = vmatpush.bf16.msra.mxu2 %v7393_v58  ;;  %6039 = vmatpush.bf16.msra.mxu3 %v7521_v50  ;;  %v7201_v58 = vor.u32 %v10274_v42, %v7200_v39  ;;  %v7056_v50 = vld [vmem:[#allocation5 + $0x28] sm:$0xf]  ;;  %v10334_v39 = vld [vmem:[#allocation5 + $0x334] sm:$0xf0] }
 0x271   :  { %v7057_v12 = vor.u32 %v10238_v33, %v7056_v50  ;;  %v11459_v18 = vadd.f32 %v5787_v62, %v5775_v7  ;;  %v10386_v20 = vld [vmem:[#allocation5 + $0x4d4] sm:$0xf0]  ;;  %v7776_v48 = vld [vmem:[#allocation5 + $0x5c8] sm:$0xf] }
 0x272   :  { %6002 = vmatpush.bf16.msra.mxu0 %v7105_v14  ;;  %6015 = vmatpush.bf16.msra.mxu1 %v7233_v4  ;;  %v7456_v14 = vld [vmem:[#allocation5 + $0x348] sm:$0xf]  ;;  %v10338_v4 = vld [vmem:[#allocation5 + $0x354] sm:$0xf0] }
 0x273   :  { %v7457_v45 = vor.u32 %v10338_v4, %v7456_v14  ;;  %v10330_v60 = vld [vmem:[#allocation5 + $0x314] sm:$0xf0]  ;;  %v7920_v61 = vld [vmem:[#allocation5 + $0x6e8] sm:$0xf]  ;;  %v7649_v4 = vor.u32 %v10386_v20, %v7648_v47 }
 0x274   :  { %6027 = vmatpush.bf16.msra.mxu2 %v7377_v51  ;;  %6040 = vmatpush.bf16.msra.mxu3 %v7505_v13  ;;  %v7185_v51 = vor.u32 %v10270_v55, %v7184_v57  ;;  %v7040_v13 = vld [vmem:[#allocation5 + $0x8] sm:$0xf]  ;;  %v10298_v57 = vld [vmem:[#allocation5 + $0x214] sm:$0xf0] }
 0x275   :  { %v7041_v42 = vor.u32 %v10234_v15, %v7040_v13  ;;  %v7424_v55 = vld [vmem:[#allocation5 + $0x308] sm:$0xf]  ;;  %v10454_v62 = vld [vmem:[#allocation5 + $0x6f4] sm:$0xf0] }
 0x276   :  { %6003 = vmatpush.bf16.msra.mxu0 %v7089_v28  ;;  %6016 = vmatpush.bf16.msra.mxu1 %v7217_v26  ;;  %v7664_v28 = vld [vmem:[#allocation5 + $0x4e8] sm:$0xf]  ;;  %v10390_v26 = vld [vmem:[#allocation5 + $0x4f4] sm:$0xf0]  ;;  %v5776_v50 = vpop.f32.mrf.mxu2  ;;  %v5789_v33 = vpop.f32.mrf.mxu3  ;;  %v7921_v16 = vor.u32 %v10454_v62, %v7920_v61 }
 0x277   :  { %v7665_v17 = vor.u32 %v10390_v26, %v7664_v28  ;;  %v10486_v14 = vld [vmem:[#allocation5 + $0x7f4] sm:$0xf0]  ;;  %v7632_v13 = vld [vmem:[#allocation5 + $0x4a8] sm:$0xf] }
 0x278   :  { %6028 = vmatpush.bf16.msra.mxu2 %v7361_v35  ;;  %6041 = vmatpush.bf16.msra.mxu3 %v7489_v36  ;;  %v7312_v35 = vld [vmem:[#allocation5 + $0x228] sm:$0xf]  ;;  %v10382_v15 = vld [vmem:[#allocation5 + $0x4b4] sm:$0xf0] }
 0x279   :  { %v7440_v36 = vld [vmem:[#allocation5 + $0x328] sm:$0xf]  ;;  %v10414_v21 = vld [vmem:[#allocation5 + $0x5b4] sm:$0xf0] }
 0x27a   :  { %6004 = vmatpush.bf16.msra.mxu0 %v7073_v49  ;;  %6017 = vmatpush.bf16.msra.mxu1 %v7201_v58  ;;  %v7313_v49 = vor.u32 %v10302_v52, %v7312_v35  ;;  %v7441_v58 = vor.u32 %v10334_v39, %v7440_v36  ;;  %v7904_v28 = vld [vmem:[#allocation5 + $0x6c8] sm:$0xf]  ;;  %v10450_v26 = vld [vmem:[#allocation5 + $0x6d4] sm:$0xf0]  ;;  %v7633_v35 = vor.u32 %v10382_v15, %v7632_v13 }
 0x27b   :  { %v8032_v8 = vld [vmem:[#allocation5 + $0x7c8] sm:$0xf]  ;;  %v10482_v27 = vld [vmem:[#allocation5 + $0x7d4] sm:$0xf0] }
 0x27c   :  { %6029 = vmatpush.bf16.msra.mxu2 %v7345_v53  ;;  %6042 = vmatpush.bf16.msra.mxu3 %v7473_v40  ;;  %v10418_v53 = vld [vmem:[#allocation5 + $0x5d4] sm:$0xf0]  ;;  %v7296_v40 = vld [vmem:[#allocation5 + $0x208] sm:$0xf] }
 0x27d   :  { %v7777_v7 = vor.u32 %v10418_v53, %v7776_v48  ;;  %v7616_v36 = vld [vmem:[#allocation5 + $0x488] sm:$0xf]  ;;  %v10378_v39 = vld [vmem:[#allocation5 + $0x494] sm:$0xf0] }
 0x27e   :  { %6005 = vmatpush.bf16.msra.mxu0 %v7057_v12  ;;  %6018 = vmatpush.bf16.msra.mxu1 %v7185_v51  ;;  %v7297_v12 = vor.u32 %v10298_v57, %v7296_v40  ;;  %v7425_v51 = vor.u32 %v10330_v60, %v7424_v55  ;;  %v7888_v47 = vld [vmem:[#allocation5 + $0x6a8] sm:$0xf]  ;;  %v10478_v50 = vld [vmem:[#allocation5 + $0x7b4] sm:$0xf0]  ;;  %v7617_v53 = vor.u32 %v10378_v39, %v7616_v36 }
 0x27f   :  { %v7600_v57 = vld [vmem:[#allocation5 + $0x468] sm:$0xf]  ;;  %v10374_v55 = vld [vmem:[#allocation5 + $0x474] sm:$0xf0] }
 0x280   :  { %6030 = vmatpush.bf16.msra.mxu2 %v7329_v19  ;;  %6043 = vmatpush.bf16.msra.mxu3 %v7457_v45  ;;  %v8049_v19 = vor.u32 %v10486_v14, %v8048_v2  ;;  %v7760_v45 = vld [vmem:[#allocation5 + $0x5a8] sm:$0xf]  ;;  %v10406_v14 = vld [vmem:[#allocation5 + $0x574] sm:$0xf0] }
 0x281   :  { %v7761_v52 = vor.u32 %v10414_v21, %v7760_v45  ;;  %v7728_v2 = vld [vmem:[#allocation5 + $0x568] sm:$0xf]  ;;  %v10470_v36 = vld [vmem:[#allocation5 + $0x774] sm:$0xf0] }
 0x282   :  { %6006 = vmatpush.bf16.msra.mxu0 %v7041_v42  ;;  %6019 = vmatpush.bf16.msra.mxu1 %v7169_v43  ;;  %v7905_v42 = vor.u32 %v10450_v26, %v7904_v28  ;;  %v8033_v43 = vor.u32 %v10482_v27, %v8032_v8  ;;  %v5800_v20 = vpop.f32.mrf.mxu0  ;;  %v5813_v48 = vpop.f32.mrf.mxu1  ;;  %v7729_v13 = vor.u32 %v10406_v14, %v7728_v2  ;;  %v7584_v15 = vld [vmem:[#allocation5 + $0x448] sm:$0xf]  ;;  %v10402_v28 = vld [vmem:[#allocation5 + $0x554] sm:$0xf0] }
 0x283   :  { %v5801_v33 = vadd.f32 %v5800_v20, %v11459_v18  ;;  %v7601_v18 = vor.u32 %v10374_v55, %v7600_v57  ;;  %v7712_v21 = vld [vmem:[#allocation5 + $0x548] sm:$0xf]  ;;  %v10362_v2 = vld [vmem:[#allocation5 + $0x414] sm:$0xf0] }
 0x284   :  { %6031 = vmatpush.bf16.msra.mxu2 %v7313_v49  ;;  %6044 = vmatpush.bf16.msra.mxu3 %v7441_v58  ;;  %v10446_v49 = vld [vmem:[#allocation5 + $0x6b4] sm:$0xf0]  ;;  %v8016_v58 = vld [vmem:[#allocation5 + $0x7a8] sm:$0xf] }
 0x285   :  { %6007 = vmatmul.bf16.vlgmr.msra.gmra.mxu0 %v11349_v9  ;;  %6020 = vmatmul.bf16.vlgmr.msra.gmra.mxu1 %v11351_v10  ;;  %v5814_v60 = vadd.f32 %v5813_v48, %v5801_v33  ;;  %v7889_v61 = vor.u32 %v10446_v49, %v7888_v47  ;;  %v8017_v62 = vor.u32 %v10478_v50, %v8016_v58  ;;  %v7856_v26 = vld [vmem:[#allocation5 + $0x668] sm:$0xf]  ;;  %v10398_v48 = vld [vmem:[#allocation5 + $0x534] sm:$0xf0] }
 0x286   :  { %6051 = vmatpush.bf16.msrb.mxu0 %v7665_v17  ;;  %6064 = vmatpush.bf16.msrb.mxu1 %v7793_v46  ;;  %v7744_v17 = vld [vmem:[#allocation5 + $0x588] sm:$0xf]  ;;  %v10410_v46 = vld [vmem:[#allocation5 + $0x594] sm:$0xf0] }
 0x287   :  { %v7745_v40 = vor.u32 %v10410_v46, %v7744_v17  ;;  %v10366_v17 = vld [vmem:[#allocation5 + $0x434] sm:$0xf0]  ;;  %v7696_v20 = vld [vmem:[#allocation5 + $0x528] sm:$0xf] }
 0x288   :  { %6032 = vmatpush.bf16.msra.mxu2 %v7297_v12  ;;  %6045 = vmatpush.bf16.msra.mxu3 %v7425_v51  ;;  %v8000_v12 = vld [vmem:[#allocation5 + $0x788] sm:$0xf]  ;;  %v10474_v51 = vld [vmem:[#allocation5 + $0x794] sm:$0xf0] }
 0x289   :  { %v8001_v45 = vor.u32 %v10474_v51, %v8000_v12  ;;  %v7840_v49 = vld [vmem:[#allocation5 + $0x648] sm:$0xf]  ;;  %v10434_v33 = vld [vmem:[#allocation5 + $0x654] sm:$0xf0] }
 0x28a   :  { %6052 = vmatpush.bf16.msrb.mxu0 %v7649_v4  ;;  %6065 = vmatpush.bf16.msrb.mxu1 %v7777_v7  ;;  %v7872_v4 = vld [vmem:[#allocation5 + $0x688] sm:$0xf]  ;;  %v10442_v7 = vld [vmem:[#allocation5 + $0x694] sm:$0xf0]  ;;  %v5802_v8 = vpop.f32.mrf.mxu0  ;;  %v5815_v27 = vpop.f32.mrf.mxu1 }
 0x28b   :  { %6033 = vmatmul.bf16.vlgmr.msra.gmra.mxu2 %v11355_v31  ;;  %6046 = vmatmul.bf16.vlgmr.msra.gmra.mxu3 %v11357_v32  ;;  %v7680_v14 = vld [vmem:[#allocation5 + $0x508] sm:$0xf]  ;;  %v10394_v51 = vld [vmem:[#allocation5 + $0x514] sm:$0xf0] }
 0x28c   :  { %6077 = vmatpush.bf16.msrb.mxu2 %v7921_v16  ;;  %6090 = vmatpush.bf16.msrb.mxu3 %v8049_v19  ;;  %v10370_v16 = vld [vmem:[#allocation5 + $0x454] sm:$0xf0]  ;;  %v7873_v19 = vor.u32 %v10442_v7, %v7872_v4  ;;  %v7841_v7 = vor.u32 %v10434_v33, %v7840_v49  ;;  %v8560_v33 = vld [vmem:[#allocation5 + $0xbe8] sm:$0xf] }
 0x28d   :  { %v7585_v39 = vor.u32 %v10370_v16, %v7584_v15  ;;  %v8304_v15 = vld [vmem:[#allocation5 + $0x9e8] sm:$0xf]  ;;  %v10550_v16 = vld [vmem:[#allocation5 + $0x9f4] sm:$0xf0] }
 0x28e   :  { %6053 = vmatpush.bf16.msrb.mxu0 %v7633_v35  ;;  %6066 = vmatpush.bf16.msrb.mxu1 %v7761_v52  ;;  %v10438_v35 = vld [vmem:[#allocation5 + $0x674] sm:$0xf0]  ;;  %v7984_v52 = vld [vmem:[#allocation5 + $0x768] sm:$0xf]  ;;  %v5826_v58 = vpop.f32.mrf.mxu2  ;;  %v5839_v50 = vpop.f32.mrf.mxu3  ;;  %v8305_v27 = vor.u32 %v10550_v16, %v8304_v15 }
 0x28f   :  { %v7857_v46 = vor.u32 %v10438_v35, %v7856_v26  ;;  %v7985_v47 = vor.u32 %v10470_v36, %v7984_v52  ;;  %v5827_v57 = vadd.f32 %v5826_v58, %v5814_v60  ;;  %v10430_v60 = vld [vmem:[#allocation5 + $0x634] sm:$0xf0]  ;;  %v7681_v26 = vor.u32 %v10394_v51, %v7680_v14  ;;  %v8160_v35 = vld [vmem:[#allocation5 + $0x8c8] sm:$0xf] }
 0x290   :  { %6078 = vmatpush.bf16.msrb.mxu2 %v7905_v42  ;;  %6091 = vmatpush.bf16.msrb.mxu3 %v8033_v43  ;;  %v7713_v42 = vor.u32 %v10402_v28, %v7712_v21  ;;  %v7568_v43 = vld [vmem:[#allocation5 + $0x428] sm:$0xf]  ;;  %v10462_v21 = vld [vmem:[#allocation5 + $0x734] sm:$0xf0] }
 0x291   :  { %v7569_v55 = vor.u32 %v10366_v17, %v7568_v43  ;;  %v11466_v4 = vadd.f32 %v5839_v50, %v5827_v57  ;;  %v10514_v52 = vld [vmem:[#allocation5 + $0x8d4] sm:$0xf0]  ;;  %v8288_v36 = vld [vmem:[#allocation5 + $0x9c8] sm:$0xf] }
 0x292   :  { %6054 = vmatpush.bf16.msrb.mxu0 %v7617_v53  ;;  %6067 = vmatpush.bf16.msrb.mxu1 %v7745_v40  ;;  %v7968_v53 = vld [vmem:[#allocation5 + $0x748] sm:$0xf]  ;;  %v10466_v40 = vld [vmem:[#allocation5 + $0x754] sm:$0xf0] }
 0x293   :  { %v7969_v12 = vor.u32 %v10466_v40, %v7968_v53  ;;  %v10458_v49 = vld [vmem:[#allocation5 + $0x714] sm:$0xf0]  ;;  %v8432_v58 = vld [vmem:[#allocation5 + $0xae8] sm:$0xf]  ;;  %v8161_v40 = vor.u32 %v10514_v52, %v8160_v35 }
 0x294   :  { %6079 = vmatpush.bf16.msrb.mxu2 %v7889_v61  ;;  %6092 = vmatpush.bf16.msrb.mxu3 %v8017_v62  ;;  %v7697_v61 = vor.u32 %v10398_v48, %v7696_v20  ;;  %v7552_v62 = vld [vmem:[#allocation5 + $0x408] sm:$0xf]  ;;  %v10426_v20 = vld [vmem:[#allocation5 + $0x614] sm:$0xf0] }
 0x295   :  { %v7553_v28 = vor.u32 %v10362_v2, %v7552_v62  ;;  %v7936_v48 = vld [vmem:[#allocation5 + $0x708] sm:$0xf]  ;;  %v10582_v50 = vld [vmem:[#allocation5 + $0xaf4] sm:$0xf0] }
 0x296   :  { %6055 = vmatpush.bf16.msrb.mxu0 %v7601_v18  ;;  %6068 = vmatpush.bf16.msrb.mxu1 %v7729_v13  ;;  %v8176_v18 = vld [vmem:[#allocation5 + $0x8e8] sm:$0xf]  ;;  %v10518_v13 = vld [vmem:[#allocation5 + $0x8f4] sm:$0xf0]  ;;  %v5828_v43 = vpop.f32.mrf.mxu2  ;;  %v5841_v17 = vpop.f32.mrf.mxu3  ;;  %v8433_v14 = vor.u32 %v10582_v50, %v8432_v58 }
 0x297   :  { %v8177_v8 = vor.u32 %v10518_v13, %v8176_v18  ;;  %v10614_v53 = vld [vmem:[#allocation5 + $0xbf4] sm:$0xf0]  ;;  %v8144_v62 = vld [vmem:[#allocation5 + $0x8a8] sm:$0xf] }
 0x298   :  { %6080 = vmatpush.bf16.msrb.mxu2 %v7873_v19  ;;  %6093 = vmatpush.bf16.msrb.mxu3 %v8001_v45  ;;  %v7824_v19 = vld [vmem:[#allocation5 + $0x628] sm:$0xf]  ;;  %v10510_v2 = vld [vmem:[#allocation5 + $0x8b4] sm:$0xf0] }
 0x299   :  { %v7952_v45 = vld [vmem:[#allocation5 + $0x728] sm:$0xf]  ;;  %v10542_v51 = vld [vmem:[#allocation5 + $0x9b4] sm:$0xf0] }
 0x29a   :  { %6056 = vmatpush.bf16.msrb.mxu0 %v7585_v39  ;;  %6069 = vmatpush.bf16.msrb.mxu1 %v7713_v42  ;;  %v7825_v39 = vor.u32 %v10430_v60, %v7824_v19  ;;  %v7953_v42 = vor.u32 %v10462_v21, %v7952_v45  ;;  %v8416_v18 = vld [vmem:[#allocation5 + $0xac8] sm:$0xf]  ;;  %v10578_v13 = vld [vmem:[#allocation5 + $0xad4] sm:$0xf0]  ;;  %v8145_v19 = vor.u32 %v10510_v2, %v8144_v62 }
 0x29b   :  { %v8544_v15 = vld [vmem:[#allocation5 + $0xbc8] sm:$0xf]  ;;  %v10610_v16 = vld [vmem:[#allocation5 + $0xbd4] sm:$0xf0] }
 0x29c   :  { %6081 = vmatpush.bf16.msrb.mxu2 %v7857_v46  ;;  %6094 = vmatpush.bf16.msrb.mxu3 %v7985_v47  ;;  %v10546_v46 = vld [vmem:[#allocation5 + $0x9d4] sm:$0xf0]  ;;  %v7808_v47 = vld [vmem:[#allocation5 + $0x608] sm:$0xf] }
 0x29d   :  { %v8289_v57 = vor.u32 %v10546_v46, %v8288_v36  ;;  %v8128_v45 = vld [vmem:[#allocation5 + $0x888] sm:$0xf]  ;;  %v10506_v21 = vld [vmem:[#allocation5 + $0x894] sm:$0xf0] }
 0x29e   :  { %6057 = vmatpush.bf16.msrb.mxu0 %v7569_v55  ;;  %6070 = vmatpush.bf16.msrb.mxu1 %v7697_v61  ;;  %v7809_v55 = vor.u32 %v10426_v20, %v7808_v47  ;;  %v7937_v61 = vor.u32 %v10458_v49, %v7936_v48  ;;  %v8400_v35 = vld [vmem:[#allocation5 + $0xaa8] sm:$0xf]  ;;  %v10606_v43 = vld [vmem:[#allocation5 + $0xbb4] sm:$0xf0]  ;;  %v8129_v46 = vor.u32 %v10506_v21, %v8128_v45 }
 0x29f   :  { %v8112_v20 = vld [vmem:[#allocation5 + $0x868] sm:$0xf]  ;;  %v10502_v48 = vld [vmem:[#allocation5 + $0x874] sm:$0xf0] }
 0x2a0   :  { %6082 = vmatpush.bf16.msrb.mxu2 %v7841_v7  ;;  %6095 = vmatpush.bf16.msrb.mxu3 %v7969_v12  ;;  %v8561_v7 = vor.u32 %v10614_v53, %v8560_v33  ;;  %v8272_v12 = vld [vmem:[#allocation5 + $0x9a8] sm:$0xf]  ;;  %v10534_v53 = vld [vmem:[#allocation5 + $0x974] sm:$0xf0] }
 0x2a1   :  { %v8273_v60 = vor.u32 %v10542_v51, %v8272_v12  ;;  %v8240_v33 = vld [vmem:[#allocation5 + $0x968] sm:$0xf]  ;;  %v10598_v45 = vld [vmem:[#allocation5 + $0xb74] sm:$0xf0] }
 0x2a2   :  { %6058 = vmatpush.bf16.msrb.mxu0 %v7553_v28  ;;  %6071 = vmatpush.bf16.msrb.mxu1 %v7681_v26  ;;  %v8417_v28 = vor.u32 %v10578_v13, %v8416_v18  ;;  %v8545_v26 = vor.u32 %v10610_v16, %v8544_v15  ;;  %v5852_v52 = vpop.f32.mrf.mxu0  ;;  %v5865_v36 = vpop.f32.mrf.mxu1  ;;  %v8241_v62 = vor.u32 %v10534_v53, %v8240_v33  ;;  %v8096_v2 = vld [vmem:[#allocation5 + $0x848] sm:$0xf]  ;;  %v10530_v18 = vld [vmem:[#allocation5 + $0x954] sm:$0xf0] }
 0x2a3   :  { %v5853_v17 = vadd.f32 %v5852_v52, %v11466_v4  ;;  %v8113_v4 = vor.u32 %v10502_v48, %v8112_v20  ;;  %v8224_v51 = vld [vmem:[#allocation5 + $0x948] sm:$0xf]  ;;  %v10490_v33 = vld [vmem:[#allocation5 + $0x814] sm:$0xf0] }
 0x2a4   :  { %6083 = vmatpush.bf16.msrb.mxu2 %v7825_v39  ;;  %6096 = vmatpush.bf16.msrb.mxu3 %v7953_v42  ;;  %v10574_v39 = vld [vmem:[#allocation5 + $0xab4] sm:$0xf0]  ;;  %v8528_v42 = vld [vmem:[#allocation5 + $0xba8] sm:$0xf] }
 0x2a5   :  { %6059 = vmatmul.bf16.vlgmr.msrb.gmra.mxu0 %v11361_v63  ;;  %6072 = vmatmul.bf16.vlgmr.msrb.gmra.mxu1 %v11363_v0  ;;  %v5866_v49 = vadd.f32 %v5865_v36, %v5853_v17  ;;  %v8401_v58 = vor.u32 %v10574_v39, %v8400_v35  ;;  %v8529_v50 = vor.u32 %v10606_v43, %v8528_v42  ;;  %v8368_v13 = vld [vmem:[#allocation5 + $0xa68] sm:$0xf]  ;;  %v10526_v36 = vld [vmem:[#allocation5 + $0x934] sm:$0xf0] }
 0x2a6   :  { %6103 = vmatpush.bf16.msra.mxu0 %v8177_v8  ;;  %6116 = vmatpush.bf16.msra.mxu1 %v8305_v27  ;;  %v8256_v8 = vld [vmem:[#allocation5 + $0x988] sm:$0xf]  ;;  %v10538_v27 = vld [vmem:[#allocation5 + $0x994] sm:$0xf0] }
 0x2a7   :  { %v8257_v47 = vor.u32 %v10538_v27, %v8256_v8  ;;  %v10494_v8 = vld [vmem:[#allocation5 + $0x834] sm:$0xf0]  ;;  %v8208_v52 = vld [vmem:[#allocation5 + $0x928] sm:$0xf] }
 0x2a8   :  { %6084 = vmatpush.bf16.msrb.mxu2 %v7809_v55  ;;  %6097 = vmatpush.bf16.msrb.mxu3 %v7937_v61  ;;  %v8512_v55 = vld [vmem:[#allocation5 + $0xb88] sm:$0xf]  ;;  %v10602_v61 = vld [vmem:[#allocation5 + $0xb94] sm:$0xf0] }
 0x2a9   :  { %v8513_v12 = vor.u32 %v10602_v61, %v8512_v55  ;;  %v8352_v39 = vld [vmem:[#allocation5 + $0xa48] sm:$0xf]  ;;  %v10562_v17 = vld [vmem:[#allocation5 + $0xa54] sm:$0xf0] }
 0x2aa   :  { %6104 = vmatpush.bf16.msra.mxu0 %v8161_v40  ;;  %6117 = vmatpush.bf16.msra.mxu1 %v8289_v57  ;;  %v8384_v40 = vld [vmem:[#allocation5 + $0xa88] sm:$0xf]  ;;  %v10570_v57 = vld [vmem:[#allocation5 + $0xa94] sm:$0xf0]  ;;  %v5854_v15 = vpop.f32.mrf.mxu0  ;;  %v5867_v16 = vpop.f32.mrf.mxu1 }
 0x2ab   :  { %6085 = vmatmul.bf16.vlgmr.msrb.gmra.mxu2 %v11367_v23  ;;  %6098 = vmatmul.bf16.vlgmr.msrb.gmra.mxu3 %v11369_v24  ;;  %v8192_v53 = vld [vmem:[#allocation5 + $0x908] sm:$0xf]  ;;  %v10522_v61 = vld [vmem:[#allocation5 + $0x914] sm:$0xf0] }
 0x2ac   :  { %6129 = vmatpush.bf16.msra.mxu2 %v8433_v14  ;;  %6142 = vmatpush.bf16.msra.mxu3 %v8561_v7  ;;  %v10498_v14 = vld [vmem:[#allocation5 + $0x854] sm:$0xf0]  ;;  %v8385_v7 = vor.u32 %v10570_v57, %v8384_v40  ;;  %v8353_v57 = vor.u32 %v10562_v17, %v8352_v39  ;;  %v9072_v17 = vld [vmem:[#allocation5 + $0xfe8] sm:$0xf] }
 0x2ad   :  { %v8097_v21 = vor.u32 %v10498_v14, %v8096_v2  ;;  %v8816_v2 = vld [vmem:[#allocation5 + $0xde8] sm:$0xf]  ;;  %v10678_v14 = vld [vmem:[#allocation5 + $0xdf4] sm:$0xf0] }
 0x2ae   :  { %6105 = vmatpush.bf16.msra.mxu0 %v8145_v19  ;;  %6118 = vmatpush.bf16.msra.mxu1 %v8273_v60  ;;  %v10566_v19 = vld [vmem:[#allocation5 + $0xa74] sm:$0xf0]  ;;  %v8496_v60 = vld [vmem:[#allocation5 + $0xb68] sm:$0xf]  ;;  %v5878_v42 = vpop.f32.mrf.mxu2  ;;  %v5891_v43 = vpop.f32.mrf.mxu3  ;;  %v8817_v16 = vor.u32 %v10678_v14, %v8816_v2 }
 0x2af   :  { %v8369_v27 = vor.u32 %v10566_v19, %v8368_v13  ;;  %v8497_v35 = vor.u32 %v10598_v45, %v8496_v60  ;;  %v5879_v20 = vadd.f32 %v5878_v42, %v5866_v49  ;;  %v10558_v49 = vld [vmem:[#allocation5 + $0xa34] sm:$0xf0]  ;;  %v8193_v13 = vor.u32 %v10522_v61, %v8192_v53  ;;  %v8672_v19 = vld [vmem:[#allocation5 + $0xcc8] sm:$0xf] }
 0x2b0   :  { %6130 = vmatpush.bf16.msra.mxu2 %v8417_v28  ;;  %6143 = vmatpush.bf16.msra.mxu3 %v8545_v26  ;;  %v8225_v28 = vor.u32 %v10530_v18, %v8224_v51  ;;  %v8080_v26 = vld [vmem:[#allocation5 + $0x828] sm:$0xf]  ;;  %v10590_v51 = vld [vmem:[#allocation5 + $0xb34] sm:$0xf0] }
 0x2b1   :  { %v8081_v48 = vor.u32 %v10494_v8, %v8080_v26  ;;  %v11473_v40 = vadd.f32 %v5891_v43, %v5879_v20  ;;  %v10642_v60 = vld [vmem:[#allocation5 + $0xcd4] sm:$0xf0]  ;;  %v8800_v45 = vld [vmem:[#allocation5 + $0xdc8] sm:$0xf] }
 0x2b2   :  { %6106 = vmatpush.bf16.msra.mxu0 %v8129_v46  ;;  %6119 = vmatpush.bf16.msra.mxu1 %v8257_v47  ;;  %v8480_v46 = vld [vmem:[#allocation5 + $0xb48] sm:$0xf]  ;;  %v10594_v47 = vld [vmem:[#allocation5 + $0xb54] sm:$0xf0] }
 0x2b3   :  { %v8481_v55 = vor.u32 %v10594_v47, %v8480_v46  ;;  %v10586_v39 = vld [vmem:[#allocation5 + $0xb14] sm:$0xf0]  ;;  %v8944_v42 = vld [vmem:[#allocation5 + $0xee8] sm:$0xf]  ;;  %v8673_v47 = vor.u32 %v10642_v60, %v8672_v19 }
 0x2b4   :  { %6131 = vmatpush.bf16.msra.mxu2 %v8401_v58  ;;  %6144 = vmatpush.bf16.msra.mxu3 %v8529_v50  ;;  %v8209_v58 = vor.u32 %v10526_v36, %v8208_v52  ;;  %v8064_v50 = vld [vmem:[#allocation5 + $0x808] sm:$0xf]  ;;  %v10554_v52 = vld [vmem:[#allocation5 + $0xa14] sm:$0xf0] }
 0x2b5   :  { %v8065_v18 = vor.u32 %v10490_v33, %v8064_v50  ;;  %v8448_v36 = vld [vmem:[#allocation5 + $0xb08] sm:$0xf]  ;;  %v10710_v43 = vld [vmem:[#allocation5 + $0xef4] sm:$0xf0] }
 0x2b6   :  { %6107 = vmatpush.bf16.msra.mxu0 %v8113_v4  ;;  %6120 = vmatpush.bf16.msra.mxu1 %v8241_v62  ;;  %v8688_v4 = vld [vmem:[#allocation5 + $0xce8] sm:$0xf]  ;;  %v10646_v62 = vld [vmem:[#allocation5 + $0xcf4] sm:$0xf0]  ;;  %v5880_v26 = vpop.f32.mrf.mxu2  ;;  %v5893_v8 = vpop.f32.mrf.mxu3  ;;  %v8945_v53 = vor.u32 %v10710_v43, %v8944_v42 }
 0x2b7   :  { %v8689_v15 = vor.u32 %v10646_v62, %v8688_v4  ;;  %v10742_v46 = vld [vmem:[#allocation5 + $0xff4] sm:$0xf0]  ;;  %v8656_v50 = vld [vmem:[#allocation5 + $0xca8] sm:$0xf] }
 0x2b8   :  { %6132 = vmatpush.bf16.msra.mxu2 %v8385_v7  ;;  %6145 = vmatpush.bf16.msra.mxu3 %v8513_v12  ;;  %v8336_v7 = vld [vmem:[#allocation5 + $0xa28] sm:$0xf]  ;;  %v10638_v33 = vld [vmem:[#allocation5 + $0xcb4] sm:$0xf0] }
 0x2b9   :  { %v8464_v12 = vld [vmem:[#allocation5 + $0xb28] sm:$0xf]  ;;  %v10670_v61 = vld [vmem:[#allocation5 + $0xdb4] sm:$0xf0] }
 0x2ba   :  { %6108 = vmatpush.bf16.msra.mxu0 %v8097_v21  ;;  %6121 = vmatpush.bf16.msra.mxu1 %v8225_v28  ;;  %v8337_v21 = vor.u32 %v10558_v49, %v8336_v7  ;;  %v8465_v28 = vor.u32 %v10590_v51, %v8464_v12  ;;  %v8928_v4 = vld [vmem:[#allocation5 + $0xec8] sm:$0xf]  ;;  %v10706_v62 = vld [vmem:[#allocation5 + $0xed4] sm:$0xf0]  ;;  %v8657_v7 = vor.u32 %v10638_v33, %v8656_v50 }
 0x2bb   :  { %v9056_v2 = vld [vmem:[#allocation5 + $0xfc8] sm:$0xf]  ;;  %v10738_v14 = vld [vmem:[#allocation5 + $0xfd4] sm:$0xf0] }
 0x2bc   :  { %6133 = vmatpush.bf16.msra.mxu2 %v8369_v27  ;;  %6146 = vmatpush.bf16.msra.mxu3 %v8497_v35  ;;  %v10674_v27 = vld [vmem:[#allocation5 + $0xdd4] sm:$0xf0]  ;;  %v8320_v35 = vld [vmem:[#allocation5 + $0xa08] sm:$0xf] }
 0x2bd   :  { %v8801_v20 = vor.u32 %v10674_v27, %v8800_v45  ;;  %v8640_v12 = vld [vmem:[#allocation5 + $0xc88] sm:$0xf]  ;;  %v10634_v51 = vld [vmem:[#allocation5 + $0xc94] sm:$0xf0] }
 0x2be   :  { %6109 = vmatpush.bf16.msra.mxu0 %v8081_v48  ;;  %6122 = vmatpush.bf16.msra.mxu1 %v8209_v58  ;;  %v8321_v48 = vor.u32 %v10554_v52, %v8320_v35  ;;  %v8449_v58 = vor.u32 %v10586_v39, %v8448_v36  ;;  %v8912_v19 = vld [vmem:[#allocation5 + $0xea8] sm:$0xf]  ;;  %v10734_v26 = vld [vmem:[#allocation5 + $0xfb4] sm:$0xf0]  ;;  %v8641_v27 = vor.u32 %v10634_v51, %v8640_v12 }
 0x2bf   :  { %v8624_v52 = vld [vmem:[#allocation5 + $0xc68] sm:$0xf]  ;;  %v10630_v36 = vld [vmem:[#allocation5 + $0xc74] sm:$0xf0] }
 0x2c0   :  { %6134 = vmatpush.bf16.msra.mxu2 %v8353_v57  ;;  %6147 = vmatpush.bf16.msra.mxu3 %v8481_v55  ;;  %v9073_v57 = vor.u32 %v10742_v46, %v9072_v17  ;;  %v8784_v55 = vld [vmem:[#allocation5 + $0xda8] sm:$0xf]  ;;  %v10662_v46 = vld [vmem:[#allocation5 + $0xd74] sm:$0xf0] }
 0x2c1   :  { %v8785_v49 = vor.u32 %v10670_v61, %v8784_v55  ;;  %v8752_v17 = vld [vmem:[#allocation5 + $0xd68] sm:$0xf]  ;;  %v10726_v12 = vld [vmem:[#allocation5 + $0xf74] sm:$0xf0] }
 0x2c2   :  { %6110 = vmatpush.bf16.msra.mxu0 %v8065_v18  ;;  %6123 = vmatpush.bf16.msra.mxu1 %v8193_v13  ;;  %v8929_v18 = vor.u32 %v10706_v62, %v8928_v4  ;;  %v9057_v13 = vor.u32 %v10738_v14, %v9056_v2  ;;  %v5904_v60 = vpop.f32.mrf.mxu0  ;;  %v5917_v45 = vpop.f32.mrf.mxu1  ;;  %v8753_v50 = vor.u32 %v10662_v46, %v8752_v17  ;;  %v8608_v33 = vld [vmem:[#allocation5 + $0xc48] sm:$0xf]  ;;  %v10658_v4 = vld [vmem:[#allocation5 + $0xd54] sm:$0xf0] }
 0x2c3   :  { %v5905_v8 = vadd.f32 %v5904_v60, %v11473_v40  ;;  %v8625_v40 = vor.u32 %v10630_v36, %v8624_v52  ;;  %v8736_v61 = vld [vmem:[#allocation5 + $0xd48] sm:$0xf]  ;;  %v10618_v17 = vld [vmem:[#allocation5 + $0xc14] sm:$0xf0] }
 0x2c4   :  { %6135 = vmatpush.bf16.msra.mxu2 %v8337_v21  ;;  %6148 = vmatpush.bf16.msra.mxu3 %v8465_v28  ;;  %v10702_v21 = vld [vmem:[#allocation5 + $0xeb4] sm:$0xf0]  ;;  %v9040_v28 = vld [vmem:[#allocation5 + $0xfa8] sm:$0xf] }
 0x2c5   :  { %6111 = vmatmul.bf16.vlgmr.msra.gmra.mxu0 %v11373_v5  ;;  %6124 = vmatmul.bf16.vlgmr.msra.gmra.mxu1 %v11375_v6  ;;  %v5918_v39 = vadd.f32 %v5917_v45, %v5905_v8  ;;  %v8913_v42 = vor.u32 %v10702_v21, %v8912_v19  ;;  %v9041_v43 = vor.u32 %v10734_v26, %v9040_v28  ;;  %v8880_v62 = vld [vmem:[#allocation5 + $0xe68] sm:$0xf]  ;;  %v10654_v45 = vld [vmem:[#allocation5 + $0xd34] sm:$0xf0] }
 0x2c6   :  { %6155 = vmatpush.bf16.msrb.mxu0 %v8689_v15  ;;  %6168 = vmatpush.bf16.msrb.mxu1 %v8817_v16  ;;  %v8768_v15 = vld [vmem:[#allocation5 + $0xd88] sm:$0xf]  ;;  %v10666_v16 = vld [vmem:[#allocation5 + $0xd94] sm:$0xf0] }
 0x2c7   :  { %v8769_v35 = vor.u32 %v10666_v16, %v8768_v15  ;;  %v10622_v15 = vld [vmem:[#allocation5 + $0xc34] sm:$0xf0]  ;;  %v8720_v60 = vld [vmem:[#allocation5 + $0xd28] sm:$0xf] }
 0x2c8   :  { %6136 = vmatpush.bf16.msra.mxu2 %v8321_v48  ;;  %6149 = vmatpush.bf16.msra.mxu3 %v8449_v58  ;;  %v9024_v48 = vld [vmem:[#allocation5 + $0xf88] sm:$0xf]  ;;  %v10730_v58 = vld [vmem:[#allocation5 + $0xf94] sm:$0xf0] }
 0x2c9   :  { %v9025_v55 = vor.u32 %v10730_v58, %v9024_v48  ;;  %v8864_v21 = vld [vmem:[#allocation5 + $0xe48] sm:$0xf]  ;;  %v10690_v8 = vld [vmem:[#allocation5 + $0xe54] sm:$0xf0] }
 0x2ca   :  { %6156 = vmatpush.bf16.msrb.mxu0 %v8673_v47  ;;  %6169 = vmatpush.bf16.msrb.mxu1 %v8801_v20  ;;  %v8896_v47 = vld [vmem:[#allocation5 + $0xe88] sm:$0xf]  ;;  %v10698_v20 = vld [vmem:[#allocation5 + $0xe94] sm:$0xf0]  ;;  %v5906_v2 = vpop.f32.mrf.mxu0  ;;  %v5919_v14 = vpop.f32.mrf.mxu1 }
 0x2cb   :  { %6137 = vmatmul.bf16.vlgmr.msra.gmra.mxu2 %v11379_v37  ;;  %6150 = vmatmul.bf16.vlgmr.msra.gmra.mxu3 %v11381_v38  ;;  %v8704_v46 = vld [vmem:[#allocation5 + $0xd08] sm:$0xf]  ;;  %v10650_v58 = vld [vmem:[#allocation5 + $0xd14] sm:$0xf0] }
 0x2cc   :  { %6181 = vmatpush.bf16.msrb.mxu2 %v8945_v53  ;;  %6194 = vmatpush.bf16.msrb.mxu3 %v9073_v57  ;;  %v10626_v53 = vld [vmem:[#allocation5 + $0xc54] sm:$0xf0]  ;;  %v8897_v57 = vor.u32 %v10698_v20, %v8896_v47  ;;  %v8865_v20 = vor.u32 %v10690_v8, %v8864_v21  ;;  %v9584_v8 = vld [vmem:[#allocation5 + $0x13e8] sm:$0xf] }
 0x2cd   :  { %v8609_v51 = vor.u32 %v10626_v53, %v8608_v33  ;;  %v9328_v33 = vld [vmem:[#allocation5 + $0x11e8] sm:$0xf]  ;;  %v10806_v53 = vld [vmem:[#allocation5 + $0x11f4] sm:$0xf0] }
 0x2ce   :  { %6157 = vmatpush.bf16.msrb.mxu0 %v8657_v7  ;;  %6170 = vmatpush.bf16.msrb.mxu1 %v8785_v49  ;;  %v10694_v7 = vld [vmem:[#allocation5 + $0xe74] sm:$0xf0]  ;;  %v9008_v49 = vld [vmem:[#allocation5 + $0xf68] sm:$0xf]  ;;  %v5930_v28 = vpop.f32.mrf.mxu2  ;;  %v5943_v26 = vpop.f32.mrf.mxu3  ;;  %v9329_v14 = vor.u32 %v10806_v53, %v9328_v33 }
 0x2cf   :  { %v8881_v16 = vor.u32 %v10694_v7, %v8880_v62  ;;  %v9009_v19 = vor.u32 %v10726_v12, %v9008_v49  ;;  %v5931_v52 = vadd.f32 %v5930_v28, %v5918_v39  ;;  %v10686_v39 = vld [vmem:[#allocation5 + $0xe34] sm:$0xf0]  ;;  %v8705_v62 = vor.u32 %v10650_v58, %v8704_v46  ;;  %v9184_v7 = vld [vmem:[#allocation5 + $0x10c8] sm:$0xf] }
 0x2d0   :  { %6182 = vmatpush.bf16.msrb.mxu2 %v8929_v18  ;;  %6195 = vmatpush.bf16.msrb.mxu3 %v9057_v13  ;;  %v8737_v18 = vor.u32 %v10658_v4, %v8736_v61  ;;  %v8592_v13 = vld [vmem:[#allocation5 + $0xc28] sm:$0xf]  ;;  %v10718_v61 = vld [vmem:[#allocation5 + $0xf34] sm:$0xf0] }
 0x2d1   :  { %v8593_v36 = vor.u32 %v10622_v15, %v8592_v13  ;;  %v11480_v47 = vadd.f32 %v5943_v26, %v5931_v52  ;;  %v10770_v49 = vld [vmem:[#allocation5 + $0x10d4] sm:$0xf0]  ;;  %v9312_v12 = vld [vmem:[#allocation5 + $0x11c8] sm:$0xf] }
 0x2d2   :  { %6158 = vmatpush.bf16.msrb.mxu0 %v8641_v27  ;;  %6171 = vmatpush.bf16.msrb.mxu1 %v8769_v35  ;;  %v8992_v27 = vld [vmem:[#allocation5 + $0xf48] sm:$0xf]  ;;  %v10722_v35 = vld [vmem:[#allocation5 + $0xf54] sm:$0xf0] }
 0x2d3   :  { %v8993_v48 = vor.u32 %v10722_v35, %v8992_v27  ;;  %v10714_v21 = vld [vmem:[#allocation5 + $0xf14] sm:$0xf0]  ;;  %v9456_v28 = vld [vmem:[#allocation5 + $0x12e8] sm:$0xf]  ;;  %v9185_v35 = vor.u32 %v10770_v49, %v9184_v7 }
 0x2d4   :  { %6183 = vmatpush.bf16.msrb.mxu2 %v8913_v42  ;;  %6196 = vmatpush.bf16.msrb.mxu3 %v9041_v43  ;;  %v8721_v42 = vor.u32 %v10654_v45, %v8720_v60  ;;  %v8576_v43 = vld [vmem:[#allocation5 + $0xc08] sm:$0xf]  ;;  %v10682_v60 = vld [vmem:[#allocation5 + $0xe14] sm:$0xf0] }
 0x2d5   :  { %v8577_v4 = vor.u32 %v10618_v17, %v8576_v43  ;;  %v8960_v45 = vld [vmem:[#allocation5 + $0xf08] sm:$0xf]  ;;  %v10838_v26 = vld [vmem:[#allocation5 + $0x12f4] sm:$0xf0] }
 0x2d6   :  { %6159 = vmatpush.bf16.msrb.mxu0 %v8625_v40  ;;  %6172 = vmatpush.bf16.msrb.mxu1 %v8753_v50  ;;  %v9200_v40 = vld [vmem:[#allocation5 + $0x10e8] sm:$0xf]  ;;  %v10774_v50 = vld [vmem:[#allocation5 + $0x10f4] sm:$0xf0]  ;;  %v5932_v13 = vpop.f32.mrf.mxu2  ;;  %v5945_v15 = vpop.f32.mrf.mxu3  ;;  %v9457_v46 = vor.u32 %v10838_v26, %v9456_v28 }
 0x2d7   :  { %v9201_v2 = vor.u32 %v10774_v50, %v9200_v40  ;;  %v10870_v27 = vld [vmem:[#allocation5 + $0x13f4] sm:$0xf0]  ;;  %v9168_v43 = vld [vmem:[#allocation5 + $0x10a8] sm:$0xf] }
 0x2d8   :  { %6184 = vmatpush.bf16.msrb.mxu2 %v8897_v57  ;;  %6197 = vmatpush.bf16.msrb.mxu3 %v9025_v55  ;;  %v8848_v57 = vld [vmem:[#allocation5 + $0xe28] sm:$0xf]  ;;  %v10766_v17 = vld [vmem:[#allocation5 + $0x10b4] sm:$0xf0] }
 0x2d9   :  { %v8976_v55 = vld [vmem:[#allocation5 + $0xf28] sm:$0xf]  ;;  %v10798_v58 = vld [vmem:[#allocation5 + $0x11b4] sm:$0xf0] }
 0x2da   :  { %6160 = vmatpush.bf16.msrb.mxu0 %v8609_v51  ;;  %6173 = vmatpush.bf16.msrb.mxu1 %v8737_v18  ;;  %v8849_v51 = vor.u32 %v10686_v39, %v8848_v57  ;;  %v8977_v18 = vor.u32 %v10718_v61, %v8976_v55  ;;  %v9440_v40 = vld [vmem:[#allocation5 + $0x12c8] sm:$0xf]  ;;  %v10834_v50 = vld [vmem:[#allocation5 + $0x12d4] sm:$0xf0]  ;;  %v9169_v57 = vor.u32 %v10766_v17, %v9168_v43 }
 0x2db   :  { %v9568_v33 = vld [vmem:[#allocation5 + $0x13c8] sm:$0xf]  ;;  %v10866_v53 = vld [vmem:[#allocation5 + $0x13d4] sm:$0xf0] }
 0x2dc   :  { %6185 = vmatpush.bf16.msrb.mxu2 %v8881_v16  ;;  %6198 = vmatpush.bf16.msrb.mxu3 %v9009_v19  ;;  %v10802_v16 = vld [vmem:[#allocation5 + $0x11d4] sm:$0xf0]  ;;  %v8832_v19 = vld [vmem:[#allocation5 + $0xe08] sm:$0xf] }
 0x2dd   :  { %v9313_v52 = vor.u32 %v10802_v16, %v9312_v12  ;;  %v9152_v55 = vld [vmem:[#allocation5 + $0x1088] sm:$0xf]  ;;  %v10762_v61 = vld [vmem:[#allocation5 + $0x1094] sm:$0xf0] }
 0x2de   :  { %6161 = vmatpush.bf16.msrb.mxu0 %v8593_v36  ;;  %6174 = vmatpush.bf16.msrb.mxu1 %v8721_v42  ;;  %v8833_v36 = vor.u32 %v10682_v60, %v8832_v19  ;;  %v8961_v42 = vor.u32 %v10714_v21, %v8960_v45  ;;  %v9424_v7 = vld [vmem:[#allocation5 + $0x12a8] sm:$0xf]  ;;  %v10862_v13 = vld [vmem:[#allocation5 + $0x13b4] sm:$0xf0]  ;;  %v9153_v16 = vor.u32 %v10762_v61, %v9152_v55 }
 0x2df   :  { %v9136_v60 = vld [vmem:[#allocation5 + $0x1068] sm:$0xf]  ;;  %v10758_v45 = vld [vmem:[#allocation5 + $0x1074] sm:$0xf0] }
 0x2e0   :  { %6186 = vmatpush.bf16.msrb.mxu2 %v8865_v20  ;;  %6199 = vmatpush.bf16.msrb.mxu3 %v8993_v48  ;;  %v9585_v20 = vor.u32 %v10870_v27, %v9584_v8  ;;  %v9296_v48 = vld [vmem:[#allocation5 + $0x11a8] sm:$0xf]  ;;  %v10790_v27 = vld [vmem:[#allocation5 + $0x1174] sm:$0xf0] }
 0x2e1   :  { %v9297_v39 = vor.u32 %v10798_v58, %v9296_v48  ;;  %v9264_v8 = vld [vmem:[#allocation5 + $0x1168] sm:$0xf]  ;;  %v10854_v55 = vld [vmem:[#allocation5 + $0x1374] sm:$0xf0] }
 0x2e2   :  { %6162 = vmatpush.bf16.msrb.mxu0 %v8577_v4  ;;  %6175 = vmatpush.bf16.msrb.mxu1 %v8705_v62  ;;  %v9441_v4 = vor.u32 %v10834_v50, %v9440_v40  ;;  %v9569_v62 = vor.u32 %v10866_v53, %v9568_v33  ;;  %v5956_v49 = vpop.f32.mrf.mxu0  ;;  %v5969_v12 = vpop.f32.mrf.mxu1  ;;  %v9265_v43 = vor.u32 %v10790_v27, %v9264_v8  ;;  %v9120_v17 = vld [vmem:[#allocation5 + $0x1048] sm:$0xf]  ;;  %v10786_v40 = vld [vmem:[#allocation5 + $0x1154] sm:$0xf0] }
 0x2e3   :  { %v5957_v15 = vadd.f32 %v5956_v49, %v11480_v47  ;;  %v9137_v47 = vor.u32 %v10758_v45, %v9136_v60  ;;  %v9248_v58 = vld [vmem:[#allocation5 + $0x1148] sm:$0xf]  ;;  %v10746_v8 = vld [vmem:[#allocation5 + $0x1014] sm:$0xf0] }
 0x2e4   :  { %6187 = vmatpush.bf16.msrb.mxu2 %v8849_v51  ;;  %6200 = vmatpush.bf16.msrb.mxu3 %v8977_v18  ;;  %v10830_v51 = vld [vmem:[#allocation5 + $0x12b4] sm:$0xf0]  ;;  %v9552_v18 = vld [vmem:[#allocation5 + $0x13a8] sm:$0xf] }
 0x2e5   :  { %6163 = vmatmul.bf16.vlgmr.msrb.gmra.mxu0 %v11385_v59  ;;  %6176 = vmatmul.bf16.vlgmr.msrb.gmra.mxu1 %v11387_v1  ;;  %v5970_v21 = vadd.f32 %v5969_v12, %v5957_v15  ;;  %v9425_v28 = vor.u32 %v10830_v51, %v9424_v7  ;;  %v9553_v26 = vor.u32 %v10862_v13, %v9552_v18  ;;  %v9392_v50 = vld [vmem:[#allocation5 + $0x1268] sm:$0xf]  ;;  %v10782_v12 = vld [vmem:[#allocation5 + $0x1134] sm:$0xf0] }
 0x2e6   :  { %6207 = vmatpush.bf16.msra.mxu0 %v9201_v2  ;;  %6220 = vmatpush.bf16.msra.mxu1 %v9329_v14  ;;  %v9280_v2 = vld [vmem:[#allocation5 + $0x1188] sm:$0xf]  ;;  %v10794_v14 = vld [vmem:[#allocation5 + $0x1194] sm:$0xf0] }
 0x2e7   :  { %v9281_v19 = vor.u32 %v10794_v14, %v9280_v2  ;;  %v10750_v2 = vld [vmem:[#allocation5 + $0x1034] sm:$0xf0]  ;;  %v9232_v49 = vld [vmem:[#allocation5 + $0x1128] sm:$0xf] }
 0x2e8   :  { %6188 = vmatpush.bf16.msrb.mxu2 %v8833_v36  ;;  %6201 = vmatpush.bf16.msrb.mxu3 %v8961_v42  ;;  %v9536_v36 = vld [vmem:[#allocation5 + $0x1388] sm:$0xf]  ;;  %v10858_v42 = vld [vmem:[#allocation5 + $0x1394] sm:$0xf0] }
 0x2e9   :  { %v9537_v48 = vor.u32 %v10858_v42, %v9536_v36  ;;  %v9376_v51 = vld [vmem:[#allocation5 + $0x1248] sm:$0xf]  ;;  %v10818_v15 = vld [vmem:[#allocation5 + $0x1254] sm:$0xf0] }
 0x2ea   :  { %6208 = vmatpush.bf16.msra.mxu0 %v9185_v35  ;;  %6221 = vmatpush.bf16.msra.mxu1 %v9313_v52  ;;  %v9408_v35 = vld [vmem:[#allocation5 + $0x1288] sm:$0xf]  ;;  %v10826_v52 = vld [vmem:[#allocation5 + $0x1294] sm:$0xf0]  ;;  %v5958_v33 = vpop.f32.mrf.mxu0  ;;  %v5971_v53 = vpop.f32.mrf.mxu1 }
 0x2eb   :  { %6189 = vmatmul.bf16.vlgmr.msrb.gmra.mxu2 %v11391_v22  ;;  %6202 = vmatmul.bf16.vlgmr.msrb.gmra.mxu3 %v11393_v29  ;;  %v9216_v27 = vld [vmem:[#allocation5 + $0x1108] sm:$0xf]  ;;  %v10778_v42 = vld [vmem:[#allocation5 + $0x1114] sm:$0xf0] }
 0x2ec   :  { %6233 = vmatpush.bf16.msra.mxu2 %v9457_v46  ;;  %6246 = vmatpush.bf16.msra.mxu3 %v9585_v20  ;;  %v10754_v46 = vld [vmem:[#allocation5 + $0x1054] sm:$0xf0]  ;;  %v9409_v20 = vor.u32 %v10826_v52, %v9408_v35  ;;  %v9377_v52 = vor.u32 %v10818_v15, %v9376_v51  ;;  %v10096_v15 = vld [vmem:[#allocation5 + $0x17e8] sm:$0xf] }
 0x2ed   :  { %v9121_v61 = vor.u32 %v10754_v46, %v9120_v17  ;;  %v9840_v17 = vld [vmem:[#allocation5 + $0x15e8] sm:$0xf]  ;;  %v10934_v46 = vld [vmem:[#allocation5 + $0x15f4] sm:$0xf0] }
 0x2ee   :  { %6209 = vmatpush.bf16.msra.mxu0 %v9169_v57  ;;  %6222 = vmatpush.bf16.msra.mxu1 %v9297_v39  ;;  %v10822_v57 = vld [vmem:[#allocation5 + $0x1274] sm:$0xf0]  ;;  %v9520_v39 = vld [vmem:[#allocation5 + $0x1368] sm:$0xf]  ;;  %v5982_v18 = vpop.f32.mrf.mxu2  ;;  %v5995_v13 = vpop.f32.mrf.mxu3  ;;  %v9841_v53 = vor.u32 %v10934_v46, %v9840_v17 }
 0x2ef   :  { %v9393_v14 = vor.u32 %v10822_v57, %v9392_v50  ;;  %v9521_v7 = vor.u32 %v10854_v55, %v9520_v39  ;;  %v5983_v60 = vadd.f32 %v5982_v18, %v5970_v21  ;;  %v10814_v21 = vld [vmem:[#allocation5 + $0x1234] sm:$0xf0]  ;;  %v9217_v50 = vor.u32 %v10778_v42, %v9216_v27  ;;  %v9696_v57 = vld [vmem:[#allocation5 + $0x14c8] sm:$0xf] }
 0x2f0   :  { %6234 = vmatpush.bf16.msra.mxu2 %v9441_v4  ;;  %6247 = vmatpush.bf16.msra.mxu3 %v9569_v62  ;;  %v9249_v4 = vor.u32 %v10786_v40, %v9248_v58  ;;  %v9104_v62 = vld [vmem:[#allocation5 + $0x1028] sm:$0xf]  ;;  %v10846_v58 = vld [vmem:[#allocation5 + $0x1334] sm:$0xf0] }
 0x2f1   :  { %v9105_v45 = vor.u32 %v10750_v2, %v9104_v62  ;;  %v11487_v35 = vadd.f32 %v5995_v13, %v5983_v60  ;;  %v10898_v39 = vld [vmem:[#allocation5 + $0x14d4] sm:$0xf0]  ;;  %v9824_v55 = vld [vmem:[#allocation5 + $0x15c8] sm:$0xf] }
 0x2f2   :  { %6210 = vmatpush.bf16.msra.mxu0 %v9153_v16  ;;  %6223 = vmatpush.bf16.msra.mxu1 %v9281_v19  ;;  %v9504_v16 = vld [vmem:[#allocation5 + $0x1348] sm:$0xf]  ;;  %v10850_v19 = vld [vmem:[#allocation5 + $0x1354] sm:$0xf0] }
 0x2f3   :  { %v9505_v36 = vor.u32 %v10850_v19, %v9504_v16  ;;  %v10842_v51 = vld [vmem:[#allocation5 + $0x1314] sm:$0xf0]  ;;  %v9968_v18 = vld [vmem:[#allocation5 + $0x16e8] sm:$0xf]  ;;  %v9697_v19 = vor.u32 %v10898_v39, %v9696_v57 }
 0x2f4   :  { %6235 = vmatpush.bf16.msra.mxu2 %v9425_v28  ;;  %6248 = vmatpush.bf16.msra.mxu3 %v9553_v26  ;;  %v9233_v28 = vor.u32 %v10782_v12, %v9232_v49  ;;  %v9088_v26 = vld [vmem:[#allocation5 + $0x1008] sm:$0xf]  ;;  %v10810_v49 = vld [vmem:[#allocation5 + $0x1214] sm:$0xf0] }
 0x2f5   :  { %v9089_v40 = vor.u32 %v10746_v8, %v9088_v26  ;;  %v9472_v12 = vld [vmem:[#allocation5 + $0x1308] sm:$0xf]  ;;  %v10966_v13 = vld [vmem:[#allocation5 + $0x16f4] sm:$0xf0] }
 0x2f6   :  { %6211 = vmatpush.bf16.msra.mxu0 %v9137_v47  ;;  %6224 = vmatpush.bf16.msra.mxu1 %v9265_v43  ;;  %v9712_v47 = vld [vmem:[#allocation5 + $0x14e8] sm:$0xf]  ;;  %v10902_v43 = vld [vmem:[#allocation5 + $0x14f4] sm:$0xf0]  ;;  %v5984_v62 = vpop.f32.mrf.mxu2  ;;  %v5997_v2 = vpop.f32.mrf.mxu3  ;;  %v9969_v27 = vor.u32 %v10966_v13, %v9968_v18 }
 0x2f7   :  { %v9713_v33 = vor.u32 %v10902_v43, %v9712_v47  ;;  %v10998_v16 = vld [vmem:[#allocation5 + $0x17f4] sm:$0xf0]  ;;  %v9680_v26 = vld [vmem:[#allocation5 + $0x14a8] sm:$0xf] }
 0x2f8   :  { %6236 = vmatpush.bf16.msra.mxu2 %v9409_v20  ;;  %6249 = vmatpush.bf16.msra.mxu3 %v9537_v48  ;;  %v9360_v20 = vld [vmem:[#allocation5 + $0x1228] sm:$0xf]  ;;  %v10894_v8 = vld [vmem:[#allocation5 + $0x14b4] sm:$0xf0] }
 0x2f9   :  { %v9488_v48 = vld [vmem:[#allocation5 + $0x1328] sm:$0xf]  ;;  %v10926_v42 = vld [vmem:[#allocation5 + $0x15b4] sm:$0xf0] }
 0x2fa   :  { %6212 = vmatpush.bf16.msra.mxu0 %v9121_v61  ;;  %6225 = vmatpush.bf16.msra.mxu1 %v9249_v4  ;;  %v9361_v61 = vor.u32 %v10814_v21, %v9360_v20  ;;  %v9489_v4 = vor.u32 %v10846_v58, %v9488_v48  ;;  %v9952_v47 = vld [vmem:[#allocation5 + $0x16c8] sm:$0xf]  ;;  %v10962_v43 = vld [vmem:[#allocation5 + $0x16d4] sm:$0xf0]  ;;  %v11050_v20 = vld [vmem:[#allocation7] sm:$0xf]  ;;  %v9681_v48 = vor.u32 %v10894_v8, %v9680_v26 }
 0x2fb   :  { %v10080_v17 = vld [vmem:[#allocation5 + $0x17c8] sm:$0xf]  ;;  %v10994_v46 = vld [vmem:[#allocation5 + $0x17d4] sm:$0xf0]  ;;  %v1529_v21 = vperm.slane %v11050_v20, 2 }
 0x2fc   :  { %6237 = vmatpush.bf16.msra.mxu2 %v9393_v14  ;;  %6250 = vmatpush.bf16.msra.mxu3 %v9521_v7  ;;  %v10930_v14 = vld [vmem:[#allocation5 + $0x15d4] sm:$0xf0]  ;;  %v9344_v7 = vld [vmem:[#allocation5 + $0x1208] sm:$0xf] }
 0x2fd   :  { %v9825_v60 = vor.u32 %v10930_v14, %v9824_v55  ;;  %v9792_v57 = vld [vmem:[#allocation5 + $0x1588] sm:$0xf]  ;;  %v10922_v39 = vld [vmem:[#allocation5 + $0x1594] sm:$0xf0] }
 0x2fe   :  { %6213 = vmatpush.bf16.msra.mxu0 %v9105_v45  ;;  %6226 = vmatpush.bf16.msra.mxu1 %v9233_v28  ;;  %v9345_v45 = vor.u32 %v10810_v49, %v9344_v7  ;;  %v9473_v28 = vor.u32 %v10842_v51, %v9472_v12  ;;  %v9936_v55 = vld [vmem:[#allocation5 + $0x16a8] sm:$0xf]  ;;  %v10958_v62 = vld [vmem:[#allocation5 + $0x16b4] sm:$0xf0]  ;;  %v9793_v12 = vor.u32 %v10922_v39, %v9792_v57 }
 0x2ff   :  { %v10064_v2 = vld [vmem:[#allocation5 + $0x17a8] sm:$0xf]  ;;  %v10990_v14 = vld [vmem:[#allocation5 + $0x17b4] sm:$0xf0] }
 0x300   :  { %6238 = vmatpush.bf16.msra.mxu2 %v9377_v52  ;;  %6251 = vmatpush.bf16.msra.mxu3 %v9505_v36  ;;  %v10097_v52 = vor.u32 %v10998_v16, %v10096_v15  ;;  %v9808_v36 = vld [vmem:[#allocation5 + $0x15a8] sm:$0xf]  ;;  %v10886_v18 = vld [vmem:[#allocation5 + $0x1474] sm:$0xf0]  ;;  %v9937_v15 = vor.u32 %v10958_v62, %v9936_v55  ;;  %v10065_v16 = vor.u32 %v10990_v14, %v10064_v2 }
 0x301   :  { %v9809_v58 = vor.u32 %v10926_v42, %v9808_v36  ;;  %v9648_v51 = vld [vmem:[#allocation5 + $0x1468] sm:$0xf]  ;;  %v10986_v8 = vld [vmem:[#allocation5 + $0x1794] sm:$0xf0] }
 0x302   :  { %6214 = vmatpush.bf16.msra.mxu0 %v9089_v40  ;;  %6227 = vmatpush.bf16.msra.mxu1 %v9217_v50  ;;  %v9664_v40 = vld [vmem:[#allocation5 + $0x1488] sm:$0xf]  ;;  %v10890_v50 = vld [vmem:[#allocation5 + $0x1494] sm:$0xf0] }
 0x303   :  { %v9665_v49 = vor.u32 %v10890_v50, %v9664_v40  ;;  %v10048_v26 = vld [vmem:[#allocation5 + $0x1788] sm:$0xf]  ;;  %v10882_v42 = vld [vmem:[#allocation5 + $0x1454] sm:$0xf0] }
 0x304   :  { %6239 = vmatpush.bf16.msra.mxu2 %v9361_v61  ;;  %6252 = vmatpush.bf16.msra.mxu3 %v9489_v4  ;;  %v6008_v61 = vpop.f32.mrf.mxu0  ;;  %v6021_v4 = vpop.f32.mrf.mxu1  ;;  %v9632_v36 = vld [vmem:[#allocation5 + $0x1448] sm:$0xf]  ;;  %v10982_v50 = vld [vmem:[#allocation5 + $0x1774] sm:$0xf0] }
 0x305   :  { %6215 = vmatmul.bf16.vlgmr.msra.gmra.mxu0 %v11397_v3  ;;  %6228 = vmatmul.bf16.vlgmr.msra.gmra.mxu1 %v11399_v11  ;;  %v6009_v7 = vadd.f32 %v6008_v61, %v1529_v21  ;;  %v9904_v20 = vld [vmem:[#allocation5 + $0x1668] sm:$0xf]  ;;  %v10878_v39 = vld [vmem:[#allocation5 + $0x1434] sm:$0xf0] }
 0x306   :  { %6259 = vmatpush.bf16.msrb.mxu0 %v9713_v33  ;;  %6272 = vmatpush.bf16.msrb.mxu1 %v9841_v53  ;;  %v9953_v33 = vor.u32 %v10962_v43, %v9952_v47  ;;  %v10081_v53 = vor.u32 %v10994_v46, %v10080_v17  ;;  %v10049_v43 = vor.u32 %v10986_v8, %v10048_v26  ;;  %v9760_v17 = vld [vmem:[#allocation5 + $0x1548] sm:$0xf]  ;;  %v10914_v46 = vld [vmem:[#allocation5 + $0x1554] sm:$0xf0] }
 0x307   :  { %v6022_v13 = vadd.f32 %v6021_v4, %v6009_v7  ;;  %v10032_v40 = vld [vmem:[#allocation5 + $0x1768] sm:$0xf]  ;;  %v10910_v62 = vld [vmem:[#allocation5 + $0x1534] sm:$0xf0] }
 0x308   :  { %6240 = vmatpush.bf16.msra.mxu2 %v9345_v45  ;;  %6253 = vmatpush.bf16.msra.mxu3 %v9473_v28  ;;  %v9920_v45 = vld [vmem:[#allocation5 + $0x1688] sm:$0xf]  ;;  %v10954_v28 = vld [vmem:[#allocation5 + $0x1694] sm:$0xf0]  ;;  %v10033_v61 = vor.u32 %v10982_v50, %v10032_v40  ;;  %v10256_v40 = vld [vmem:[#allocation5 + $0xcc] sm:$0xf] }
 0x309   :  { %v9921_v47 = vor.u32 %v10954_v28, %v9920_v45  ;;  %v9616_v57 = vld [vmem:[#allocation5 + $0x1428] sm:$0xf]  ;;  %v7138_v50 = vld [vmem:[#allocation5 + $0xd8] sm:$0xf0] }
 0x30a   :  { %6260 = vmatpush.bf16.msrb.mxu0 %v9697_v19  ;;  %6273 = vmatpush.bf16.msrb.mxu1 %v9825_v60  ;;  %v9776_v19 = vld [vmem:[#allocation5 + $0x1568] sm:$0xf]  ;;  %v10918_v60 = vld [vmem:[#allocation5 + $0x1574] sm:$0xf0] }
 0x30b   :  { %6241 = vmatmul.bf16.vlgmr.msra.gmra.mxu2 %v11403_v34  ;;  %6254 = vmatmul.bf16.vlgmr.msra.gmra.mxu3 %v11405_v41  ;;  %v9744_v4 = vld [vmem:[#allocation5 + $0x1528] sm:$0xf] }
 0x30c   :  { %6285 = vmatpush.bf16.msrb.mxu2 %v9969_v27  ;;  %6298 = vmatpush.bf16.msrb.mxu3 %v10097_v52  ;;  %v9649_v27 = vor.u32 %v10886_v18, %v9648_v51  ;;  %v9777_v52 = vor.u32 %v10918_v60, %v9776_v19  ;;  %v6010_v21 = vpop.f32.mrf.mxu0  ;;  %v9888_v2 = vld [vmem:[#allocation5 + $0x1648] sm:$0xf]  ;;  %v10978_v51 = vld [vmem:[#allocation5 + $0x1754] sm:$0xf0] }
 0x30d   :  { %v9600_v19 = vld [vmem:[#allocation5 + $0x1408] sm:$0xf]  ;;  %v10874_v60 = vld [vmem:[#allocation5 + $0x1414] sm:$0xf0] }
 0x30e   :  { %6261 = vmatpush.bf16.msrb.mxu0 %v9681_v48  ;;  %6274 = vmatpush.bf16.msrb.mxu1 %v9809_v58  ;;  %v6023_v48 = vpop.f32.mrf.mxu1  ;;  %v10950_v58 = vld [vmem:[#allocation5 + $0x1674] sm:$0xf0]  ;;  %v6034_v14 = vpop.f32.mrf.mxu2  ;;  %v9728_v45 = vld [vmem:[#allocation5 + $0x1508] sm:$0xf] }
 0x30f   :  { %v9905_v55 = vor.u32 %v10950_v58, %v9904_v20  ;;  %v6047_v7 = vpop.f32.mrf.mxu3  ;;  %v6035_v18 = vadd.f32 %v6034_v14, %v6022_v13  ;;  %v10942_v13 = vld [vmem:[#allocation5 + $0x1634] sm:$0xf0]  ;;  %v9601_v20 = vor.u32 %v10874_v60, %v9600_v19  ;;  %v10252_v60 = vld [vmem:[#allocation5 + $0xac] sm:$0xf] }
 0x310   :  { %6286 = vmatpush.bf16.msrb.mxu2 %v9953_v33  ;;  %6299 = vmatpush.bf16.msrb.mxu3 %v10081_v53  ;;  %v9633_v33 = vor.u32 %v10882_v42, %v9632_v36  ;;  %v9761_v53 = vor.u32 %v10914_v46, %v9760_v17  ;;  %v7154_v36 = vld [vmem:[#allocation5 + $0xf8] sm:$0xf0]  ;;  %v10292_v42 = vld [vmem:[#allocation5 + $0x1ec] sm:$0xf]  ;;  %v10000_v17 = vld [vmem:[#allocation5 + $0x1728] sm:$0xf] }
 0x311   :  { %v11493_v28 = vadd.f32 %v6047_v7, %v6035_v18  ;;  %v10974_v46 = vld [vmem:[#allocation5 + $0x1734] sm:$0xf0]  ;;  %v10324_v7 = vld [vmem:[#allocation5 + $0x2ec] sm:$0xf]  ;;  %v7141_v18 = vor.u32 %v10256_v40, %v7138_v50  ;;  %v7234_v40 = vld [vmem:[#allocation5 + $0x198] sm:$0xf0] }
 0x312   :  { %6262 = vmatpush.bf16.msrb.mxu0 %v9665_v49  ;;  %6275 = vmatpush.bf16.msrb.mxu1 %v9793_v12  ;;  %v10946_v49 = vld [vmem:[#allocation5 + $0x1654] sm:$0xf0]  ;;  %v10016_v12 = vld [vmem:[#allocation5 + $0x1748] sm:$0xf]  ;;  %v10316_v50 = vld [vmem:[#allocation5 + $0x2ac] sm:$0xf] }
 0x313   :  { %v9889_v26 = vor.u32 %v10946_v49, %v9888_v2  ;;  %v10017_v8 = vor.u32 %v10978_v51, %v10016_v12  ;;  %v9984_v2 = vld [vmem:[#allocation5 + $0x1708] sm:$0xf]  ;;  %v10970_v14 = vld [vmem:[#allocation5 + $0x1714] sm:$0xf0]  ;;  %v7410_v49 = vld [vmem:[#allocation5 + $0x2f8] sm:$0xf0] }
 0x314   :  { %6287 = vmatpush.bf16.msrb.mxu2 %v9937_v15  ;;  %6300 = vmatpush.bf16.msrb.mxu3 %v10065_v16  ;;  %v9617_v15 = vor.u32 %v10878_v39, %v9616_v57  ;;  %v9745_v16 = vor.u32 %v10910_v62, %v9744_v4  ;;  %v10001_v57 = vor.u32 %v10974_v46, %v10000_v17  ;;  %v9856_v4 = vld [vmem:[#allocation5 + $0x1608] sm:$0xf]  ;;  %v10938_v62 = vld [vmem:[#allocation5 + $0x1614] sm:$0xf0]  ;;  %v10356_v12 = vld [vmem:[#allocation5 + $0x3ec] sm:$0xf] }
 0x315   :  { %v7538_v51 = vld [vmem:[#allocation5 + $0x3f8] sm:$0xf0]  ;;  %v9985_v19 = vor.u32 %v10970_v14, %v9984_v2  ;;  %v10248_v46 = vld [vmem:[#allocation5 + $0x8c] sm:$0xf] }
 0x316   :  { %6263 = vmatpush.bf16.msrb.mxu0 %v9649_v27  ;;  %6276 = vmatpush.bf16.msrb.mxu1 %v9777_v52  ;;  %v10906_v27 = vld [vmem:[#allocation5 + $0x1514] sm:$0xf0]  ;;  %v10260_v52 = vld [vmem:[#allocation5 + $0xec] sm:$0xf]  ;;  %v6036_v39 = vpop.f32.mrf.mxu2  ;;  %v7090_v14 = vld [vmem:[#allocation5 + $0x78] sm:$0xf0] }
 0x317   :  { %v9729_v21 = vor.u32 %v10906_v27, %v9728_v45  ;;  %v7157_v48 = vor.u32 %v10260_v52, %v7154_v36  ;;  %v7122_v45 = vld [vmem:[#allocation5 + $0xb8] sm:$0xf0]  ;;  %v10284_v27 = vld [vmem:[#allocation5 + $0x1ac] sm:$0xf] }
 0x318   :  { %6288 = vmatpush.bf16.msrb.mxu2 %v9921_v47  ;;  %6301 = vmatpush.bf16.msrb.mxu3 %v10049_v43  ;;  %v7282_v47 = vld [vmem:[#allocation5 + $0x1f8] sm:$0xf0]  ;;  %v9872_v43 = vld [vmem:[#allocation5 + $0x1628] sm:$0xf]  ;;  %v10320_v36 = vld [vmem:[#allocation5 + $0x2cc] sm:$0xf] }
 0x319   :  { %v7285_v58 = vor.u32 %v10292_v42, %v7282_v47  ;;  %v7250_v52 = vld [vmem:[#allocation5 + $0x1b8] sm:$0xf0]  ;;  %v10352_v47 = vld [vmem:[#allocation5 + $0x3cc] sm:$0xf] }
 0x31a   :  { %6264 = vmatpush.bf16.msrb.mxu0 %v9633_v33  ;;  %6277 = vmatpush.bf16.msrb.mxu1 %v9761_v53  ;;  %v10288_v33 = vld [vmem:[#allocation5 + $0x1cc] sm:$0xf]  ;;  %v9873_v53 = vor.u32 %v10942_v13, %v9872_v43  ;;  %v7394_v42 = vld [vmem:[#allocation5 + $0x2d8] sm:$0xf0]  ;;  %v7125_v13 = vor.u32 %v10252_v60, %v7122_v45  ;;  %v7253_v17 = vor.u32 %v10284_v27, %v7250_v52 }
 0x31b   :  { %v7522_v43 = vld [vmem:[#allocation5 + $0x3d8] sm:$0xf0]  ;;  %v10348_v39 = vld [vmem:[#allocation5 + $0x3ac] sm:$0xf] }
 0x31c   :  { %6289 = vmatpush.bf16.msrb.mxu2 %v9905_v55  ;;  %6302 = vmatpush.bf16.msrb.mxu3 %v10033_v61  ;;  %v6049_v55 = vpop.f32.mrf.mxu3  ;;  %v7266_v61 = vld [vmem:[#allocation5 + $0x1d8] sm:$0xf0]  ;;  %v10244_v2 = vld [vmem:[#allocation5 + $0x6c] sm:$0xf] }
 0x31d   :  { %v7506_v55 = vld [vmem:[#allocation5 + $0x3b8] sm:$0xf0] }
 0x31e   :  { %6265 = vmatpush.bf16.msrb.mxu0 %v9617_v15  ;;  %6278 = vmatpush.bf16.msrb.mxu1 %v9745_v16  ;;  %v7269_v15 = vor.u32 %v10288_v33, %v7266_v61  ;;  %v9857_v16 = vor.u32 %v10938_v62, %v9856_v4  ;;  %v7490_v60 = vld [vmem:[#allocation5 + $0x398] sm:$0xf0] }
 0x320   :  { %6290 = vmatpush.bf16.msrb.mxu2 %v9889_v26  ;;  %6303 = vmatpush.bf16.msrb.mxu3 %v10017_v8  ;;  %v7413_v26 = vor.u32 %v10324_v7, %v7410_v49  ;;  %v7541_v8 = vor.u32 %v10356_v12, %v7538_v51  ;;  %v7509_v12 = vor.u32 %v10348_v39, %v7506_v55  ;;  %v10276_v51 = vld [vmem:[#allocation5 + $0x16c] sm:$0xf] }
 0x321   :  { %v10304_v39 = vld [vmem:[#allocation5 + $0x24c] sm:$0xf] }
 0x322   :  { %6266 = vmatpush.bf16.msrb.mxu0 %v9601_v20  ;;  %6279 = vmatpush.bf16.msrb.mxu1 %v9729_v21  ;;  %v7106_v20 = vld [vmem:[#allocation5 + $0x98] sm:$0xf0]  ;;  %v7397_v21 = vor.u32 %v10320_v36, %v7394_v42  ;;  %v6060_v33 = vpop.f32.mrf.mxu0  ;;  %v10272_v36 = vld [vmem:[#allocation5 + $0x14c] sm:$0xf] }
 0x323   :  { %v6061_v61 = vadd.f32 %v6060_v33, %v11493_v28  ;;  %v7109_v4 = vor.u32 %v10248_v46, %v7106_v20  ;;  %v7093_v28 = vor.u32 %v10244_v2, %v7090_v14  ;;  %v7202_v42 = vld [vmem:[#allocation5 + $0x158] sm:$0xf0]  ;;  %v10340_v46 = vld [vmem:[#allocation5 + $0x36c] sm:$0xf] }
 0x324   :  { %6291 = vmatpush.bf16.msrb.mxu2 %v9873_v53  ;;  %6304 = vmatpush.bf16.msrb.mxu3 %v10001_v57  ;;  %v6073_v53 = vpop.f32.mrf.mxu1  ;;  %v7378_v57 = vld [vmem:[#allocation5 + $0x2b8] sm:$0xf0] }
 0x325   :  { %6267 = vmatmul.bf16.vlgmr.msrb.gmra.mxu0 %v11409_v25  ;;  %6280 = vmatmul.bf16.vlgmr.msrb.gmra.mxu1 %v11411_v30  ;;  %v6074_v7 = vadd.f32 %v6073_v53, %v6061_v61  ;;  %v7381_v49 = vor.u32 %v10316_v50, %v7378_v57  ;;  %v7474_v20 = vld [vmem:[#allocation5 + $0x378] sm:$0xf0]  ;;  %v10268_v53 = vld [vmem:[#allocation5 + $0x12c] sm:$0xf] }
 0x326   :  { %6311 = vmatpush.bf16.msra.mxu0 %v7157_v48  ;;  %6324 = vmatpush.bf16.msra.mxu1 %v7285_v58  ;;  %v7525_v48 = vor.u32 %v10352_v47, %v7522_v43  ;;  %v10280_v58 = vld [vmem:[#allocation5 + $0x18c] sm:$0xf]  ;;  %v7477_v33 = vor.u32 %v10340_v46, %v7474_v20  ;;  %v7186_v57 = vld [vmem:[#allocation5 + $0x138] sm:$0xf0] }
 0x327   :  { %v7237_v62 = vor.u32 %v10280_v58, %v7234_v40  ;;  %v10308_v47 = vld [vmem:[#allocation5 + $0x26c] sm:$0xf]  ;;  %v7058_v40 = vld [vmem:[#allocation5 + $0x38] sm:$0xf0] }
 0x328   :  { %6292 = vmatpush.bf16.msrb.mxu2 %v9857_v16  ;;  %6305 = vmatpush.bf16.msrb.mxu3 %v9985_v19  ;;  %v7362_v16 = vld [vmem:[#allocation5 + $0x298] sm:$0xf0]  ;;  %v10344_v19 = vld [vmem:[#allocation5 + $0x38c] sm:$0xf] }
 0x329   :  { %v7493_v52 = vor.u32 %v10344_v19, %v7490_v60  ;;  %v10236_v58 = vld [vmem:[#allocation5 + $0x2c] sm:$0xf]  ;;  %v7458_v2 = vld [vmem:[#allocation5 + $0x358] sm:$0xf0] }
 0x32a   :  { %6312 = vmatpush.bf16.msra.mxu0 %v7141_v18  ;;  %6325 = vmatpush.bf16.msra.mxu1 %v7269_v15  ;;  %v7218_v18 = vld [vmem:[#allocation5 + $0x178] sm:$0xf0]  ;;  %v10312_v15 = vld [vmem:[#allocation5 + $0x28c] sm:$0xf]  ;;  %v6062_v43 = vpop.f32.mrf.mxu0 }
 0x32b   :  { %6293 = vmatmul.bf16.vlgmr.msrb.gmra.mxu2 %v11415_v54  ;;  %6306 = vmatmul.bf16.vlgmr.msrb.gmra.mxu3 %v11417_v56  ;;  %v7221_v45 = vor.u32 %v10276_v51, %v7218_v18  ;;  %v7365_v27 = vor.u32 %v10312_v15, %v7362_v16  ;;  %v10232_v51 = vld [vmem:[#allocation5 + $0xc] sm:$0xf]  ;;  %v7042_v18 = vld [vmem:[#allocation5 + $0x18] sm:$0xf0] }
 0x32c   :  { %6337 = vmatpush.bf16.msra.mxu2 %v7413_v26  ;;  %6350 = vmatpush.bf16.msra.mxu3 %v7541_v8  ;;  %v10240_v26 = vld [vmem:[#allocation5 + $0x4c] sm:$0xf]  ;;  %v7074_v8 = vld [vmem:[#allocation5 + $0x58] sm:$0xf0] }
 0x32d   :  { %v10264_v15 = vld [vmem:[#allocation5 + $0x10c] sm:$0xf]  ;;  %v7650_v20 = vld [vmem:[#allocation5 + $0x4d8] sm:$0xf0] }
 0x32e   :  { %6313 = vmatpush.bf16.msra.mxu0 %v7125_v13  ;;  %6326 = vmatpush.bf16.msra.mxu1 %v7253_v17  ;;  %v6075_v13 = vpop.f32.mrf.mxu1  ;;  %v7346_v17 = vld [vmem:[#allocation5 + $0x278] sm:$0xf0]  ;;  %v6086_v55 = vpop.f32.mrf.mxu2  ;;  %v10384_v46 = vld [vmem:[#allocation5 + $0x4cc] sm:$0xf] }
 0x32f   :  { %v7349_v50 = vor.u32 %v10308_v47, %v7346_v17  ;;  %v6099_v61 = vpop.f32.mrf.mxu3  ;;  %v6087_v14 = vadd.f32 %v6086_v55, %v6074_v7  ;;  %v7314_v7 = vld [vmem:[#allocation5 + $0x238] sm:$0xf0]  ;;  %v7045_v47 = vor.u32 %v10232_v51, %v7042_v18  ;;  %v10380_v18 = vld [vmem:[#allocation5 + $0x4ac] sm:$0xf] }
 0x330   :  { %6338 = vmatpush.bf16.msra.mxu2 %v7397_v21  ;;  %6351 = vmatpush.bf16.msra.mxu3 %v7525_v48  ;;  %v7077_v21 = vor.u32 %v10240_v26, %v7074_v8  ;;  %v7205_v48 = vor.u32 %v10272_v36, %v7202_v42  ;;  %v7666_v26 = vld [vmem:[#allocation5 + $0x4f8] sm:$0xf0]  ;;  %v10420_v8 = vld [vmem:[#allocation5 + $0x5ec] sm:$0xf] }
 0x331   :  { %v11500_v16 = vadd.f32 %v6099_v61, %v6087_v14  ;;  %v10332_v36 = vld [vmem:[#allocation5 + $0x32c] sm:$0xf]  ;;  %v7442_v42 = vld [vmem:[#allocation5 + $0x338] sm:$0xf0]  ;;  %v7653_v14 = vor.u32 %v10384_v46, %v7650_v20 }
 0x332   :  { %6314 = vmatpush.bf16.msra.mxu0 %v7109_v4  ;;  %6327 = vmatpush.bf16.msra.mxu1 %v7237_v62  ;;  %v7330_v4 = vld [vmem:[#allocation5 + $0x258] sm:$0xf0]  ;;  %v10336_v62 = vld [vmem:[#allocation5 + $0x34c] sm:$0xf] }
 0x333   :  { %v7333_v19 = vor.u32 %v10304_v39, %v7330_v4  ;;  %v7461_v60 = vor.u32 %v10336_v62, %v7458_v2  ;;  %v10328_v39 = vld [vmem:[#allocation5 + $0x30c] sm:$0xf]  ;;  %v7426_v55 = vld [vmem:[#allocation5 + $0x318] sm:$0xf0] }
 0x334   :  { %6339 = vmatpush.bf16.msra.mxu2 %v7381_v49  ;;  %6352 = vmatpush.bf16.msra.mxu3 %v7509_v12  ;;  %v7061_v49 = vor.u32 %v10236_v58, %v7058_v40  ;;  %v7189_v12 = vor.u32 %v10268_v53, %v7186_v57  ;;  %v7445_v58 = vor.u32 %v10332_v36, %v7442_v42  ;;  %v10296_v53 = vld [vmem:[#allocation5 + $0x20c] sm:$0xf]  ;;  %v7298_v57 = vld [vmem:[#allocation5 + $0x218] sm:$0xf0] }
 0x335   :  { %v10452_v61 = vld [vmem:[#allocation5 + $0x6ec] sm:$0xf]  ;;  %v7922_v4 = vld [vmem:[#allocation5 + $0x6f8] sm:$0xf0]  ;;  %v7429_v51 = vor.u32 %v10328_v39, %v7426_v55 }
 0x336   :  { %6315 = vmatpush.bf16.msra.mxu0 %v7093_v28  ;;  %6328 = vmatpush.bf16.msra.mxu1 %v7221_v45  ;;  %v7170_v28 = vld [vmem:[#allocation5 + $0x118] sm:$0xf0]  ;;  %v10388_v45 = vld [vmem:[#allocation5 + $0x4ec] sm:$0xf]  ;;  %v6088_v40 = vpop.f32.mrf.mxu2 }
 0x337   :  { %v7173_v43 = vor.u32 %v10264_v15, %v7170_v28  ;;  %v7669_v13 = vor.u32 %v10388_v45, %v7666_v26  ;;  %v10484_v62 = vld [vmem:[#allocation5 + $0x7ec] sm:$0xf]  ;;  %v8050_v2 = vld [vmem:[#allocation5 + $0x7f8] sm:$0xf0] }
 0x338   :  { %6340 = vmatpush.bf16.msra.mxu2 %v7365_v27  ;;  %6353 = vmatpush.bf16.msra.mxu3 %v7493_v52  ;;  %v7794_v27 = vld [vmem:[#allocation5 + $0x5f8] sm:$0xf0]  ;;  %v10300_v52 = vld [vmem:[#allocation5 + $0x22c] sm:$0xf] }
 0x339   :  { %v7797_v17 = vor.u32 %v10420_v8, %v7794_v27  ;;  %v7634_v15 = vld [vmem:[#allocation5 + $0x4b8] sm:$0xf0]  ;;  %v10412_v28 = vld [vmem:[#allocation5 + $0x5ac] sm:$0xf] }
 0x33a   :  { %6316 = vmatpush.bf16.msra.mxu0 %v7077_v21  ;;  %6329 = vmatpush.bf16.msra.mxu1 %v7205_v48  ;;  %v10416_v21 = vld [vmem:[#allocation5 + $0x5cc] sm:$0xf]  ;;  %v7317_v48 = vor.u32 %v10300_v52, %v7314_v7  ;;  %v7762_v45 = vld [vmem:[#allocation5 + $0x5b8] sm:$0xf0]  ;;  %v7637_v7 = vor.u32 %v10380_v18, %v7634_v15 }
 0x33b   :  { %v10448_v26 = vld [vmem:[#allocation5 + $0x6cc] sm:$0xf]  ;;  %v7906_v8 = vld [vmem:[#allocation5 + $0x6d8] sm:$0xf0]  ;;  %v7765_v36 = vor.u32 %v10412_v28, %v7762_v45 }
 0x33c   :  { %6341 = vmatpush.bf16.msra.mxu2 %v7349_v50  ;;  %6354 = vmatpush.bf16.msra.mxu3 %v7477_v33  ;;  %v6101_v50 = vpop.f32.mrf.mxu3  ;;  %v7778_v33 = vld [vmem:[#allocation5 + $0x5d8] sm:$0xf0]  ;;  %v10480_v27 = vld [vmem:[#allocation5 + $0x7cc] sm:$0xf] }
 0x33d   :  { %v8034_v52 = vld [vmem:[#allocation5 + $0x7d8] sm:$0xf0]  ;;  %v10376_v42 = vld [vmem:[#allocation5 + $0x48c] sm:$0xf] }
 0x33e   :  { %6317 = vmatpush.bf16.msra.mxu0 %v7061_v49  ;;  %6330 = vmatpush.bf16.msra.mxu1 %v7189_v12  ;;  %v7781_v49 = vor.u32 %v10416_v21, %v7778_v33  ;;  %v7301_v12 = vor.u32 %v10296_v53, %v7298_v57  ;;  %v7890_v21 = vld [vmem:[#allocation5 + $0x6b8] sm:$0xf0]  ;;  %v10372_v53 = vld [vmem:[#allocation5 + $0x46c] sm:$0xf] }
 0x33f   :  { %v7602_v57 = vld [vmem:[#allocation5 + $0x478] sm:$0xf0]  ;;  %v10436_v28 = vld [vmem:[#allocation5 + $0x66c] sm:$0xf] }
 0x340   :  { %6342 = vmatpush.bf16.msra.mxu2 %v7333_v19  ;;  %6355 = vmatpush.bf16.msra.mxu3 %v7461_v60  ;;  %v7925_v19 = vor.u32 %v10452_v61, %v7922_v4  ;;  %v8053_v60 = vor.u32 %v10484_v62, %v8050_v2  ;;  %v10404_v4 = vld [vmem:[#allocation5 + $0x56c] sm:$0xf]  ;;  %v7730_v62 = vld [vmem:[#allocation5 + $0x578] sm:$0xf0] }
 0x341   :  { %v10440_v2 = vld [vmem:[#allocation5 + $0x68c] sm:$0xf] }
 0x342   :  { %6318 = vmatpush.bf16.msra.mxu0 %v7045_v47  ;;  %6331 = vmatpush.bf16.msra.mxu1 %v7173_v43  ;;  %v7618_v47 = vld [vmem:[#allocation5 + $0x498] sm:$0xf0]  ;;  %v10408_v43 = vld [vmem:[#allocation5 + $0x58c] sm:$0xf]  ;;  %v6112_v46 = vpop.f32.mrf.mxu0  ;;  %v6125_v20 = vpop.f32.mrf.mxu1 }
 0x343   :  { %v6113_v40 = vadd.f32 %v6112_v46, %v11500_v16  ;;  %v7621_v50 = vor.u32 %v10376_v42, %v7618_v47  ;;  %v7733_v16 = vor.u32 %v10404_v4, %v7730_v62  ;;  %v10364_v42 = vld [vmem:[#allocation5 + $0x42c] sm:$0xf]  ;;  %v7570_v47 = vld [vmem:[#allocation5 + $0x438] sm:$0xf0] }
 0x344   :  { %6343 = vmatpush.bf16.msra.mxu2 %v7317_v48  ;;  %6356 = vmatpush.bf16.msra.mxu3 %v7445_v58  ;;  %v10476_v48 = vld [vmem:[#allocation5 + $0x7ac] sm:$0xf]  ;;  %v8018_v58 = vld [vmem:[#allocation5 + $0x7b8] sm:$0xf0] }
 0x345   :  { %6319 = vmatmul.bf16.vlgmr.msra.gmra.mxu0 %v11349_v9  ;;  %6332 = vmatmul.bf16.vlgmr.msra.gmra.mxu1 %v11351_v10  ;;  %v7909_v9 = vor.u32 %v10448_v26, %v7906_v8  ;;  %v8037_v10 = vor.u32 %v10480_v27, %v8034_v52  ;;  %v6126_v39 = vadd.f32 %v6125_v20, %v6113_v40  ;;  %v7858_v8 = vld [vmem:[#allocation5 + $0x678] sm:$0xf0]  ;;  %v10468_v27 = vld [vmem:[#allocation5 + $0x76c] sm:$0xf] }
 0x346   :  { %6363 = vmatpush.bf16.msrb.mxu0 %v7669_v13  ;;  %6376 = vmatpush.bf16.msrb.mxu1 %v7797_v17  ;;  %v7746_v13 = vld [vmem:[#allocation5 + $0x598] sm:$0xf0]  ;;  %v10444_v17 = vld [vmem:[#allocation5 + $0x6ac] sm:$0xf]  ;;  %v8021_v61 = vor.u32 %v10476_v48, %v8018_v58 }
 0x347   :  { %v7749_v33 = vor.u32 %v10408_v43, %v7746_v13  ;;  %v7893_v55 = vor.u32 %v10444_v17, %v7890_v21  ;;  %v7986_v52 = vld [vmem:[#allocation5 + $0x778] sm:$0xf0]  ;;  %v10396_v43 = vld [vmem:[#allocation5 + $0x52c] sm:$0xf] }
 0x348   :  { %6344 = vmatpush.bf16.msra.mxu2 %v7301_v12  ;;  %6357 = vmatpush.bf16.msra.mxu3 %v7429_v51  ;;  %v10368_v12 = vld [vmem:[#allocation5 + $0x44c] sm:$0xf]  ;;  %v7586_v51 = vld [vmem:[#allocation5 + $0x458] sm:$0xf0] }
 0x349   :  { %v7698_v13 = vld [vmem:[#allocation5 + $0x538] sm:$0xf0]  ;;  %v10432_v17 = vld [vmem:[#allocation5 + $0x64c] sm:$0xf] }
 0x34a   :  { %6364 = vmatpush.bf16.msrb.mxu0 %v7653_v14  ;;  %6377 = vmatpush.bf16.msrb.mxu1 %v7781_v49  ;;  %v7874_v14 = vld [vmem:[#allocation5 + $0x698] sm:$0xf0]  ;;  %v6114_v45 = vpop.f32.mrf.mxu0  ;;  %v6127_v26 = vpop.f32.mrf.mxu1  ;;  %v10464_v48 = vld [vmem:[#allocation5 + $0x74c] sm:$0xf] }
 0x34b   :  { %6345 = vmatmul.bf16.vlgmr.msra.gmra.mxu2 %v11355_v31  ;;  %6358 = vmatmul.bf16.vlgmr.msra.gmra.mxu3 %v11357_v32  ;;  %v10472_v31 = vld [vmem:[#allocation5 + $0x78c] sm:$0xf]  ;;  %v8002_v49 = vld [vmem:[#allocation5 + $0x798] sm:$0xf0]  ;;  %v7605_v32 = vor.u32 %v10372_v53, %v7602_v57  ;;  %v7877_v18 = vor.u32 %v10440_v2, %v7874_v14 }
 0x34c   :  { %6389 = vmatpush.bf16.msrb.mxu2 %v7925_v19  ;;  %6402 = vmatpush.bf16.msrb.mxu3 %v8053_v60  ;;  %v8005_v15 = vor.u32 %v10472_v31, %v8002_v49  ;;  %v10400_v19 = vld [vmem:[#allocation5 + $0x54c] sm:$0xf]  ;;  %v7714_v60 = vld [vmem:[#allocation5 + $0x558] sm:$0xf0] }
 0x34d   :  { %v7842_v21 = vld [vmem:[#allocation5 + $0x658] sm:$0xf0]  ;;  %v10360_v53 = vld [vmem:[#allocation5 + $0x40c] sm:$0xf] }
 0x34e   :  { %6365 = vmatpush.bf16.msrb.mxu0 %v7637_v7  ;;  %6378 = vmatpush.bf16.msrb.mxu1 %v7765_v36  ;;  %v7589_v7 = vor.u32 %v10368_v12, %v7586_v51  ;;  %v7717_v36 = vor.u32 %v10400_v19, %v7714_v60  ;;  %v6138_v46 = vpop.f32.mrf.mxu2  ;;  %v6151_v20 = vpop.f32.mrf.mxu3  ;;  %v7970_v58 = vld [vmem:[#allocation5 + $0x758] sm:$0xf0]  ;;  %v7845_v4 = vor.u32 %v10432_v17, %v7842_v21  ;;  %v10516_v14 = vld [vmem:[#allocation5 + $0x8ec] sm:$0xf] }
 0x34f   :  { %v6139_v40 = vadd.f32 %v6138_v46, %v6126_v39  ;;  %v7554_v57 = vld [vmem:[#allocation5 + $0x418] sm:$0xf0]  ;;  %v7973_v62 = vor.u32 %v10464_v48, %v7970_v58  ;;  %v10548_v49 = vld [vmem:[#allocation5 + $0x9ec] sm:$0xf] }
 0x350   :  { %6390 = vmatpush.bf16.msrb.mxu2 %v7909_v9  ;;  %6403 = vmatpush.bf16.msrb.mxu3 %v8037_v10  ;;  %v7861_v9 = vor.u32 %v10436_v28, %v7858_v8  ;;  %v7989_v10 = vor.u32 %v10468_v27, %v7986_v52  ;;  %v7682_v2 = vld [vmem:[#allocation5 + $0x518] sm:$0xf0]  ;;  %v10460_v12 = vld [vmem:[#allocation5 + $0x72c] sm:$0xf] }
 0x351   :  { %v8178_v31 = vld [vmem:[#allocation5 + $0x8f8] sm:$0xf0]  ;;  %v10512_v28 = vld [vmem:[#allocation5 + $0x8cc] sm:$0xf] }
 0x352   :  { %6366 = vmatpush.bf16.msrb.mxu0 %v7621_v50  ;;  %6379 = vmatpush.bf16.msrb.mxu1 %v7749_v33  ;;  %v7573_v50 = vor.u32 %v10364_v42, %v7570_v47  ;;  %v7701_v33 = vor.u32 %v10396_v43, %v7698_v13  ;;  %v7826_v39 = vld [vmem:[#allocation5 + $0x638] sm:$0xf0]  ;;  %v8181_v19 = vor.u32 %v10516_v14, %v8178_v31  ;;  %v10544_v26 = vld [vmem:[#allocation5 + $0x9cc] sm:$0xf] }
 0x353   :  { %v7954_v51 = vld [vmem:[#allocation5 + $0x738] sm:$0xf0]  ;;  %v10424_v42 = vld [vmem:[#allocation5 + $0x60c] sm:$0xf] }
 0x354   :  { %6391 = vmatpush.bf16.msrb.mxu2 %v7893_v55  ;;  %6404 = vmatpush.bf16.msrb.mxu3 %v8021_v61  ;;  %v10392_v55 = vld [vmem:[#allocation5 + $0x50c] sm:$0xf]  ;;  %v11507_v61 = vadd.f32 %v6151_v20, %v6139_v40  ;;  %v8162_v45 = vld [vmem:[#allocation5 + $0x8d8] sm:$0xf0]  ;;  %v7957_v27 = vor.u32 %v10460_v12, %v7954_v51 }
 0x355   :  { %v7810_v47 = vld [vmem:[#allocation5 + $0x618] sm:$0xf0]  ;;  %v10580_v43 = vld [vmem:[#allocation5 + $0xaec] sm:$0xf]  ;;  %v8165_v20 = vor.u32 %v10512_v28, %v8162_v45 }
 0x356   :  { %6367 = vmatpush.bf16.msrb.mxu0 %v7605_v32  ;;  %6380 = vmatpush.bf16.msrb.mxu1 %v7733_v16  ;;  %v8306_v32 = vld [vmem:[#allocation5 + $0x9f8] sm:$0xf0]  ;;  %v10428_v16 = vld [vmem:[#allocation5 + $0x62c] sm:$0xf]  ;;  %v6140_v52 = vpop.f32.mrf.mxu2  ;;  %v7813_v48 = vor.u32 %v10424_v42, %v7810_v47 }
 0x357   :  { %v8309_v60 = vor.u32 %v10548_v49, %v8306_v32  ;;  %v7829_v8 = vor.u32 %v10428_v16, %v7826_v39  ;;  %v8434_v13 = vld [vmem:[#allocation5 + $0xaf8] sm:$0xf0]  ;;  %v10612_v17 = vld [vmem:[#allocation5 + $0xbec] sm:$0xf] }
 0x358   :  { %6392 = vmatpush.bf16.msrb.mxu2 %v7877_v18  ;;  %6405 = vmatpush.bf16.msrb.mxu3 %v8005_v15  ;;  %v7557_v18 = vor.u32 %v10360_v53, %v7554_v57  ;;  %v7685_v15 = vor.u32 %v10392_v55, %v7682_v2  ;;  %v8562_v46 = vld [vmem:[#allocation5 + $0xbf8] sm:$0xf0]  ;;  %v10508_v40 = vld [vmem:[#allocation5 + $0x8ac] sm:$0xf] }
 0x359   :  { %v8565_v53 = vor.u32 %v10612_v17, %v8562_v46  ;;  %v10540_v57 = vld [vmem:[#allocation5 + $0x9ac] sm:$0xf]  ;;  %v8274_v55 = vld [vmem:[#allocation5 + $0x9b8] sm:$0xf0] }
 0x35a   :  { %6368 = vmatpush.bf16.msrb.mxu0 %v7589_v7  ;;  %6381 = vmatpush.bf16.msrb.mxu1 %v7717_v36  ;;  %v6153_v7 = vpop.f32.mrf.mxu3  ;;  %v8290_v36 = vld [vmem:[#allocation5 + $0x9d8] sm:$0xf0]  ;;  %v10608_v2 = vld [vmem:[#allocation5 + $0xbcc] sm:$0xf]  ;;  %v8277_v49 = vor.u32 %v10540_v57, %v8274_v55 }
 0x35b   :  { %v8293_v21 = vor.u32 %v10544_v26, %v8290_v36  ;;  %v8546_v14 = vld [vmem:[#allocation5 + $0xbd8] sm:$0xf0]  ;;  %v10504_v32 = vld [vmem:[#allocation5 + $0x88c] sm:$0xf] }
 0x35c   :  { %6393 = vmatpush.bf16.msrb.mxu2 %v7861_v9  ;;  %6406 = vmatpush.bf16.msrb.mxu3 %v7989_v10  ;;  %v10456_v9 = vld [vmem:[#allocation5 + $0x70c] sm:$0xf]  ;;  %v7938_v10 = vld [vmem:[#allocation5 + $0x718] sm:$0xf0] }
 0x35d   :  { %v7941_v58 = vor.u32 %v10456_v9, %v7938_v10  ;;  %v8130_v16 = vld [vmem:[#allocation5 + $0x898] sm:$0xf0]  ;;  %v10536_v39 = vld [vmem:[#allocation5 + $0x98c] sm:$0xf] }
 0x35e   :  { %6369 = vmatpush.bf16.msrb.mxu0 %v7573_v50  ;;  %6382 = vmatpush.bf16.msrb.mxu1 %v7701_v33  ;;  %v8146_v50 = vld [vmem:[#allocation5 + $0x8b8] sm:$0xf0]  ;;  %v8437_v33 = vor.u32 %v10580_v43, %v8434_v13  ;;  %v10572_v51 = vld [vmem:[#allocation5 + $0xaac] sm:$0xf]  ;;  %v8133_v26 = vor.u32 %v10504_v32, %v8130_v16 }
 0x35f   :  { %v8149_v31 = vor.u32 %v10508_v40, %v8146_v50  ;;  %v8258_v12 = vld [vmem:[#allocation5 + $0x998] sm:$0xf0]  ;;  %v10532_v47 = vld [vmem:[#allocation5 + $0x96c] sm:$0xf] }
 0x360   :  { %6394 = vmatpush.bf16.msrb.mxu2 %v7845_v4  ;;  %6407 = vmatpush.bf16.msrb.mxu3 %v7973_v62  ;;  %v10576_v4 = vld [vmem:[#allocation5 + $0xacc] sm:$0xf]  ;;  %v8418_v62 = vld [vmem:[#allocation5 + $0xad8] sm:$0xf0] }
 0x361   :  { %v8530_v28 = vld [vmem:[#allocation5 + $0xbb8] sm:$0xf0]  ;;  %v10568_v10 = vld [vmem:[#allocation5 + $0xa8c] sm:$0xf] }
 0x362   :  { %6370 = vmatpush.bf16.msrb.mxu0 %v7557_v18  ;;  %6383 = vmatpush.bf16.msrb.mxu1 %v7685_v15  ;;  %v6164_v18 = vpop.f32.mrf.mxu0  ;;  %v6177_v15 = vpop.f32.mrf.mxu1  ;;  %v8114_v52 = vld [vmem:[#allocation5 + $0x878] sm:$0xf0]  ;;  %v10496_v17 = vld [vmem:[#allocation5 + $0x84c] sm:$0xf] }
 0x363   :  { %v6165_v45 = vadd.f32 %v6164_v18, %v11507_v61  ;;  %v8242_v9 = vld [vmem:[#allocation5 + $0x978] sm:$0xf0]  ;;  %v10564_v40 = vld [vmem:[#allocation5 + $0xa6c] sm:$0xf] }
 0x364   :  { %6395 = vmatpush.bf16.msrb.mxu2 %v7829_v8  ;;  %6408 = vmatpush.bf16.msrb.mxu3 %v7957_v27  ;;  %v8261_v8 = vor.u32 %v10536_v39, %v8258_v12  ;;  %v10500_v27 = vld [vmem:[#allocation5 + $0x86c] sm:$0xf]  ;;  %v8386_v43 = vld [vmem:[#allocation5 + $0xa98] sm:$0xf0]  ;;  %v8245_v61 = vor.u32 %v10532_v47, %v8242_v9 }
 0x365   :  { %6371 = vmatmul.bf16.vlgmr.msrb.gmra.mxu0 %v11361_v63  ;;  %6384 = vmatmul.bf16.vlgmr.msrb.gmra.mxu1 %v11363_v0  ;;  %v8421_v63 = vor.u32 %v10576_v4, %v8418_v62  ;;  %v8549_v0 = vor.u32 %v10608_v2, %v8546_v14  ;;  %v6178_v7 = vadd.f32 %v6177_v15, %v6165_v45  ;;  %v8514_v13 = vld [vmem:[#allocation5 + $0xb98] sm:$0xf0]  ;;  %v10596_v57 = vld [vmem:[#allocation5 + $0xb6c] sm:$0xf] }
 0x366   :  { %6415 = vmatpush.bf16.msra.mxu0 %v8181_v19  ;;  %6428 = vmatpush.bf16.msra.mxu1 %v8309_v60  ;;  %v8402_v19 = vld [vmem:[#allocation5 + $0xab8] sm:$0xf0]  ;;  %v10604_v60 = vld [vmem:[#allocation5 + $0xbac] sm:$0xf] }
 0x367   :  { %v8405_v36 = vor.u32 %v10572_v51, %v8402_v19  ;;  %v8533_v42 = vor.u32 %v10604_v60, %v8530_v28  ;;  %v8098_v46 = vld [vmem:[#allocation5 + $0x858] sm:$0xf0]  ;;  %v10492_v2 = vld [vmem:[#allocation5 + $0x82c] sm:$0xf] }
 0x368   :  { %6396 = vmatpush.bf16.msrb.mxu2 %v7813_v48  ;;  %6409 = vmatpush.bf16.msrb.mxu3 %v7941_v58  ;;  %v10528_v48 = vld [vmem:[#allocation5 + $0x94c] sm:$0xf]  ;;  %v8226_v58 = vld [vmem:[#allocation5 + $0x958] sm:$0xf0]  ;;  %v8101_v4 = vor.u32 %v10496_v17, %v8098_v46 }
 0x369   :  { %v8498_v55 = vld [vmem:[#allocation5 + $0xb78] sm:$0xf0]  ;;  %v8229_v62 = vor.u32 %v10528_v48, %v8226_v58  ;;  %v10524_v32 = vld [vmem:[#allocation5 + $0x92c] sm:$0xf] }
 0x36a   :  { %6416 = vmatpush.bf16.msra.mxu0 %v8165_v20  ;;  %6429 = vmatpush.bf16.msra.mxu1 %v8293_v21  ;;  %v8389_v20 = vor.u32 %v10568_v10, %v8386_v43  ;;  %v6166_v50 = vpop.f32.mrf.mxu0  ;;  %v8082_v14 = vld [vmem:[#allocation5 + $0x838] sm:$0xf0]  ;;  %v10592_v51 = vld [vmem:[#allocation5 + $0xb4c] sm:$0xf] }
 0x36b   :  { %6397 = vmatmul.bf16.vlgmr.msrb.gmra.mxu2 %v11367_v23  ;;  %6410 = vmatmul.bf16.vlgmr.msrb.gmra.mxu3 %v11369_v24  ;;  %v10600_v23 = vld [vmem:[#allocation5 + $0xb8c] sm:$0xf]  ;;  %v8117_v24 = vor.u32 %v10500_v27, %v8114_v52  ;;  %v8210_v16 = vld [vmem:[#allocation5 + $0x938] sm:$0xf0]  ;;  %v8085_v19 = vor.u32 %v10492_v2, %v8082_v14 }
 0x36c   :  { %6441 = vmatpush.bf16.msra.mxu2 %v8437_v33  ;;  %6454 = vmatpush.bf16.msra.mxu3 %v8565_v53  ;;  %v8517_v21 = vor.u32 %v10600_v23, %v8514_v13  ;;  %v6179_v33 = vpop.f32.mrf.mxu1  ;;  %v8370_v53 = vld [vmem:[#allocation5 + $0xa78] sm:$0xf0]  ;;  %v8213_v60 = vor.u32 %v10524_v32, %v8210_v16  ;;  %v10488_v28 = vld [vmem:[#allocation5 + $0x80c] sm:$0xf] }
 0x36d   :  { %v8354_v12 = vld [vmem:[#allocation5 + $0xa58] sm:$0xf0]  ;;  %v10676_v9 = vld [vmem:[#allocation5 + $0xdec] sm:$0xf] }
 0x36e   :  { %6417 = vmatpush.bf16.msra.mxu0 %v8149_v31  ;;  %6430 = vmatpush.bf16.msra.mxu1 %v8277_v49  ;;  %v8373_v31 = vor.u32 %v10564_v40, %v8370_v53  ;;  %v8501_v49 = vor.u32 %v10596_v57, %v8498_v55  ;;  %v6203_v39 = vpop.f32.mrf.mxu3  ;;  %v8482_v18 = vld [vmem:[#allocation5 + $0xb58] sm:$0xf0]  ;;  %v10556_v43 = vld [vmem:[#allocation5 + $0xa2c] sm:$0xf] }
 0x36f   :  { %v8066_v45 = vld [vmem:[#allocation5 + $0x818] sm:$0xf0]  ;;  %v8485_v52 = vor.u32 %v10592_v51, %v8482_v18  ;;  %v10588_v23 = vld [vmem:[#allocation5 + $0xb2c] sm:$0xf] }
 0x370   :  { %6442 = vmatpush.bf16.msra.mxu2 %v8421_v63  ;;  %6455 = vmatpush.bf16.msra.mxu3 %v8549_v0  ;;  %v10560_v63 = vld [vmem:[#allocation5 + $0xa4c] sm:$0xf]  ;;  %v6190_v0 = vpop.f32.mrf.mxu2  ;;  %v8690_v47 = vld [vmem:[#allocation5 + $0xcf8] sm:$0xf0] }
 0x371   :  { %v6191_v15 = vadd.f32 %v6190_v0, %v6178_v7  ;;  %v8357_v27 = vor.u32 %v10560_v63, %v8354_v12  ;;  %v8818_v10 = vld [vmem:[#allocation5 + $0xdf8] sm:$0xf0]  ;;  %v10672_v48 = vld [vmem:[#allocation5 + $0xdcc] sm:$0xf] }
 0x372   :  { %6418 = vmatpush.bf16.msra.mxu0 %v8133_v26  ;;  %6431 = vmatpush.bf16.msra.mxu1 %v8261_v8  ;;  %v10520_v26 = vld [vmem:[#allocation5 + $0x90c] sm:$0xf]  ;;  %v8338_v7 = vld [vmem:[#allocation5 + $0xa38] sm:$0xf0]  ;;  %v8821_v46 = vor.u32 %v10676_v9, %v8818_v10 }
 0x373   :  { %v11514_v8 = vadd.f32 %v6203_v39, %v6191_v15  ;;  %v8466_v13 = vld [vmem:[#allocation5 + $0xb38] sm:$0xf0]  ;;  %v8341_v58 = vor.u32 %v10556_v43, %v8338_v7  ;;  %v10552_v57 = vld [vmem:[#allocation5 + $0xa0c] sm:$0xf] }
 0x374   :  { %6443 = vmatpush.bf16.msra.mxu2 %v8405_v36  ;;  %6456 = vmatpush.bf16.msra.mxu3 %v8533_v42  ;;  %v8194_v36 = vld [vmem:[#allocation5 + $0x918] sm:$0xf0]  ;;  %v10644_v42 = vld [vmem:[#allocation5 + $0xcec] sm:$0xf]  ;;  %v8469_v40 = vor.u32 %v10588_v23, %v8466_v13 }
 0x375   :  { %v8693_v17 = vor.u32 %v10644_v42, %v8690_v47  ;;  %v8802_v53 = vld [vmem:[#allocation5 + $0xdd8] sm:$0xf0]  ;;  %v10708_v2 = vld [vmem:[#allocation5 + $0xeec] sm:$0xf] }
 0x376   :  { %6419 = vmatpush.bf16.msra.mxu0 %v8117_v24  ;;  %6432 = vmatpush.bf16.msra.mxu1 %v8245_v61  ;;  %v8069_v24 = vor.u32 %v10488_v28, %v8066_v45  ;;  %v8197_v61 = vor.u32 %v10520_v26, %v8194_v36  ;;  %v6205_v33 = vpop.f32.mrf.mxu3  ;;  %v8322_v55 = vld [vmem:[#allocation5 + $0xa18] sm:$0xf0]  ;;  %v8805_v16 = vor.u32 %v10672_v48, %v8802_v53  ;;  %v10636_v39 = vld [vmem:[#allocation5 + $0xcac] sm:$0xf] }
 0x377   :  { %v8946_v14 = vld [vmem:[#allocation5 + $0xef8] sm:$0xf0]  ;;  %v8325_v63 = vor.u32 %v10552_v57, %v8322_v55  ;;  %v10668_v15 = vld [vmem:[#allocation5 + $0xdac] sm:$0xf] }
 0x378   :  { %6444 = vmatpush.bf16.msra.mxu2 %v8389_v20  ;;  %6457 = vmatpush.bf16.msra.mxu3 %v8517_v21  ;;  %v10640_v20 = vld [vmem:[#allocation5 + $0xccc] sm:$0xf]  ;;  %v8674_v21 = vld [vmem:[#allocation5 + $0xcd8] sm:$0xf0]  ;;  %v6192_v50 = vpop.f32.mrf.mxu2  ;;  %v8949_v51 = vor.u32 %v10708_v2, %v8946_v14 }
 0x379   :  { %v8677_v32 = vor.u32 %v10640_v20, %v8674_v21  ;;  %v8658_v12 = vld [vmem:[#allocation5 + $0xcb8] sm:$0xf0]  ;;  %v10736_v45 = vld [vmem:[#allocation5 + $0xfcc] sm:$0xf] }
 0x37a   :  { %6420 = vmatpush.bf16.msra.mxu0 %v8101_v4  ;;  %6433 = vmatpush.bf16.msra.mxu1 %v8229_v62  ;;  %v10584_v4 = vld [vmem:[#allocation5 + $0xb0c] sm:$0xf]  ;;  %v8450_v62 = vld [vmem:[#allocation5 + $0xb18] sm:$0xf0] }
 0x37b   :  { %v8453_v0 = vor.u32 %v10584_v4, %v8450_v62  ;;  %v8930_v28 = vld [vmem:[#allocation5 + $0xed8] sm:$0xf0]  ;;  %v10632_v36 = vld [vmem:[#allocation5 + $0xc8c] sm:$0xf] }
 0x37c   :  { %6445 = vmatpush.bf16.msra.mxu2 %v8373_v31  ;;  %6458 = vmatpush.bf16.msra.mxu3 %v8501_v49  ;;  %v10740_v31 = vld [vmem:[#allocation5 + $0xfec] sm:$0xf]  ;;  %v9074_v49 = vld [vmem:[#allocation5 + $0xff8] sm:$0xf0] }
 0x37d   :  { %v9077_v18 = vor.u32 %v10740_v31, %v9074_v49  ;;  %v9058_v26 = vld [vmem:[#allocation5 + $0xfd8] sm:$0xf0]  ;;  %v10664_v47 = vld [vmem:[#allocation5 + $0xd8c] sm:$0xf] }
 0x37e   :  { %6421 = vmatpush.bf16.msra.mxu0 %v8085_v19  ;;  %6434 = vmatpush.bf16.msra.mxu1 %v8213_v60  ;;  %v8786_v19 = vld [vmem:[#allocation5 + $0xdb8] sm:$0xf0]  ;;  %v10704_v60 = vld [vmem:[#allocation5 + $0xecc] sm:$0xf] }
 0x37f   :  { %v8642_v42 = vld [vmem:[#allocation5 + $0xc98] sm:$0xf0]  ;;  %v10700_v10 = vld [vmem:[#allocation5 + $0xeac] sm:$0xf] }
 0x380   :  { %6446 = vmatpush.bf16.msra.mxu2 %v8357_v27  ;;  %6459 = vmatpush.bf16.msra.mxu3 %v8485_v52  ;;  %v8661_v27 = vor.u32 %v10636_v39, %v8658_v12  ;;  %v8789_v52 = vor.u32 %v10668_v15, %v8786_v19  ;;  %v8770_v9 = vld [vmem:[#allocation5 + $0xd98] sm:$0xf0]  ;;  %v10732_v13 = vld [vmem:[#allocation5 + $0xfac] sm:$0xf] }
 0x381   :  { %v8914_v23 = vld [vmem:[#allocation5 + $0xeb8] sm:$0xf0]  ;;  %v10628_v20 = vld [vmem:[#allocation5 + $0xc6c] sm:$0xf] }
 0x382   :  { %6422 = vmatpush.bf16.msra.mxu0 %v8069_v24  ;;  %6435 = vmatpush.bf16.msra.mxu1 %v8197_v61  ;;  %v6216_v43 = vpop.f32.mrf.mxu0  ;;  %v6229_v7 = vpop.f32.mrf.mxu1  ;;  %v9042_v24 = vld [vmem:[#allocation5 + $0xfb8] sm:$0xf0]  ;;  %v10660_v50 = vld [vmem:[#allocation5 + $0xd6c] sm:$0xf] }
 0x383   :  { %v6217_v61 = vadd.f32 %v6216_v43, %v11514_v8  ;;  %v8626_v21 = vld [vmem:[#allocation5 + $0xc78] sm:$0xf0]  ;;  %v10696_v53 = vld [vmem:[#allocation5 + $0xe8c] sm:$0xf] }
 0x384   :  { %6447 = vmatpush.bf16.msra.mxu2 %v8341_v58  ;;  %6460 = vmatpush.bf16.msra.mxu3 %v8469_v40  ;;  %v8917_v58 = vor.u32 %v10700_v10, %v8914_v23  ;;  %v9045_v40 = vor.u32 %v10732_v13, %v9042_v24  ;;  %v8754_v33 = vld [vmem:[#allocation5 + $0xd78] sm:$0xf0]  ;;  %v10624_v4 = vld [vmem:[#allocation5 + $0xc4c] sm:$0xf] }
 0x385   :  { %6423 = vmatmul.bf16.vlgmr.msra.gmra.mxu0 %v11373_v5  ;;  %6436 = vmatmul.bf16.vlgmr.msra.gmra.mxu1 %v11375_v6  ;;  %v8933_v5 = vor.u32 %v10704_v60, %v8930_v28  ;;  %v9061_v6 = vor.u32 %v10736_v45, %v9058_v26  ;;  %v6230_v48 = vadd.f32 %v6229_v7, %v6217_v61  ;;  %v8898_v57 = vld [vmem:[#allocation5 + $0xe98] sm:$0xf0]  ;;  %v10656_v31 = vld [vmem:[#allocation5 + $0xd4c] sm:$0xf] }
 0x386   :  { %6467 = vmatpush.bf16.msrb.mxu0 %v8693_v17  ;;  %6480 = vmatpush.bf16.msrb.mxu1 %v8821_v46  ;;  %v8645_v17 = vor.u32 %v10632_v36, %v8642_v42  ;;  %v8773_v46 = vor.u32 %v10664_v47, %v8770_v9  ;;  %v9026_v55 = vld [vmem:[#allocation5 + $0xf98] sm:$0xf0]  ;;  %v8757_v8 = vor.u32 %v10660_v50, %v8754_v33  ;;  %v10724_v39 = vld [vmem:[#allocation5 + $0xf6c] sm:$0xf] }
 0x387   :  { %v8610_v62 = vld [vmem:[#allocation5 + $0xc58] sm:$0xf0]  ;;  %v8901_v2 = vor.u32 %v10696_v53, %v8898_v57  ;;  %v10620_v15 = vld [vmem:[#allocation5 + $0xc2c] sm:$0xf] }
 0x388   :  { %6448 = vmatpush.bf16.msra.mxu2 %v8325_v63  ;;  %6461 = vmatpush.bf16.msra.mxu3 %v8453_v0  ;;  %v8738_v49 = vld [vmem:[#allocation5 + $0xd58] sm:$0xf0]  ;;  %v10652_v45 = vld [vmem:[#allocation5 + $0xd2c] sm:$0xf] }
 0x389   :  { %v8882_v0 = vld [vmem:[#allocation5 + $0xe78] sm:$0xf0]  ;;  %v10616_v43 = vld [vmem:[#allocation5 + $0xc0c] sm:$0xf] }
 0x38a   :  { %6468 = vmatpush.bf16.msrb.mxu0 %v8677_v32  ;;  %6481 = vmatpush.bf16.msrb.mxu1 %v8805_v16  ;;  %v10692_v32 = vld [vmem:[#allocation5 + $0xe6c] sm:$0xf]  ;;  %v6218_v16 = vpop.f32.mrf.mxu0  ;;  %v6231_v63 = vpop.f32.mrf.mxu1  ;;  %v9010_v12 = vld [vmem:[#allocation5 + $0xf78] sm:$0xf0] }
 0x38b   :  { %6449 = vmatmul.bf16.vlgmr.msra.gmra.mxu2 %v11379_v37  ;;  %6462 = vmatmul.bf16.vlgmr.msra.gmra.mxu3 %v11381_v38  ;;  %v10728_v37 = vld [vmem:[#allocation5 + $0xf8c] sm:$0xf]  ;;  %v8629_v38 = vor.u32 %v10628_v20, %v8626_v21  ;;  %v8594_v19 = vld [vmem:[#allocation5 + $0xc38] sm:$0xf0]  ;;  %v8885_v60 = vor.u32 %v10692_v32, %v8882_v0  ;;  %v9013_v28 = vor.u32 %v10724_v39, %v9010_v12 }
 0x38c   :  { %6493 = vmatpush.bf16.msrb.mxu2 %v8949_v51  ;;  %6506 = vmatpush.bf16.msrb.mxu3 %v9077_v18  ;;  %v9029_v14 = vor.u32 %v10728_v37, %v9026_v55  ;;  %v8613_v51 = vor.u32 %v10624_v4, %v8610_v62  ;;  %v8741_v18 = vor.u32 %v10656_v31, %v8738_v49  ;;  %v8722_v26 = vld [vmem:[#allocation5 + $0xd38] sm:$0xf0]  ;;  %v10648_v23 = vld [vmem:[#allocation5 + $0xd0c] sm:$0xf] }
 0x38d   :  { %v8866_v42 = vld [vmem:[#allocation5 + $0xe58] sm:$0xf0]  ;;  %v8597_v9 = vor.u32 %v10620_v15, %v8594_v19  ;;  %v8725_v10 = vor.u32 %v10652_v45, %v8722_v26  ;;  %v10804_v21 = vld [vmem:[#allocation5 + $0x11ec] sm:$0xf] }
 0x38e   :  { %6469 = vmatpush.bf16.msrb.mxu0 %v8661_v27  ;;  %6482 = vmatpush.bf16.msrb.mxu1 %v8789_v52  ;;  %v10688_v27 = vld [vmem:[#allocation5 + $0xe4c] sm:$0xf]  ;;  %v6242_v52 = vpop.f32.mrf.mxu2  ;;  %v6255_v36 = vpop.f32.mrf.mxu3  ;;  %v8578_v7 = vld [vmem:[#allocation5 + $0xc18] sm:$0xf0] }
 0x38f   :  { %v6243_v47 = vadd.f32 %v6242_v52, %v6230_v48  ;;  %v8869_v24 = vor.u32 %v10688_v27, %v8866_v42  ;;  %v9202_v20 = vld [vmem:[#allocation5 + $0x10f8] sm:$0xf0]  ;;  %v10716_v50 = vld [vmem:[#allocation5 + $0xf2c] sm:$0xf]  ;;  %v8581_v53 = vor.u32 %v10616_v43, %v8578_v7 }
 0x390   :  { %6494 = vmatpush.bf16.msrb.mxu2 %v8933_v5  ;;  %6507 = vmatpush.bf16.msrb.mxu3 %v9061_v6  ;;  %v10720_v5 = vld [vmem:[#allocation5 + $0xf4c] sm:$0xf]  ;;  %v8994_v6 = vld [vmem:[#allocation5 + $0xf58] sm:$0xf0] }
 0x391   :  { %v11521_v13 = vadd.f32 %v6255_v36, %v6243_v47  ;;  %v8997_v61 = vor.u32 %v10720_v5, %v8994_v6  ;;  %v8850_v48 = vld [vmem:[#allocation5 + $0xe38] sm:$0xf0]  ;;  %v10800_v4 = vld [vmem:[#allocation5 + $0x11cc] sm:$0xf] }
 0x392   :  { %6470 = vmatpush.bf16.msrb.mxu0 %v8645_v17  ;;  %6483 = vmatpush.bf16.msrb.mxu1 %v8773_v46  ;;  %v8706_v17 = vld [vmem:[#allocation5 + $0xd18] sm:$0xf0]  ;;  %v10772_v46 = vld [vmem:[#allocation5 + $0x10ec] sm:$0xf] }
 0x393   :  { %v8978_v33 = vld [vmem:[#allocation5 + $0xf38] sm:$0xf0]  ;;  %v8709_v57 = vor.u32 %v10648_v23, %v8706_v17  ;;  %v9205_v37 = vor.u32 %v10772_v46, %v9202_v20  ;;  %v10680_v32 = vld [vmem:[#allocation5 + $0xe0c] sm:$0xf] }
 0x394   :  { %6495 = vmatpush.bf16.msrb.mxu2 %v8917_v58  ;;  %6508 = vmatpush.bf16.msrb.mxu3 %v9045_v40  ;;  %v9330_v58 = vld [vmem:[#allocation5 + $0x11f8] sm:$0xf0]  ;;  %v10684_v40 = vld [vmem:[#allocation5 + $0xe2c] sm:$0xf] }
 0x395   :  { %v9333_v55 = vor.u32 %v10804_v21, %v9330_v58  ;;  %v8853_v62 = vor.u32 %v10684_v40, %v8850_v48  ;;  %v9314_v49 = vld [vmem:[#allocation5 + $0x11d8] sm:$0xf0]  ;;  %v10712_v63 = vld [vmem:[#allocation5 + $0xf0c] sm:$0xf] }
 0x396   :  { %6471 = vmatpush.bf16.msrb.mxu0 %v8629_v38  ;;  %6484 = vmatpush.bf16.msrb.mxu1 %v8757_v8  ;;  %v10768_v38 = vld [vmem:[#allocation5 + $0x10cc] sm:$0xf]  ;;  %v9186_v8 = vld [vmem:[#allocation5 + $0x10d8] sm:$0xf0]  ;;  %v6257_v31 = vpop.f32.mrf.mxu3  ;;  %v9317_v19 = vor.u32 %v10800_v4, %v9314_v49 }
 0x397   :  { %v8834_v16 = vld [vmem:[#allocation5 + $0xe18] sm:$0xf0]  ;;  %v10836_v39 = vld [vmem:[#allocation5 + $0x12ec] sm:$0xf]  ;;  %v9189_v15 = vor.u32 %v10768_v38, %v9186_v8 }
 0x398   :  { %6496 = vmatpush.bf16.msrb.mxu2 %v8901_v2  ;;  %6509 = vmatpush.bf16.msrb.mxu3 %v9029_v14  ;;  %v8981_v2 = vor.u32 %v10716_v50, %v8978_v33  ;;  %v6244_v14 = vpop.f32.mrf.mxu2  ;;  %v8962_v0 = vld [vmem:[#allocation5 + $0xf18] sm:$0xf0]  ;;  %v10764_v45 = vld [vmem:[#allocation5 + $0x10ac] sm:$0xf] }
 0x399   :  { %v9458_v12 = vld [vmem:[#allocation5 + $0x12f8] sm:$0xf0]  ;;  %v10796_v36 = vld [vmem:[#allocation5 + $0x11ac] sm:$0xf] }
 0x39a   :  { %6472 = vmatpush.bf16.msrb.mxu0 %v8613_v51  ;;  %6485 = vmatpush.bf16.msrb.mxu1 %v8741_v18  ;;  %v10868_v51 = vld [vmem:[#allocation5 + $0x13ec] sm:$0xf]  ;;  %v9586_v18 = vld [vmem:[#allocation5 + $0x13f8] sm:$0xf0]  ;;  %v9461_v27 = vor.u32 %v10836_v39, %v9458_v12 }
 0x39b   :  { %v9170_v26 = vld [vmem:[#allocation5 + $0x10b8] sm:$0xf0]  ;;  %v9589_v52 = vor.u32 %v10868_v51, %v9586_v18  ;;  %v10832_v5 = vld [vmem:[#allocation5 + $0x12cc] sm:$0xf] }
 0x39c   :  { %6497 = vmatpush.bf16.msrb.mxu2 %v8885_v60  ;;  %6510 = vmatpush.bf16.msrb.mxu3 %v9013_v28  ;;  %v8837_v60 = vor.u32 %v10680_v32, %v8834_v16  ;;  %v8965_v28 = vor.u32 %v10712_v63, %v8962_v0  ;;  %v9298_v42 = vld [vmem:[#allocation5 + $0x11b8] sm:$0xf0]  ;;  %v10864_v47 = vld [vmem:[#allocation5 + $0x13cc] sm:$0xf] }
 0x39d   :  { %v9442_v6 = vld [vmem:[#allocation5 + $0x12d8] sm:$0xf0]  ;;  %v9301_v43 = vor.u32 %v10796_v36, %v9298_v42  ;;  %v10760_v7 = vld [vmem:[#allocation5 + $0x108c] sm:$0xf] }
 0x39e   :  { %6473 = vmatpush.bf16.msrb.mxu0 %v8597_v9  ;;  %6486 = vmatpush.bf16.msrb.mxu1 %v8725_v10  ;;  %v9570_v9 = vld [vmem:[#allocation5 + $0x13d8] sm:$0xf0]  ;;  %v9173_v10 = vor.u32 %v10764_v45, %v9170_v26  ;;  %v10828_v17 = vld [vmem:[#allocation5 + $0x12ac] sm:$0xf] }
 0x39f   :  { %v9154_v23 = vld [vmem:[#allocation5 + $0x1098] sm:$0xf0]  ;;  %v10860_v58 = vld [vmem:[#allocation5 + $0x13ac] sm:$0xf] }
 0x3a0   :  { %6498 = vmatpush.bf16.msrb.mxu2 %v8869_v24  ;;  %6511 = vmatpush.bf16.msrb.mxu3 %v8997_v61  ;;  %v10792_v24 = vld [vmem:[#allocation5 + $0x118c] sm:$0xf]  ;;  %v9282_v61 = vld [vmem:[#allocation5 + $0x1198] sm:$0xf0]  ;;  %v9157_v50 = vor.u32 %v10760_v7, %v9154_v23 }
 0x3a1   :  { %v9426_v21 = vld [vmem:[#allocation5 + $0x12b8] sm:$0xf0]  ;;  %v9285_v33 = vor.u32 %v10792_v24, %v9282_v61  ;;  %v10788_v8 = vld [vmem:[#allocation5 + $0x116c] sm:$0xf] }
 0x3a2   :  { %6474 = vmatpush.bf16.msrb.mxu0 %v8581_v53  ;;  %6487 = vmatpush.bf16.msrb.mxu1 %v8709_v57  ;;  %v6268_v46 = vpop.f32.mrf.mxu0  ;;  %v6281_v20 = vpop.f32.mrf.mxu1  ;;  %v9554_v40 = vld [vmem:[#allocation5 + $0x13b8] sm:$0xf0]  ;;  %v10756_v53 = vld [vmem:[#allocation5 + $0x106c] sm:$0xf] }
 0x3a3   :  { %v6269_v48 = vadd.f32 %v6268_v46, %v11521_v13  ;;  %v9138_v57 = vld [vmem:[#allocation5 + $0x1078] sm:$0xf0]  ;;  %v9557_v38 = vor.u32 %v10860_v58, %v9554_v40  ;;  %v10752_v31 = vld [vmem:[#allocation5 + $0x104c] sm:$0xf] }
 0x3a4   :  { %6499 = vmatpush.bf16.msrb.mxu2 %v8853_v62  ;;  %6512 = vmatpush.bf16.msrb.mxu3 %v8981_v2  ;;  %v9266_v4 = vld [vmem:[#allocation5 + $0x1178] sm:$0xf0]  ;;  %v10824_v62 = vld [vmem:[#allocation5 + $0x128c] sm:$0xf] }
 0x3a5   :  { %6475 = vmatmul.bf16.vlgmr.msrb.gmra.mxu0 %v11385_v59  ;;  %6488 = vmatmul.bf16.vlgmr.msrb.gmra.mxu1 %v11387_v1  ;;  %v9445_v59 = vor.u32 %v10832_v5, %v9442_v6  ;;  %v9573_v1 = vor.u32 %v10864_v47, %v9570_v9  ;;  %v9410_v2 = vld [vmem:[#allocation5 + $0x1298] sm:$0xf0]  ;;  %v9269_v13 = vor.u32 %v10788_v8, %v9266_v4  ;;  %v10784_v63 = vld [vmem:[#allocation5 + $0x114c] sm:$0xf] }
 0x3a6   :  { %6519 = vmatpush.bf16.msra.mxu0 %v9205_v37  ;;  %6532 = vmatpush.bf16.msra.mxu1 %v9333_v55  ;;  %v6282_v37 = vadd.f32 %v6281_v20, %v6269_v48  ;;  %v9429_v55 = vor.u32 %v10828_v17, %v9426_v21  ;;  %v9538_v14 = vld [vmem:[#allocation5 + $0x1398] sm:$0xf0]  ;;  %v9413_v32 = vor.u32 %v10824_v62, %v9410_v2  ;;  %v10820_v39 = vld [vmem:[#allocation5 + $0x126c] sm:$0xf] }
 0x3a7   :  { %v9122_v49 = vld [vmem:[#allocation5 + $0x1058] sm:$0xf0]  ;;  %v10748_v45 = vld [vmem:[#allocation5 + $0x102c] sm:$0xf] }
 0x3a8   :  { %6500 = vmatpush.bf16.msrb.mxu2 %v8837_v60  ;;  %6513 = vmatpush.bf16.msrb.mxu3 %v8965_v28  ;;  %v9250_v0 = vld [vmem:[#allocation5 + $0x1158] sm:$0xf0]  ;;  %v9125_v60 = vor.u32 %v10752_v31, %v9122_v49  ;;  %v10780_v36 = vld [vmem:[#allocation5 + $0x112c] sm:$0xf] }
 0x3a9   :  { %v9394_v18 = vld [vmem:[#allocation5 + $0x1278] sm:$0xf0]  ;;  %v9253_v28 = vor.u32 %v10784_v63, %v9250_v0  ;;  %v10816_v5 = vld [vmem:[#allocation5 + $0x124c] sm:$0xf] }
 0x3aa   :  { %6520 = vmatpush.bf16.msra.mxu0 %v9189_v15  ;;  %6533 = vmatpush.bf16.msra.mxu1 %v9317_v19  ;;  %v6270_v12 = vpop.f32.mrf.mxu0  ;;  %v6283_v51 = vpop.f32.mrf.mxu1  ;;  %v10852_v15 = vld [vmem:[#allocation5 + $0x136c] sm:$0xf]  ;;  %v9522_v19 = vld [vmem:[#allocation5 + $0x1378] sm:$0xf0] }
 0x3ab   :  { %6501 = vmatmul.bf16.vlgmr.msrb.gmra.mxu2 %v11391_v22  ;;  %6514 = vmatmul.bf16.vlgmr.msrb.gmra.mxu3 %v11393_v29  ;;  %v10856_v22 = vld [vmem:[#allocation5 + $0x138c] sm:$0xf]  ;;  %v9141_v29 = vor.u32 %v10756_v53, %v9138_v57  ;;  %v9106_v26 = vld [vmem:[#allocation5 + $0x1038] sm:$0xf0] }
 0x3ac   :  { %6545 = vmatpush.bf16.msra.mxu2 %v9461_v27  ;;  %6558 = vmatpush.bf16.msra.mxu3 %v9589_v52  ;;  %v9541_v16 = vor.u32 %v10856_v22, %v9538_v14  ;;  %v9397_v27 = vor.u32 %v10820_v39, %v9394_v18  ;;  %v9525_v52 = vor.u32 %v10852_v15, %v9522_v19  ;;  %v9234_v42 = vld [vmem:[#allocation5 + $0x1138] sm:$0xf0]  ;;  %v10776_v61 = vld [vmem:[#allocation5 + $0x110c] sm:$0xf] }
 0x3ad   :  { %v9378_v9 = vld [vmem:[#allocation5 + $0x1258] sm:$0xf0]  ;;  %v9109_v23 = vor.u32 %v10748_v45, %v9106_v26  ;;  %v10900_v58 = vld [vmem:[#allocation5 + $0x14ec] sm:$0xf] }
 0x3ae   :  { %6521 = vmatpush.bf16.msra.mxu0 %v9173_v10  ;;  %6534 = vmatpush.bf16.msra.mxu1 %v9301_v43  ;;  %v6294_v6 = vpop.f32.mrf.mxu2  ;;  %v6307_v47 = vpop.f32.mrf.mxu3  ;;  %v10848_v10 = vld [vmem:[#allocation5 + $0x134c] sm:$0xf]  ;;  %v9506_v43 = vld [vmem:[#allocation5 + $0x1358] sm:$0xf0]  ;;  %v9381_v46 = vor.u32 %v10816_v5, %v9378_v9 }
 0x3af   :  { %v6295_v7 = vadd.f32 %v6294_v6, %v6282_v37  ;;  %v9090_v24 = vld [vmem:[#allocation5 + $0x1018] sm:$0xf0]  ;;  %v9509_v20 = vor.u32 %v10848_v10, %v9506_v43  ;;  %v10932_v48 = vld [vmem:[#allocation5 + $0x15ec] sm:$0xf]  ;;  %v11051_v10 = vld [vmem:[#allocation7] sm:$0xf] }
 0x3b0   :  { %6546 = vmatpush.bf16.msra.mxu2 %v9445_v59  ;;  %6559 = vmatpush.bf16.msra.mxu3 %v9573_v1  ;;  %v9237_v59 = vor.u32 %v10780_v36, %v9234_v42  ;;  %v10744_v1 = vld [vmem:[#allocation5 + $0x100c] sm:$0xf]  ;;  %v9218_v21 = vld [vmem:[#allocation5 + $0x1118] sm:$0xf0]  ;;  %v1530_v43 = vperm.slane %v11051_v10, 3 }
 0x3b1   :  { %v11528_v17 = vadd.f32 %v6307_v47, %v6295_v7  ;;  %v9714_v40 = vld [vmem:[#allocation5 + $0x14f8] sm:$0xf0]  ;;  %v10844_v57 = vld [vmem:[#allocation5 + $0x132c] sm:$0xf] }
 0x3b2   :  { %6522 = vmatpush.bf16.msra.mxu0 %v9157_v50  ;;  %6535 = vmatpush.bf16.msra.mxu1 %v9285_v33  ;;  %v9842_v50 = vld [vmem:[#allocation5 + $0x15f8] sm:$0xf0]  ;;  %v10812_v33 = vld [vmem:[#allocation5 + $0x122c] sm:$0xf]  ;;  %v9717_v8 = vor.u32 %v10900_v58, %v9714_v40 }
 0x3b3   :  { %v9362_v53 = vld [vmem:[#allocation5 + $0x1238] sm:$0xf0]  ;;  %v9845_v4 = vor.u32 %v10932_v48, %v9842_v50  ;;  %v10896_v62 = vld [vmem:[#allocation5 + $0x14cc] sm:$0xf] }
 0x3b4   :  { %6547 = vmatpush.bf16.msra.mxu2 %v9429_v55  ;;  %6560 = vmatpush.bf16.msra.mxu3 %v9557_v38  ;;  %v9490_v37 = vld [vmem:[#allocation5 + $0x1338] sm:$0xf0]  ;;  %v9093_v55 = vor.u32 %v10744_v1, %v9090_v24  ;;  %v9221_v38 = vor.u32 %v10776_v61, %v9218_v21  ;;  %v10928_v22 = vld [vmem:[#allocation5 + $0x15cc] sm:$0xf]  ;;  %v9365_v14 = vor.u32 %v10812_v33, %v9362_v53 }
 0x3b5   :  { %v9698_v2 = vld [vmem:[#allocation5 + $0x14d8] sm:$0xf0]  ;;  %v10840_v63 = vld [vmem:[#allocation5 + $0x130c] sm:$0xf] }
 0x3b6   :  { %6523 = vmatpush.bf16.msra.mxu0 %v9141_v29  ;;  %6536 = vmatpush.bf16.msra.mxu1 %v9269_v13  ;;  %v9493_v29 = vor.u32 %v10844_v57, %v9490_v37  ;;  %v6296_v13 = vpop.f32.mrf.mxu2  ;;  %v6309_v31 = vpop.f32.mrf.mxu3  ;;  %v9826_v49 = vld [vmem:[#allocation5 + $0x15d8] sm:$0xf0]  ;;  %v10964_v39 = vld [vmem:[#allocation5 + $0x16ec] sm:$0xf]  ;;  %v9701_v15 = vor.u32 %v10896_v62, %v9698_v2 }
 0x3b7   :  { %v9474_v0 = vld [vmem:[#allocation5 + $0x1318] sm:$0xf0]  ;;  %v10996_v51 = vld [vmem:[#allocation5 + $0x17ec] sm:$0xf]  ;;  %v9829_v19 = vor.u32 %v10928_v22, %v9826_v49 }
 0x3b8   :  { %6548 = vmatpush.bf16.msra.mxu2 %v9413_v32  ;;  %6561 = vmatpush.bf16.msra.mxu3 %v9541_v16  ;;  %v10808_v32 = vld [vmem:[#allocation5 + $0x120c] sm:$0xf]  ;;  %v9346_v16 = vld [vmem:[#allocation5 + $0x1218] sm:$0xf0] }
 0x3b9   :  { %v9970_v12 = vld [vmem:[#allocation5 + $0x16f8] sm:$0xf0]  ;;  %v10892_v45 = vld [vmem:[#allocation5 + $0x14ac] sm:$0xf] }
 0x3ba   :  { %6524 = vmatpush.bf16.msra.mxu0 %v9125_v60  ;;  %6537 = vmatpush.bf16.msra.mxu1 %v9253_v28  ;;  %v10098_v18 = vld [vmem:[#allocation5 + $0x17f8] sm:$0xf0]  ;;  %v9349_v60 = vor.u32 %v10808_v32, %v9346_v16  ;;  %v9477_v28 = vor.u32 %v10840_v63, %v9474_v0  ;;  %v10924_v36 = vld [vmem:[#allocation5 + $0x15ac] sm:$0xf] }
 0x3bb   :  { %v9682_v26 = vld [vmem:[#allocation5 + $0x14b8] sm:$0xf0]  ;;  %v10960_v5 = vld [vmem:[#allocation5 + $0x16cc] sm:$0xf] }
 0x3bc   :  { %6549 = vmatpush.bf16.msra.mxu2 %v9397_v27  ;;  %6562 = vmatpush.bf16.msra.mxu3 %v9525_v52  ;;  %v9973_v27 = vor.u32 %v10964_v39, %v9970_v12  ;;  %v10101_v52 = vor.u32 %v10996_v51, %v10098_v18  ;;  %v9810_v42 = vld [vmem:[#allocation5 + $0x15b8] sm:$0xf0]  ;;  %v10992_v47 = vld [vmem:[#allocation5 + $0x17cc] sm:$0xf]  ;;  %v9685_v7 = vor.u32 %v10892_v45, %v9682_v26 }
 0x3bd   :  { %v9954_v6 = vld [vmem:[#allocation5 + $0x16d8] sm:$0xf0]  ;;  %v10920_v24 = vld [vmem:[#allocation5 + $0x158c] sm:$0xf] }
 0x3be   :  { %6525 = vmatpush.bf16.msra.mxu0 %v9109_v23  ;;  %6538 = vmatpush.bf16.msra.mxu1 %v9237_v59  ;;  %v10082_v9 = vld [vmem:[#allocation5 + $0x17d8] sm:$0xf0]  ;;  %v9813_v23 = vor.u32 %v10924_v36, %v9810_v42  ;;  %v10888_v59 = vld [vmem:[#allocation5 + $0x148c] sm:$0xf] }
 0x3bf   :  { %v10085_v1 = vor.u32 %v10992_v47, %v10082_v9  ;;  %v9794_v61 = vld [vmem:[#allocation5 + $0x1598] sm:$0xf0]  ;;  %v10988_v40 = vld [vmem:[#allocation5 + $0x17ac] sm:$0xf] }
 0x3c0   :  { %6550 = vmatpush.bf16.msra.mxu2 %v9381_v46  ;;  %6563 = vmatpush.bf16.msra.mxu3 %v9509_v20  ;;  %v10956_v46 = vld [vmem:[#allocation5 + $0x16ac] sm:$0xf]  ;;  %v9938_v58 = vld [vmem:[#allocation5 + $0x16b8] sm:$0xf0]  ;;  %v9797_v53 = vor.u32 %v10920_v24, %v9794_v61 }
 0x3c1   :  { %v10066_v48 = vld [vmem:[#allocation5 + $0x17b8] sm:$0xf0]  ;;  %v10884_v57 = vld [vmem:[#allocation5 + $0x146c] sm:$0xf] }
 0x3c2   :  { %6526 = vmatpush.bf16.msra.mxu0 %v9093_v55  ;;  %6539 = vmatpush.bf16.msra.mxu1 %v9221_v38  ;;  %v6320_v20 = vpop.f32.mrf.mxu0  ;;  %v6333_v21 = vpop.f32.mrf.mxu1  ;;  %v9650_v37 = vld [vmem:[#allocation5 + $0x1478] sm:$0xf0]  ;;  %v9941_v38 = vor.u32 %v10956_v46, %v9938_v58  ;;  %v10952_v2 = vld [vmem:[#allocation5 + $0x168c] sm:$0xf] }
 0x3c3   :  { %v6321_v50 = vadd.f32 %v6320_v20, %v1530_v43  ;;  %v9778_v62 = vld [vmem:[#allocation5 + $0x1578] sm:$0xf0]  ;;  %v10880_v13 = vld [vmem:[#allocation5 + $0x144c] sm:$0xf] }
 0x3c4   :  { %6551 = vmatpush.bf16.msra.mxu2 %v9365_v14  ;;  %6564 = vmatpush.bf16.msra.mxu3 %v9493_v29  ;;  %v9922_v22 = vld [vmem:[#allocation5 + $0x1698] sm:$0xf0]  ;;  %v10984_v14 = vld [vmem:[#allocation5 + $0x178c] sm:$0xf] }
 0x3c5   :  { %6527 = vmatmul.bf16.vlgmr.msra.gmra.mxu0 %v11397_v3  ;;  %6540 = vmatmul.bf16.vlgmr.msra.gmra.mxu1 %v11399_v11  ;;  %v9666_v3 = vld [vmem:[#allocation5 + $0x1498] sm:$0xf0]  ;;  %v9957_v11 = vor.u32 %v10960_v5, %v9954_v6  ;;  %v6334_v55 = vadd.f32 %v6333_v21, %v6321_v50  ;;  %v9925_v49 = vor.u32 %v10952_v2, %v9922_v22  ;;  %v10912_v16 = vld [vmem:[#allocation5 + $0x154c] sm:$0xf]  ;;  %v11005_v22 = vld [vmem:[#allocation8 + $0x30] sm:$0xff] }
 0x3c6   :  { %6571 = vmatpush.bf16.msrb.mxu0 %v9717_v8  ;;  %6584 = vmatpush.bf16.msrb.mxu1 %v9845_v4  ;;  %v9669_v33 = vor.u32 %v10888_v59, %v9666_v3  ;;  %v10069_v8 = vor.u32 %v10988_v40, %v10066_v48  ;;  %v10916_v4 = vld [vmem:[#allocation5 + $0x156c] sm:$0xf]  ;;  %v9634_v31 = vld [vmem:[#allocation5 + $0x1458] sm:$0xf0] }
 0x3c7   :  { %v9781_v29 = vor.u32 %v10916_v4, %v9778_v62  ;;  %v9762_v63 = vld [vmem:[#allocation5 + $0x1558] sm:$0xf0]  ;;  %v10948_v0 = vld [vmem:[#allocation5 + $0x166c] sm:$0xf] }
 0x3c8   :  { %6552 = vmatpush.bf16.msra.mxu2 %v9349_v60  ;;  %6565 = vmatpush.bf16.msra.mxu3 %v9477_v28  ;;  %v9906_v51 = vld [vmem:[#allocation5 + $0x1678] sm:$0xf0]  ;;  %v10980_v18 = vld [vmem:[#allocation5 + $0x176c] sm:$0xf]  ;;  %v9765_v60 = vor.u32 %v10912_v16, %v9762_v63 }
 0x3c9   :  { %v10876_v28 = vld [vmem:[#allocation5 + $0x142c] sm:$0xf]  ;;  %v9618_v45 = vld [vmem:[#allocation5 + $0x1438] sm:$0xf0]  ;;  %v9909_v26 = vor.u32 %v10948_v0, %v9906_v51 }
 0x3ca   :  { %6572 = vmatpush.bf16.msrb.mxu0 %v9701_v15  ;;  %6585 = vmatpush.bf16.msrb.mxu1 %v9829_v19  ;;  %v6322_v39 = vpop.f32.mrf.mxu0  ;;  %v6335_v12 = vpop.f32.mrf.mxu1  ;;  %v10034_v15 = vld [vmem:[#allocation5 + $0x1778] sm:$0xf0]  ;;  %v9637_v19 = vor.u32 %v10880_v13, %v9634_v31  ;;  %v10944_v42 = vld [vmem:[#allocation5 + $0x164c] sm:$0xf] }
 0x3cb   :  { %6553 = vmatmul.bf16.vlgmr.msra.gmra.mxu2 %v11403_v34  ;;  %6566 = vmatmul.bf16.vlgmr.msra.gmra.mxu3 %v11405_v41  ;;  %v10050_v34 = vld [vmem:[#allocation5 + $0x1798] sm:$0xf0]  ;;  %v9653_v41 = vor.u32 %v10884_v57, %v9650_v37  ;;  %v10976_v9 = vld [vmem:[#allocation5 + $0x174c] sm:$0xf] }
 0x3cc   :  { %6597 = vmatpush.bf16.msrb.mxu2 %v9973_v27  ;;  %6610 = vmatpush.bf16.msrb.mxu3 %v10101_v52  ;;  %v10053_v32 = vor.u32 %v10984_v14, %v10050_v34  ;;  %v10037_v27 = vor.u32 %v10980_v18, %v10034_v15  ;;  %v10908_v52 = vld [vmem:[#allocation5 + $0x152c] sm:$0xf]  ;;  %v9746_v36 = vld [vmem:[#allocation5 + $0x1538] sm:$0xf0]  ;;  %v11013_v14 = vld [vmem:[#allocation8 + $0x70] sm:$0xff] }
 0x3cd   :  { %v9890_v47 = vld [vmem:[#allocation5 + $0x1658] sm:$0xf0]  ;;  %v10872_v59 = vld [vmem:[#allocation5 + $0x140c] sm:$0xf]  ;;  %v11019_v18 = vld [vmem:[#allocation8 + $0xa0] sm:$0xff] }
 0x3ce   :  { %6573 = vmatpush.bf16.msrb.mxu0 %v9685_v7  ;;  %6586 = vmatpush.bf16.msrb.mxu1 %v9813_v23  ;;  %v6346_v5 = vpop.f32.mrf.mxu2  ;;  %v6359_v6 = vpop.f32.mrf.mxu3  ;;  %v10018_v10 = vld [vmem:[#allocation5 + $0x1758] sm:$0xf0]  ;;  %v9621_v7 = vor.u32 %v10876_v28, %v9618_v45  ;;  %v9749_v23 = vor.u32 %v10908_v52, %v9746_v36  ;;  %v10904_v61 = vld [vmem:[#allocation5 + $0x150c] sm:$0xf] }
 0x3cf   :  { %v6347_v43 = vadd.f32 %v6346_v5, %v6334_v55  ;;  %v9602_v24 = vld [vmem:[#allocation5 + $0x1418] sm:$0xf0]  ;;  %v10940_v20 = vld [vmem:[#allocation5 + $0x162c] sm:$0xf]  ;;  %v10999_v5 = vld [vmem:[#allocation8] sm:$0xff] }
 0x3d0   :  { %6598 = vmatpush.bf16.msrb.mxu2 %v9957_v11  ;;  %6611 = vmatpush.bf16.msrb.mxu3 %v10085_v1  ;;  %v9893_v11 = vor.u32 %v10944_v42, %v9890_v47  ;;  %v10021_v1 = vor.u32 %v10976_v9, %v10018_v10  ;;  %v9730_v46 = vld [vmem:[#allocation5 + $0x1518] sm:$0xf0]  ;;  %v10972_v58 = vld [vmem:[#allocation5 + $0x172c] sm:$0xf]  ;;  %v9605_v48 = vor.u32 %v10872_v59, %v9602_v24  ;;  %v11017_v42 = vld [vmem:[#allocation8 + $0x90] sm:$0xff]  ;;  %v6623_v47 = vmax.f32 %v11446_v44, 0.0 }
 0x3d1   :  { %v6360_v3 = vadd.f32 %v6359_v6, %v6347_v43  ;;  %v9874_v21 = vld [vmem:[#allocation5 + $0x1638] sm:$0xf0]  ;;  %v9733_v50 = vor.u32 %v10904_v61, %v9730_v46  ;;  %v10968_v62 = vld [vmem:[#allocation5 + $0x170c] sm:$0xf]  ;;  %v11007_v6 = vld [vmem:[#allocation8 + $0x40] sm:$0xff]  ;;  %v6624_v9 = vmax.f32 %v11487_v35, 0.0 }
 0x3d2   :  { %6574 = vmatpush.bf16.msrb.mxu0 %v9669_v33  ;;  %6587 = vmatpush.bf16.msrb.mxu1 %v9797_v53  ;;  %v10002_v40 = vld [vmem:[#allocation5 + $0x1738] sm:$0xf0]  ;;  %v9877_v57 = vor.u32 %v10940_v20, %v9874_v21  ;;  %v11004_v13 = vld [vmem:[#allocation8 + $0x28] sm:$0xff] }
 0x3d3   :  { %v11006_v33 = vld [vmem:[#allocation8 + $0x38] sm:$0xff]  ;;  %v10005_v37 = vor.u32 %v10972_v58, %v10002_v40  ;;  %v11012_v31 = vld [vmem:[#allocation8 + $0x68] sm:$0xff]  ;;  %v6628_v59 = vpack.c.bf16 %v6624_v9, %v6624_v9 }
 0x3d4   :  { %6599 = vmatpush.bf16.msrb.mxu2 %v9941_v38  ;;  %6612 = vmatpush.bf16.msrb.mxu3 %v10069_v8  ;;  %v11014_v53 = vld [vmem:[#allocation8 + $0x78] sm:$0xff]  ;;  %v10936_v8 = vld [vmem:[#allocation5 + $0x160c] sm:$0xf] }
 0x3d5   :  { %v9858_v4 = vld [vmem:[#allocation5 + $0x1618] sm:$0xf0]  ;;  %v11020_v39 = vld [vmem:[#allocation8 + $0xa8] sm:$0xff] }
 0x3d6   :  { %6575 = vmatpush.bf16.msrb.mxu0 %v9653_v41  ;;  %6588 = vmatpush.bf16.msrb.mxu1 %v9781_v29  ;;  %v6348_v55 = vpop.f32.mrf.mxu2  ;;  %v6361_v38 = vpop.f32.mrf.mxu3  ;;  %v9986_v2 = vld [vmem:[#allocation5 + $0x1718] sm:$0xf0]  ;;  %v9861_v34 = vor.u32 %v10936_v8, %v9858_v4  ;;  %v11008_v52 = vld [vmem:[#allocation8 + $0x48] sm:$0xff]  ;;  %v11029_v4 = vld [vmem:[#allocation8 + $0xf0] sm:$0xff] }
 0x3d7   :  { %v9989_v41 = vor.u32 %v10968_v62, %v9986_v2  ;;  %v11022_v29 = vld [vmem:[#allocation8 + $0xb8] sm:$0xff]  ;;  %v11016_v10 = vld [vmem:[#allocation8 + $0x88] sm:$0xff] }
 0x3d8   :  { %6600 = vmatpush.bf16.msrb.mxu2 %v9925_v49  ;;  %6613 = vmatpush.bf16.msrb.mxu3 %v10053_v32  ;;  %v11021_v49 = vld [vmem:[#allocation8 + $0xb0] sm:$0xff]  ;;  %v11002_v12 = vld [vmem:[#allocation8 + $0x18] sm:$0xff] }
 0x3d9   :  { %v11010_v51 = vld [vmem:[#allocation8 + $0x58] sm:$0xff] }
 0x3da   :  { %6576 = vmatpush.bf16.msrb.mxu0 %v9637_v19  ;;  %6589 = vmatpush.bf16.msrb.mxu1 %v9765_v60  ;;  %v11018_v60 = vld [vmem:[#allocation8 + $0x98] sm:$0xff] }
 0x3db   :  { %v11030_v8 = vld [vmem:[#allocation8 + $0xf8] sm:$0xff] }
 0x3dc   :  { %6601 = vmatpush.bf16.msrb.mxu2 %v9909_v26  ;;  %6614 = vmatpush.bf16.msrb.mxu3 %v10037_v27  ;;  %v11000_v27 = vld [vmem:[#allocation8 + $0x8] sm:$0xff] }
 0x3de   :  { %6577 = vmatpush.bf16.msrb.mxu0 %v9621_v7  ;;  %6590 = vmatpush.bf16.msrb.mxu1 %v9749_v23  ;;  %v6627_v23 = vpack.c.bf16 %v6623_v47, %v6623_v47 }
 0x3e0   :  { %6602 = vmatpush.bf16.msrb.mxu2 %v9893_v11  ;;  %6615 = vmatpush.bf16.msrb.mxu3 %v10021_v1  ;;  %v6625_v11 = vmax.f32 %v11528_v17, 0.0 }
 0x3e2   :  { %6578 = vmatpush.bf16.msrb.mxu0 %v9605_v48  ;;  %6591 = vmatpush.bf16.msrb.mxu1 %v9733_v50  ;;  %v6372_v32 = vpop.f32.mrf.mxu0  ;;  %v6385_v16 = vpop.f32.mrf.mxu1  ;;  %v6629_v1 = vpack.c.bf16 %v6625_v11, %v6625_v11 }
 0x3e3   :  { %v6373_v63 = vadd.f32 %v6372_v32, %v6360_v3  ;;  %v11015_v3 = vld [vmem:[#allocation8 + $0x80] sm:$0xff]  ;;  %v11024_v32 = vld [vmem:[#allocation8 + $0xc8] sm:$0xff] }
 0x3e4   :  { %6603 = vmatpush.bf16.msrb.mxu2 %v9877_v57  ;;  %6616 = vmatpush.bf16.msrb.mxu3 %v10005_v37 }
 0x3e5   :  { %6579 = vmatmul.bf16.vlgmr.msrb.gmra.mxu0 %v11409_v25  ;;  %6592 = vmatmul.bf16.vlgmr.msrb.gmra.mxu1 %v11411_v30  ;;  %v11003_v25 = vld [vmem:[#allocation8 + $0x20] sm:$0xff]  ;;  %v6386_v0 = vadd.f32 %v6385_v16, %v6373_v63 }
 0x3e6   :  { %6891 = vmatpush.bf16.msra.mxu0 %v11006_v33  ;;  %6904 = vmatpush.bf16.msra.mxu1 %v11014_v53  ;;  %v11011_v30 = vld [vmem:[#allocation8 + $0x60] sm:$0xff] }
 0x3e8   :  { %6604 = vmatpush.bf16.msrb.mxu2 %v9861_v34  ;;  %6617 = vmatpush.bf16.msrb.mxu3 %v9989_v41 }
 0x3ea   :  { %6892 = vmatpush.bf16.msra.mxu0 %v11005_v22  ;;  %6905 = vmatpush.bf16.msra.mxu1 %v11013_v14  ;;  %v6374_v15 = vpop.f32.mrf.mxu0  ;;  %v6387_v19 = vpop.f32.mrf.mxu1  ;;  %v11028_v22 = vld [vmem:[#allocation8 + $0xe8] sm:$0xff]  ;;  %v11027_v14 = vld [vmem:[#allocation8 + $0xe0] sm:$0xff] }
 0x3eb   :  { %6605 = vmatmul.bf16.vlgmr.msrb.gmra.mxu2 %v11415_v54  ;;  %6618 = vmatmul.bf16.vlgmr.msrb.gmra.mxu3 %v11417_v56  ;;  %v11001_v54 = vld [vmem:[#allocation8 + $0x10] sm:$0xff] }
 0x3ec   :  { %6917 = vmatpush.bf16.msra.mxu2 %v11022_v29  ;;  %v11009_v56 = vld [vmem:[#allocation8 + $0x50] sm:$0xff]  ;;  %6930 = vmatpush.bf16.msra.mxu3 %v11030_v8  ;;  %v11026_v29 = vld [vmem:[#allocation8 + $0xd8] sm:$0xff] }
 0x3ee   :  { %6893 = vmatpush.bf16.msra.mxu0 %v11004_v13  ;;  %6906 = vmatpush.bf16.msra.mxu1 %v11012_v31  ;;  %v6398_v28 = vpop.f32.mrf.mxu2  ;;  %v6411_v45 = vpop.f32.mrf.mxu3  ;;  %v11025_v13 = vld [vmem:[#allocation8 + $0xd0] sm:$0xff] }
 0x3ef   :  { %v6399_v26 = vadd.f32 %v6398_v28, %v6386_v0 }
 0x3f0   :  { %6918 = vmatpush.bf16.msra.mxu2 %v11021_v49  ;;  %6931 = vmatpush.bf16.msra.mxu3 %v11029_v4 }
 0x3f1   :  { %v6412_v36 = vadd.f32 %v6411_v45, %v6399_v26 }
 0x3f2   :  { %6894 = vmatpush.bf16.msra.mxu0 %v11003_v25  ;;  %6907 = vmatpush.bf16.msra.mxu1 %v11011_v30  ;;  %v11023_v30 = vld [vmem:[#allocation8 + $0xc0] sm:$0xff] }
 0x3f4   :  { %6919 = vmatpush.bf16.msra.mxu2 %v11020_v39  ;;  %6932 = vmatpush.bf16.msra.mxu3 %v11028_v22 }
 0x3f6   :  { %6895 = vmatpush.bf16.msra.mxu0 %v11002_v12  ;;  %6908 = vmatpush.bf16.msra.mxu1 %v11010_v51  ;;  %v6400_v43 = vpop.f32.mrf.mxu2  ;;  %v6413_v7 = vpop.f32.mrf.mxu3 }
 0x3f7   :  { %v11042_v7 = vld [vmem:[#allocation10] ss:$0 sm:$0xff] }
 0x3f8   :  { %6920 = vmatpush.bf16.msra.mxu2 %v11019_v18  ;;  %6933 = vmatpush.bf16.msra.mxu3 %v11027_v14 }
 0x3fa   :  { %6896 = vmatpush.bf16.msra.mxu0 %v11001_v54  ;;  %6909 = vmatpush.bf16.msra.mxu1 %v11009_v56 }
 0x3fc   :  { %6921 = vmatpush.bf16.msra.mxu2 %v11018_v60  ;;  %6934 = vmatpush.bf16.msra.mxu3 %v11026_v29 }
 0x3fe   :  { %6897 = vmatpush.bf16.msra.mxu0 %v11000_v27  ;;  %6910 = vmatpush.bf16.msra.mxu1 %v11008_v52 }
 0x400   :  { %6922 = vmatpush.bf16.msra.mxu2 %v11017_v42  ;;  %6935 = vmatpush.bf16.msra.mxu3 %v11025_v13 }
 0x402   :  { %6898 = vmatpush.bf16.msra.mxu0 %v10999_v5  ;;  %6911 = vmatpush.bf16.msra.mxu1 %v11007_v6  ;;  %v6424_v44 = vpop.f32.mrf.mxu0  ;;  %v6437_v24 = vpop.f32.mrf.mxu1 }
 0x403   :  { %v6425_v35 = vadd.f32 %v6424_v44, %v6412_v36 }
 0x404   :  { %6923 = vmatpush.bf16.msra.mxu2 %v11016_v10  ;;  %6936 = vmatpush.bf16.msra.mxu3 %v11024_v32 }
 0x405   :  { %6899 = vmatmul.bf16.vlgmr.msra.gmra.mxu0 %v6627_v23  ;;  %6912 = vmatmul.bf16.vlgmr.msra.gmra.mxu1 %v6628_v59  ;;  %v6438_v61 = vadd.f32 %v6437_v24, %v6425_v35 }
 0x408   :  { %6924 = vmatpush.bf16.msra.mxu2 %v11015_v3  ;;  %6937 = vmatpush.bf16.msra.mxu3 %v11023_v30 }
 0x40a   :  { %v6426_v46 = vpop.f32.mrf.mxu0  ;;  %v6439_v20 = vpop.f32.mrf.mxu1 }
 0x40b   :  { %6925 = vmatmul.bf16.vlgmr.msra.gmra.mxu2 %v6629_v1 }
 0x40e   :  { %v6450_v21 = vpop.f32.mrf.mxu2  ;;  %v6463_v58 = vpop.f32.mrf.mxu3 }
 0x40f   :  { %v6451_v40 = vadd.f32 %v6450_v21, %v6438_v61 }
 0x411   :  { %v6464_v48 = vadd.f32 %v6463_v58, %v6451_v40 }
 0x416   :  { %v6452_v50 = vpop.f32.mrf.mxu2  ;;  %v6465_v33 = vpop.f32.mrf.mxu3 }
 0x422   :  { %v6476_v53 = vpop.f32.mrf.mxu0  ;;  %v6489_v57 = vpop.f32.mrf.mxu1 }
 0x423   :  { %v6477_v25 = vadd.f32 %v6476_v53, %v6464_v48 }
 0x425   :  { %v6490_v0 = vadd.f32 %v6489_v57, %v6477_v25 }
 0x42a   :  { %v6478_v17 = vpop.f32.mrf.mxu0  ;;  %v6491_v37 = vpop.f32.mrf.mxu1 }
 0x42e   :  { %v6502_v55 = vpop.f32.mrf.mxu2  ;;  %v6515_v38 = vpop.f32.mrf.mxu3 }
 0x42f   :  { %v6503_v39 = vadd.f32 %v6502_v55, %v6490_v0 }
 0x431   :  { %v6516_v18 = vadd.f32 %v6515_v38, %v6503_v39 }
 0x436   :  { %v6504_v62 = vpop.f32.mrf.mxu2  ;;  %v6517_v2 = vpop.f32.mrf.mxu3 }
 0x442   :  { %v6528_v34 = vpop.f32.mrf.mxu0  ;;  %v6541_v41 = vpop.f32.mrf.mxu1 }
 0x443   :  { %v6529_v15 = vadd.f32 %v6528_v34, %v6516_v18 }
 0x445   :  { %v6542_v19 = vadd.f32 %v6541_v41, %v6529_v15 }
 0x44a   :  { %v6530_v31 = vpop.f32.mrf.mxu0  ;;  %v6543_v49 = vpop.f32.mrf.mxu1 }
 0x44e   :  { %v6554_v16 = vpop.f32.mrf.mxu2  ;;  %v6567_v63 = vpop.f32.mrf.mxu3 }
 0x44f   :  { %v6555_v60 = vadd.f32 %v6554_v16, %v6542_v19 }
 0x451   :  { %v6568_v28 = vadd.f32 %v6567_v63, %v6555_v60 }
 0x456   :  { %v6556_v12 = vpop.f32.mrf.mxu2  ;;  %v6569_v51 = vpop.f32.mrf.mxu3 }
 0x462   :  { %v6580_v54 = vpop.f32.mrf.mxu0  ;;  %v6593_v56 = vpop.f32.mrf.mxu1 }
 0x463   :  { %v6581_v45 = vadd.f32 %v6580_v54, %v6568_v28 }
 0x465   :  { %v6594_v52 = vadd.f32 %v6593_v56, %v6581_v45 }
 0x46a   :  { %v6582_v26 = vpop.f32.mrf.mxu0  ;;  %v6595_v27 = vpop.f32.mrf.mxu1 }
 0x46e   :  { %v6606_v36 = vpop.f32.mrf.mxu2  ;;  %v6619_v42 = vpop.f32.mrf.mxu3 }
 0x46f   :  { %v6607_v5 = vadd.f32 %v6606_v36, %v6594_v52 }
 0x471   :  { %v6620_v6 = vadd.f32 %v6619_v42, %v6607_v5 }
 0x473   :  { %v6626_v47 = vmax.f32 %v6620_v6, 0.0 }
 0x475   :  { %v6630_v9 = vpack.c.bf16 %v6626_v47, %v6626_v47 }
 0x476   :  { %v6608_v10 = vpop.f32.mrf.mxu2  ;;  %v6621_v43 = vpop.f32.mrf.mxu3 }
 0x477   :  { %6938 = vmatmul.bf16.vlgmr.msra.gmra.mxu3 %v6630_v9 }
 0x482   :  { %v6900_v23 = vpop.f32.mrf.mxu0  ;;  %v6913_v59 = vpop.f32.mrf.mxu1 }
 0x483   :  { %v6901_v3 = vadd.f32 %v11042_v7, %v6900_v23 }
 0x485   :  { %v6914_v11 = vadd.f32 %v6913_v59, %v6901_v3 }
 0x48a   :  { %v6902_v1 = vpop.f32.mrf.mxu0  ;;  %v6915_v44 = vpop.f32.mrf.mxu1 }
 0x48e   :  { %v6926_v24 = vpop.f32.mrf.mxu2 }
 0x48f   :  { %v6927_v35 = vadd.f32 %v6926_v24, %v6914_v11 }
 0x496   :  { %v6928_v61 = vpop.f32.mrf.mxu2 }
 0x4fa   :  { %v6939_v46 = vpop.f32.mrf.mxu3 }
 0x4fb   :  { %v6940_v20 = vadd.f32 %v6939_v46, %v6927_v35 }
 0x4fd   :  { %v10230_v21 = vmul.f32 -1.442695, %v6940_v20 }
 0x4ff   :  { %11045 = vpow2.f32 %v10230_v21 }
 0x502   :  { %v6941_v58 = vpop.f32.mrf.mxu3 }
 0x505   :  { %v11046_v40 = vpop.eup %11045 }
 0x506   :  { %v6946_v48 = vadd.f32 1.0, %v11046_v40 }
 0x508   :  { %11047 = vrcp.f32 %v6946_v48  ;;  %v6958_v57 = vand.u32 2147483648, %v6946_v48  ;;  %v6956_v37 = vand.u32 2147483647, %v6946_v48  ;;  %vm6952_vm5 = vweird.f32 %v6946_v48 }
 0x50a   :  { %v6959_v38 = vor.u32 1.1754944e-38, %v6958_v57  ;;  %vm6957_vm7 = vcmp.eq.f32.partialorder %v6956_v37, 8.507059e+37 }
 0x50e   :  { %v11048_v50 = vpop.eup %11047 }
 0x50f   :  { %v6948_v33 = vmul.f32 %v11048_v50, %v6946_v48  ;;  %vm6953_vm4 = vweird.f32 %v11048_v50 }
 0x510   :  { %vm6954_vm6 = vmor %vm6952_vm5, %vm6953_vm4 }
 0x511   :  { %v6949_v53 = vsub.f32 1.0, %v6948_v33 }
 0x513   :  { %v6950_v17 = vmul.f32 %v11048_v50, %v6949_v53 }
 0x515   :  { %v6951_v55 = vadd.f32 %v11048_v50, %v6950_v17 }
 0x517   :  { %v6955_v8 = vsel %vm6954_vm6, %v11048_v50, %v6951_v55 }
 0x518   :  { %v6960_v4 = vsel %vm6957_vm7, %v6959_v38, %v6955_v8 }
 0x519   :  { %6962 = vst [vmem:[#allocation11] sm:$0x3] %v6960_v4 }
 0x51a   :  { %6973 = dma.vmem_to_hbm [thread:$0]  %s6969_s5, 32, %s6971_s28, [#allocation4]  }
 0x51b   :  { %11202 = dma.done.wait [#allocation4], 32  }
 0x51c   :  { %11203 = vsyncadd [#allocation4], 4294967264 }
 0x51d   :  { %6978 = vsyncpa [#allocation3], 1 }
 0x51e   :  { %6979 = vsyncpa [#allocation6], 1 }
 0x51f   :  { %6980 = vsyncpa [#allocation9], 1 }
 0x520   :  { %6981 = vsyncpa [#allocation4], 1 }

</bundles_post_ra>
